<compile_context>
chip_gen: v6e
topology: v6e:2x2x1
jax: 0.10.0
libtpu: 0.0.40
codegen_flags: <defaults>
</compile_context>

<pallas_src>
import jax
import jax.numpy as jnp
from jax.experimental import pallas as pl
from jax.experimental.pallas import tpu as pltpu

# --- "config" constants implied by the module -------------------------------
PPO_CRITIC_HIDDEN_SIZE = 32
PPO_CRITIC_LAYER_COUNT = 2
NUM_CHARS = 11                     # len(OutputLang.chars)
VOCAB_SIZE = NUM_CHARS + 1         # input_size in __init__
PAD_CHAR_I = 0                     # OutputLang.pad_char_i

BLOCK_B = 128                      # batch block (lane-dense)


def _value_lstm_kernel(lengths_ref, gx_ref, whh0_ref, wf_ref, bias_ref,
                       wout_ref, bout_ref, out_ref):
    """Multi-layer LSTM recurrence + linear head, fully unrolled, state in vregs.

    Batch-on-lanes layout:
      gx_ref   : (T, 4H, B)   precomputed (x @ w_ih[0] + bias[0])^T per timestep (f32)
      whh0_ref : (4H, H)      layer-0 recurrent weight, transposed (bf16)
      wf_ref   : (L-1, 4H, 2H) fused [w_ih; w_hh]^T for layers 1..L-1 (bf16)
      bias_ref : (L-1, 4H, 1) (f32)
      wout_ref : (H, 1), bout_ref : (1, 1)
      out_ref  : (1, B)
    """
    T = gx_ref.shape[0]
    G4 = gx_ref.shape[1]
    B = gx_ref.shape[2]
    H = G4 // 4
    L = wf_ref.shape[0] + 1

    whh0 = whh0_ref[...]                               # (4H, H)  bf16
    wfs = [wf_ref[l] for l in range(L - 1)]            # (4H, 2H) bf16
    lengths = lengths_ref[...]                         # (1, B)   int32

    h = [jnp.zeros((H, B), jnp.float32) for _ in range(L)]
    c = [jnp.zeros((H, B), jnp.float32) for _ in range(L)]
    gathered = jnp.zeros((H, B), jnp.float32)

    def gate_combine(gates, c_prev):
        # gates: (4H, B), rows ordered [i | f | g | o]; slices are sublane-aligned.
        sig_if = jax.nn.sigmoid(gates[0:2 * H, :])     # i, f together
        i_g = sig_if[0:H, :]
        f_g = sig_if[H:2 * H, :]
        g_g = jnp.tanh(gates[2 * H:3 * H, :])
        o_g = jax.nn.sigmoid(gates[3 * H:4 * H, :])
        c_new = f_g * c_prev + i_g * g_g
        h_new = o_g * jnp.tanh(c_new)
        return h_new, c_new

    for t in range(T):                                 # static unroll (T small)
        # ---- layer 0: x-projection precomputed; only W_hh^T @ h on the chain.
        gates0 = gx_ref[t] + jnp.dot(whh0, h[0].astype(jnp.bfloat16),
                                     preferred_element_type=jnp.float32)
        h[0], c[0] = gate_combine(gates0, c[0])
        x = h[0]
        # ---- layers 1..L-1: single fused matmul per layer (bf16 operands).
        for l in range(1, L):                          # static unroll (L small)
            xin = jnp.concatenate([x, h[l]], axis=0).astype(jnp.bfloat16)  # (2H,B)
            gates = (jnp.dot(wfs[l - 1], xin,
                             preferred_element_type=jnp.float32)
                     + bias_ref[l - 1])                # (4H,1) column bias add
            h[l], c[l] = gate_combine(gates, c[l])
            x = h[l]
        # gather top-layer hidden state at t == length - 1
        gathered = jnp.where(lengths == (t + 1), x, gathered)

    # Linear head on VPU/XLU: (H,B)*(H,1) -> sublane reduce -> (1,B) lane-dense.
    out_ref[...] = (jnp.sum(gathered * wout_ref[...], axis=0, keepdims=True)
                    + bout_ref[...])


def value_lstm_forward(input_sequences, input_lengths, params, *, block_b=BLOCK_B):
    """input_sequences: (B, T) int32 tokens; input_lengths: (B,) int32."""
    B, T = input_sequences.shape
    H = PPO_CRITIC_HIDDEN_SIZE
    L = PPO_CRITIC_LAYER_COUNT
    G4 = 4 * H
    BB = block_b
    B_pad = pl.cdiv(B, BB) * BB

    # Fold the layer-0 input projection + bias into the embedding table, then
    # the embedding lookup *is* the projection (gather of a (VOCAB, 4H) table).
    proj_table = (params["embedding"] @ params["w_ih"][0]
                  + params["bias"][0]).astype(jnp.float32)        # (V, 4H)
    gx = jnp.take(proj_table, input_sequences, axis=0)            # (B, T, 4H)
    gx = jnp.transpose(gx, (1, 2, 0))                             # (T, 4H, B) batch-on-lanes

    # TODO(synk): length-0 sequences are clipped to 1 (PyTorch pack_padded_sequence
    # disallows length 0, so this divergence from the pure-JAX reference is benign).
    lengths = jnp.clip(input_lengths.astype(jnp.int32), 1, T).reshape(1, B)

    if B_pad != B:
        gx = jnp.pad(gx, ((0, 0), (0, 0), (0, B_pad - B)))
        lengths = jnp.pad(lengths, ((0, 0), (0, B_pad - B)), constant_values=1)

    # Pre-transposed weights for gates = W^T @ [x; h]; bf16 MXU operands.
    whh0_t = params["w_hh"][0].T.astype(jnp.bfloat16)                       # (4H, H)
    w_fused = jnp.concatenate(
        [jnp.transpose(params["w_ih"][1:], (0, 2, 1)),
         jnp.transpose(params["w_hh"][1:], (0, 2, 1))],
        axis=2).astype(jnp.bfloat16)                                        # (L-1, 4H, 2H)
    bias_rest = jnp.transpose(params["bias"][1:], (0, 2, 1))                # (L-1, 4H, 1)

    out = pl.pallas_call(
        _value_lstm_kernel,
        out_shape=jax.ShapeDtypeStruct((1, B_pad), jnp.float32),
        grid=(B_pad // BB,),
        in_specs=[
            pl.BlockSpec((1, BB), lambda b: (0, b)),                # lengths
            pl.BlockSpec((T, G4, BB), lambda b: (0, 0, b)),         # gx (contiguous slab)
            pl.BlockSpec((G4, H), lambda b: (0, 0)),                # w_hh[0]^T
            pl.BlockSpec((L - 1, G4, 2 * H), lambda b: (0, 0, 0)),  # fused [w_ih;w_hh]^T
            pl.BlockSpec((L - 1, G4, 1), lambda b: (0, 0, 0)),      # bias rest
            pl.BlockSpec((H, 1), lambda b: (0, 0)),                 # w_out
            pl.BlockSpec((1, 1), lambda b: (0, 0)),                 # b_out
        ],
        out_specs=pl.BlockSpec((1, BB), lambda b: (0, b)),
        compiler_params=pltpu.CompilerParams(
            dimension_semantics=("parallel",)),
    )(lengths, gx, whh0_t, w_fused, bias_rest, params["w_out"], params["b_out"])
    return out[0, :B].reshape(B, 1)


def init_params(key):
    H = PPO_CRITIC_HIDDEN_SIZE
    L = PPO_CRITIC_LAYER_COUNT
    k = 1.0 / jnp.sqrt(H)
    keys = jax.random.split(key, 7)

    emb = jax.random.normal(keys[0], (VOCAB_SIZE, H), jnp.float32)
    emb = emb.at[PAD_CHAR_I].set(0.0)                    # padding_idx row is zero

    # PyTorch LSTM weights: (4H, H_in); store pre-transposed as (L, H, 4H).
    w_ih = jax.random.uniform(keys[1], (L, H, 4 * H), jnp.float32, -k, k)
    w_hh = jax.random.uniform(keys[2], (L, H, 4 * H), jnp.float32, -k, k)
    b_ih = jax.random.uniform(keys[3], (L, 1, 4 * H), jnp.float32, -k, k)
    b_hh = jax.random.uniform(keys[4], (L, 1, 4 * H), jnp.float32, -k, k)

    w_out = jax.random.uniform(keys[5], (H, 1), jnp.float32, -k, k)
    b_out = jax.random.uniform(keys[6], (1, 1), jnp.float32, -k, k)

    return dict(embedding=emb, w_ih=w_ih, w_hh=w_hh, bias=b_ih + b_hh,
                w_out=w_out, b_out=b_out)


def value_lstm_reference(input_sequences, input_lengths, params):
    """Pure-JAX f32 reference for correctness checking (mirrors PyTorch forward)."""
    B, T = input_sequences.shape
    H = PPO_CRITIC_HIDDEN_SIZE
    L = PPO_CRITIC_LAYER_COUNT
    emb = jnp.take(params["embedding"], input_sequences, axis=0)   # (B, T, H)
    h = jnp.zeros((L, B, H), jnp.float32)
    c = jnp.zeros((L, B, H), jnp.float32)
    gathered = jnp.zeros((B, H), jnp.float32)
    lengths = input_lengths.astype(jnp.int32).reshape(B, 1)
    for t in range(T):
        x = emb[:, t, :]
        for l in range(L):
            gates = x @ params["w_ih"][l] + h[l] @ params["w_hh"][l] + params["bias"][l]
            i_g = jax.nn.sigmoid(gates[:, 0 * H:1 * H])
            f_g = jax.nn.sigmoid(gates[:, 1 * H:2 * H])
            g_g = jnp.tanh(gates[:, 2 * H:3 * H])
            o_g = jax.nn.sigmoid(gates[:, 3 * H:4 * H])
            c_new = f_g * c[l] + i_g * g_g
            h_new = o_g * jnp.tanh(c_new)
            h = h.at[l].set(h_new)
            c = c.at[l].set(c_new)
            x = h_new
        gathered = jnp.where(lengths == (t + 1), x, gathered)
    return gathered @ params["w_out"] + params["b_out"]


if __name__ == "__main__":
    key = jax.random.PRNGKey(0)
    k_param, k_tok = jax.random.split(key)

    B, T = 4, 8
    params = init_params(k_param)
    input_sequences = jax.random.randint(k_tok, (B, T), 1, VOCAB_SIZE, jnp.int32)
    input_lengths = jnp.array([8, 3, 5, 1], dtype=jnp.int32)
    # zero out padded positions with the pad token (as a padded batch would have)
    pos = jnp.arange(T)[None, :]
    input_sequences = jnp.where(pos < input_lengths[:, None], input_sequences, PAD_CHAR_I)

    out = value_lstm_forward(input_sequences, input_lengths, params)
    out = jax.block_until_ready(out)

    ref = value_lstm_reference(input_sequences, input_lengths, params)
    assert out.shape == (B, 1)
    # bf16 MXU operands (f32 accumulation) vs. exact-f32 reference -> loosened tol.
    assert jnp.allclose(out, ref, atol=5e-2, rtol=5e-2), (out, ref)

    print("KERNEL_OK")
</pallas_src>

<mosaic_0001>
module attributes {stable_mosaic.version = 11 : i64} {
  func.func @_value_lstm_kernel(%arg0: i32, %arg1: memref<1x128xi32, #tpu.memory_space<vmem>>, %arg2: memref<8x128x128xf32, #tpu.memory_space<vmem>>, %arg3: memref<128x32xbf16, #tpu.memory_space<vmem>>, %arg4: memref<1x128x64xbf16, #tpu.memory_space<vmem>>, %arg5: memref<1x128x1xf32, #tpu.memory_space<vmem>>, %arg6: memref<32x1xf32, #tpu.memory_space<vmem>>, %arg7: memref<1x1xf32, #tpu.memory_space<vmem>>, %arg8: memref<1x128xf32, #tpu.memory_space<vmem>>) attributes {dimension_semantics = [#tpu.dimension_semantics<parallel>], iteration_bounds = array<i64: 1>, scalar_prefetch = 0 : i64, scratch_operands = 0 : i64, tpu.core_type = #tpu.core_type<tc>, window_params = [{transform_indices = @transform_0, window_bounds = array<i64: 1, 128>}, {transform_indices = @transform_1, window_bounds = array<i64: 8, 128, 128>}, {pipeline_mode = #tpu.pipeline_mode<synchronous>, transform_indices = @transform_2, window_bounds = array<i64: 128, 32>}, {pipeline_mode = #tpu.pipeline_mode<synchronous>, transform_indices = @transform_3, window_bounds = array<i64: 1, 128, 64>}, {pipeline_mode = #tpu.pipeline_mode<synchronous>, transform_indices = @transform_4, window_bounds = array<i64: 1, 128, 1>}, {pipeline_mode = #tpu.pipeline_mode<synchronous>, transform_indices = @transform_5, window_bounds = array<i64: 32, 1>}, {pipeline_mode = #tpu.pipeline_mode<synchronous>, transform_indices = @transform_6, window_bounds = array<i64: 1, 1>}, {transform_indices = @transform_7, window_bounds = array<i64: 1, 128>}]} {
    %c0 = arith.constant 0 : index
    %c0_0 = arith.constant 0 : index
    %0 = vector.load %arg3[%c0, %c0_0] : memref<128x32xbf16, #tpu.memory_space<vmem>>, vector<128x32xbf16>
    %c0_1 = arith.constant 0 : index
    %c0_2 = arith.constant 0 : index
    %c0_3 = arith.constant 0 : index
    %1 = vector.load %arg4[%c0_1, %c0_2, %c0_3] : memref<1x128x64xbf16, #tpu.memory_space<vmem>>, vector<1x128x64xbf16>
    %2 = vector.shape_cast %1 : vector<1x128x64xbf16> to vector<128x64xbf16>
    %c0_4 = arith.constant 0 : index
    %c0_5 = arith.constant 0 : index
    %3 = vector.load %arg1[%c0_4, %c0_5] : memref<1x128xi32, #tpu.memory_space<vmem>>, vector<1x128xi32>
    %cst = arith.constant 0.000000e+00 : f32
    %4 = vector.broadcast %cst : f32 to vector<32x128xf32>
    %cst_6 = arith.constant 0.000000e+00 : f32
    %5 = vector.broadcast %cst_6 : f32 to vector<32x128xf32>
    %cst_7 = arith.constant 0.000000e+00 : f32
    %6 = vector.broadcast %cst_7 : f32 to vector<32x128xf32>
    %cst_8 = arith.constant 0.000000e+00 : f32
    %7 = vector.broadcast %cst_8 : f32 to vector<32x128xf32>
    %cst_9 = arith.constant 0.000000e+00 : f32
    %8 = vector.broadcast %cst_9 : f32 to vector<32x128xf32>
    %c0_10 = arith.constant 0 : index
    %c0_11 = arith.constant 0 : index
    %c0_12 = arith.constant 0 : index
    %9 = vector.load %arg2[%c0_10, %c0_11, %c0_12] : memref<8x128x128xf32, #tpu.memory_space<vmem>>, vector<1x128x128xf32>
    %10 = vector.shape_cast %9 : vector<1x128x128xf32> to vector<128x128xf32>
    %11 = arith.truncf %4 : vector<32x128xf32> to vector<32x128xbf16>
    %cst_13 = arith.constant dense<0.000000e+00> : vector<128x128xf32>
    %12 = tpu.matmul %0, %11, %cst_13 {dimension_numbers = #tpu.dot_dimension_numbers<[1], [0], [0], [1], [0, 0, 1, 1], [], []>} : vector<128x32xbf16>, vector<32x128xbf16>, vector<128x128xf32> -> vector<128x128xf32>
    %13 = arith.addf %10, %12 : vector<128x128xf32>
    %14 = vector.extract_strided_slice %13 {offsets = [0, 0], sizes = [64, 128], strides = [1, 1]} : vector<128x128xf32> to vector<64x128xf32>
    %15 = arith.negf %14 : vector<64x128xf32>
    %16 = math.exp %15 : vector<64x128xf32>
    %cst_14 = arith.constant 1.000000e+00 : f32
    %17 = vector.broadcast %cst_14 : f32 to vector<64x128xf32>
    %18 = arith.addf %17, %16 : vector<64x128xf32>
    %19 = arith.divf %17, %18 : vector<64x128xf32>
    %20 = vector.extract_strided_slice %19 {offsets = [0, 0], sizes = [32, 128], strides = [1, 1]} : vector<64x128xf32> to vector<32x128xf32>
    %21 = vector.extract_strided_slice %19 {offsets = [32, 0], sizes = [32, 128], strides = [1, 1]} : vector<64x128xf32> to vector<32x128xf32>
    %22 = vector.extract_strided_slice %13 {offsets = [64, 0], sizes = [32, 128], strides = [1, 1]} : vector<128x128xf32> to vector<32x128xf32>
    %23 = math.tanh %22 : vector<32x128xf32>
    %24 = vector.extract_strided_slice %13 {offsets = [96, 0], sizes = [32, 128], strides = [1, 1]} : vector<128x128xf32> to vector<32x128xf32>
    %25 = arith.negf %24 : vector<32x128xf32>
    %26 = math.exp %25 : vector<32x128xf32>
    %cst_15 = arith.constant 1.000000e+00 : f32
    %27 = vector.broadcast %cst_15 : f32 to vector<32x128xf32>
    %28 = arith.addf %27, %26 : vector<32x128xf32>
    %29 = arith.divf %27, %28 : vector<32x128xf32>
    %30 = arith.mulf %21, %6 : vector<32x128xf32>
    %31 = arith.mulf %20, %23 : vector<32x128xf32>
    %32 = arith.addf %30, %31 : vector<32x128xf32>
    %33 = math.tanh %32 : vector<32x128xf32>
    %34 = arith.mulf %29, %33 : vector<32x128xf32>
    %35 = tpu.concatenate %34, %5 in 0 : vector<32x128xf32>, vector<32x128xf32> -> vector<64x128xf32>
    %36 = arith.truncf %35 : vector<64x128xf32> to vector<64x128xbf16>
    %cst_16 = arith.constant dense<0.000000e+00> : vector<128x128xf32>
    %37 = tpu.matmul %2, %36, %cst_16 {dimension_numbers = #tpu.dot_dimension_numbers<[1], [0], [0], [1], [0, 0, 1, 1], [], []>} : vector<128x64xbf16>, vector<64x128xbf16>, vector<128x128xf32> -> vector<128x128xf32>
    %c0_17 = arith.constant 0 : index
    %c0_18 = arith.constant 0 : index
    %c0_19 = arith.constant 0 : index
    %38 = vector.load %arg5[%c0_17, %c0_18, %c0_19] : memref<1x128x1xf32, #tpu.memory_space<vmem>>, vector<1x128x1xf32>
    %39 = vector.shape_cast %38 : vector<1x128x1xf32> to vector<128x1xf32>
    %40 = vector.broadcast %39 : vector<128x1xf32> to vector<128x128xf32>
    %41 = arith.addf %37, %40 : vector<128x128xf32>
    %42 = vector.extract_strided_slice %41 {offsets = [0, 0], sizes = [64, 128], strides = [1, 1]} : vector<128x128xf32> to vector<64x128xf32>
    %43 = arith.negf %42 : vector<64x128xf32>
    %44 = math.exp %43 : vector<64x128xf32>
    %cst_20 = arith.constant 1.000000e+00 : f32
    %45 = vector.broadcast %cst_20 : f32 to vector<64x128xf32>
    %46 = arith.addf %45, %44 : vector<64x128xf32>
    %47 = arith.divf %45, %46 : vector<64x128xf32>
    %48 = vector.extract_strided_slice %47 {offsets = [0, 0], sizes = [32, 128], strides = [1, 1]} : vector<64x128xf32> to vector<32x128xf32>
    %49 = vector.extract_strided_slice %47 {offsets = [32, 0], sizes = [32, 128], strides = [1, 1]} : vector<64x128xf32> to vector<32x128xf32>
    %50 = vector.extract_strided_slice %41 {offsets = [64, 0], sizes = [32, 128], strides = [1, 1]} : vector<128x128xf32> to vector<32x128xf32>
    %51 = math.tanh %50 : vector<32x128xf32>
    %52 = vector.extract_strided_slice %41 {offsets = [96, 0], sizes = [32, 128], strides = [1, 1]} : vector<128x128xf32> to vector<32x128xf32>
    %53 = arith.negf %52 : vector<32x128xf32>
    %54 = math.exp %53 : vector<32x128xf32>
    %cst_21 = arith.constant 1.000000e+00 : f32
    %55 = vector.broadcast %cst_21 : f32 to vector<32x128xf32>
    %56 = arith.addf %55, %54 : vector<32x128xf32>
    %57 = arith.divf %55, %56 : vector<32x128xf32>
    %58 = arith.mulf %49, %7 : vector<32x128xf32>
    %59 = arith.mulf %48, %51 : vector<32x128xf32>
    %60 = arith.addf %58, %59 : vector<32x128xf32>
    %61 = math.tanh %60 : vector<32x128xf32>
    %62 = arith.mulf %57, %61 : vector<32x128xf32>
    %c1_i32 = arith.constant 1 : i32
    %63 = vector.broadcast %c1_i32 : i32 to vector<1x128xi32>
    %64 = arith.cmpi eq, %3, %63 : vector<1x128xi32>
    %65 = vector.shape_cast %64 : vector<1x128xi1> to vector<1x128xi1>
    %66 = vector.broadcast %65 : vector<1x128xi1> to vector<32x128xi1>
    %67 = arith.select %66, %62, %8 : vector<32x128xi1>, vector<32x128xf32>
    %c1 = arith.constant 1 : index
    %c0_22 = arith.constant 0 : index
    %c0_23 = arith.constant 0 : index
    %68 = vector.load %arg2[%c1, %c0_22, %c0_23] : memref<8x128x128xf32, #tpu.memory_space<vmem>>, vector<1x128x128xf32>
    %69 = vector.shape_cast %68 : vector<1x128x128xf32> to vector<128x128xf32>
    %70 = arith.truncf %34 : vector<32x128xf32> to vector<32x128xbf16>
    %cst_24 = arith.constant dense<0.000000e+00> : vector<128x128xf32>
    %71 = tpu.matmul %0, %70, %cst_24 {dimension_numbers = #tpu.dot_dimension_numbers<[1], [0], [0], [1], [0, 0, 1, 1], [], []>} : vector<128x32xbf16>, vector<32x128xbf16>, vector<128x128xf32> -> vector<128x128xf32>
    %72 = arith.addf %69, %71 : vector<128x128xf32>
    %73 = vector.extract_strided_slice %72 {offsets = [0, 0], sizes = [64, 128], strides = [1, 1]} : vector<128x128xf32> to vector<64x128xf32>
    %74 = arith.negf %73 : vector<64x128xf32>
    %75 = math.exp %74 : vector<64x128xf32>
    %cst_25 = arith.constant 1.000000e+00 : f32
    %76 = vector.broadcast %cst_25 : f32 to vector<64x128xf32>
    %77 = arith.addf %76, %75 : vector<64x128xf32>
    %78 = arith.divf %76, %77 : vector<64x128xf32>
    %79 = vector.extract_strided_slice %78 {offsets = [0, 0], sizes = [32, 128], strides = [1, 1]} : vector<64x128xf32> to vector<32x128xf32>
    %80 = vector.extract_strided_slice %78 {offsets = [32, 0], sizes = [32, 128], strides = [1, 1]} : vector<64x128xf32> to vector<32x128xf32>
    %81 = vector.extract_strided_slice %72 {offsets = [64, 0], sizes = [32, 128], strides = [1, 1]} : vector<128x128xf32> to vector<32x128xf32>
    %82 = math.tanh %81 : vector<32x128xf32>
    %83 = vector.extract_strided_slice %72 {offsets = [96, 0], sizes = [32, 128], strides = [1, 1]} : vector<128x128xf32> to vector<32x128xf32>
    %84 = arith.negf %83 : vector<32x128xf32>
    %85 = math.exp %84 : vector<32x128xf32>
    %cst_26 = arith.constant 1.000000e+00 : f32
    %86 = vector.broadcast %cst_26 : f32 to vector<32x128xf32>
    %87 = arith.addf %86, %85 : vector<32x128xf32>
    %88 = arith.divf %86, %87 : vector<32x128xf32>
    %89 = arith.mulf %80, %32 : vector<32x128xf32>
    %90 = arith.mulf %79, %82 : vector<32x128xf32>
    %91 = arith.addf %89, %90 : vector<32x128xf32>
    %92 = math.tanh %91 : vector<32x128xf32>
    %93 = arith.mulf %88, %92 : vector<32x128xf32>
    %94 = tpu.concatenate %93, %62 in 0 : vector<32x128xf32>, vector<32x128xf32> -> vector<64x128xf32>
    %95 = arith.truncf %94 : vector<64x128xf32> to vector<64x128xbf16>
    %cst_27 = arith.constant dense<0.000000e+00> : vector<128x128xf32>
    %96 = tpu.matmul %2, %95, %cst_27 {dimension_numbers = #tpu.dot_dimension_numbers<[1], [0], [0], [1], [0, 0, 1, 1], [], []>} : vector<128x64xbf16>, vector<64x128xbf16>, vector<128x128xf32> -> vector<128x128xf32>
    %c0_28 = arith.constant 0 : index
    %c0_29 = arith.constant 0 : index
    %c0_30 = arith.constant 0 : index
    %97 = vector.load %arg5[%c0_28, %c0_29, %c0_30] : memref<1x128x1xf32, #tpu.memory_space<vmem>>, vector<1x128x1xf32>
    %98 = vector.shape_cast %97 : vector<1x128x1xf32> to vector<128x1xf32>
    %99 = vector.broadcast %98 : vector<128x1xf32> to vector<128x128xf32>
    %100 = arith.addf %96, %99 : vector<128x128xf32>
    %101 = vector.extract_strided_slice %100 {offsets = [0, 0], sizes = [64, 128], strides = [1, 1]} : vector<128x128xf32> to vector<64x128xf32>
    %102 = arith.negf %101 : vector<64x128xf32>
    %103 = math.exp %102 : vector<64x128xf32>
    %cst_31 = arith.constant 1.000000e+00 : f32
    %104 = vector.broadcast %cst_31 : f32 to vector<64x128xf32>
    %105 = arith.addf %104, %103 : vector<64x128xf32>
    %106 = arith.divf %104, %105 : vector<64x128xf32>
    %107 = vector.extract_strided_slice %106 {offsets = [0, 0], sizes = [32, 128], strides = [1, 1]} : vector<64x128xf32> to vector<32x128xf32>
    %108 = vector.extract_strided_slice %106 {offsets = [32, 0], sizes = [32, 128], strides = [1, 1]} : vector<64x128xf32> to vector<32x128xf32>
    %109 = vector.extract_strided_slice %100 {offsets = [64, 0], sizes = [32, 128], strides = [1, 1]} : vector<128x128xf32> to vector<32x128xf32>
    %110 = math.tanh %109 : vector<32x128xf32>
    %111 = vector.extract_strided_slice %100 {offsets = [96, 0], sizes = [32, 128], strides = [1, 1]} : vector<128x128xf32> to vector<32x128xf32>
    %112 = arith.negf %111 : vector<32x128xf32>
    %113 = math.exp %112 : vector<32x128xf32>
    %cst_32 = arith.constant 1.000000e+00 : f32
    %114 = vector.broadcast %cst_32 : f32 to vector<32x128xf32>
    %115 = arith.addf %114, %113 : vector<32x128xf32>
    %116 = arith.divf %114, %115 : vector<32x128xf32>
    %117 = arith.mulf %108, %60 : vector<32x128xf32>
    %118 = arith.mulf %107, %110 : vector<32x128xf32>
    %119 = arith.addf %117, %118 : vector<32x128xf32>
    %120 = math.tanh %119 : vector<32x128xf32>
    %121 = arith.mulf %116, %120 : vector<32x128xf32>
    %c2_i32 = arith.constant 2 : i32
    %122 = vector.broadcast %c2_i32 : i32 to vector<1x128xi32>
    %123 = arith.cmpi eq, %3, %122 : vector<1x128xi32>
    %124 = vector.shape_cast %123 : vector<1x128xi1> to vector<1x128xi1>
    %125 = vector.broadcast %124 : vector<1x128xi1> to vector<32x128xi1>
    %126 = arith.select %125, %121, %67 : vector<32x128xi1>, vector<32x128xf32>
    %c2 = arith.constant 2 : index
    %c0_33 = arith.constant 0 : index
    %c0_34 = arith.constant 0 : index
    %127 = vector.load %arg2[%c2, %c0_33, %c0_34] : memref<8x128x128xf32, #tpu.memory_space<vmem>>, vector<1x128x128xf32>
    %128 = vector.shape_cast %127 : vector<1x128x128xf32> to vector<128x128xf32>
    %129 = arith.truncf %93 : vector<32x128xf32> to vector<32x128xbf16>
    %cst_35 = arith.constant dense<0.000000e+00> : vector<128x128xf32>
    %130 = tpu.matmul %0, %129, %cst_35 {dimension_numbers = #tpu.dot_dimension_numbers<[1], [0], [0], [1], [0, 0, 1, 1], [], []>} : vector<128x32xbf16>, vector<32x128xbf16>, vector<128x128xf32> -> vector<128x128xf32>
    %131 = arith.addf %128, %130 : vector<128x128xf32>
    %132 = vector.extract_strided_slice %131 {offsets = [0, 0], sizes = [64, 128], strides = [1, 1]} : vector<128x128xf32> to vector<64x128xf32>
    %133 = arith.negf %132 : vector<64x128xf32>
    %134 = math.exp %133 : vector<64x128xf32>
    %cst_36 = arith.constant 1.000000e+00 : f32
    %135 = vector.broadcast %cst_36 : f32 to vector<64x128xf32>
    %136 = arith.addf %135, %134 : vector<64x128xf32>
    %137 = arith.divf %135, %136 : vector<64x128xf32>
    %138 = vector.extract_strided_slice %137 {offsets = [0, 0], sizes = [32, 128], strides = [1, 1]} : vector<64x128xf32> to vector<32x128xf32>
    %139 = vector.extract_strided_slice %137 {offsets = [32, 0], sizes = [32, 128], strides = [1, 1]} : vector<64x128xf32> to vector<32x128xf32>
    %140 = vector.extract_strided_slice %131 {offsets = [64, 0], sizes = [32, 128], strides = [1, 1]} : vector<128x128xf32> to vector<32x128xf32>
    %141 = math.tanh %140 : vector<32x128xf32>
    %142 = vector.extract_strided_slice %131 {offsets = [96, 0], sizes = [32, 128], strides = [1, 1]} : vector<128x128xf32> to vector<32x128xf32>
    %143 = arith.negf %142 : vector<32x128xf32>
    %144 = math.exp %143 : vector<32x128xf32>
    %cst_37 = arith.constant 1.000000e+00 : f32
    %145 = vector.broadcast %cst_37 : f32 to vector<32x128xf32>
    %146 = arith.addf %145, %144 : vector<32x128xf32>
    %147 = arith.divf %145, %146 : vector<32x128xf32>
    %148 = arith.mulf %139, %91 : vector<32x128xf32>
    %149 = arith.mulf %138, %141 : vector<32x128xf32>
    %150 = arith.addf %148, %149 : vector<32x128xf32>
    %151 = math.tanh %150 : vector<32x128xf32>
    %152 = arith.mulf %147, %151 : vector<32x128xf32>
    %153 = tpu.concatenate %152, %121 in 0 : vector<32x128xf32>, vector<32x128xf32> -> vector<64x128xf32>
    %154 = arith.truncf %153 : vector<64x128xf32> to vector<64x128xbf16>
    %cst_38 = arith.constant dense<0.000000e+00> : vector<128x128xf32>
    %155 = tpu.matmul %2, %154, %cst_38 {dimension_numbers = #tpu.dot_dimension_numbers<[1], [0], [0], [1], [0, 0, 1, 1], [], []>} : vector<128x64xbf16>, vector<64x128xbf16>, vector<128x128xf32> -> vector<128x128xf32>
    %c0_39 = arith.constant 0 : index
    %c0_40 = arith.constant 0 : index
    %c0_41 = arith.constant 0 : index
    %156 = vector.load %arg5[%c0_39, %c0_40, %c0_41] : memref<1x128x1xf32, #tpu.memory_space<vmem>>, vector<1x128x1xf32>
    %157 = vector.shape_cast %156 : vector<1x128x1xf32> to vector<128x1xf32>
    %158 = vector.broadcast %157 : vector<128x1xf32> to vector<128x128xf32>
    %159 = arith.addf %155, %158 : vector<128x128xf32>
    %160 = vector.extract_strided_slice %159 {offsets = [0, 0], sizes = [64, 128], strides = [1, 1]} : vector<128x128xf32> to vector<64x128xf32>
    %161 = arith.negf %160 : vector<64x128xf32>
    %162 = math.exp %161 : vector<64x128xf32>
    %cst_42 = arith.constant 1.000000e+00 : f32
    %163 = vector.broadcast %cst_42 : f32 to vector<64x128xf32>
    %164 = arith.addf %163, %162 : vector<64x128xf32>
    %165 = arith.divf %163, %164 : vector<64x128xf32>
    %166 = vector.extract_strided_slice %165 {offsets = [0, 0], sizes = [32, 128], strides = [1, 1]} : vector<64x128xf32> to vector<32x128xf32>
    %167 = vector.extract_strided_slice %165 {offsets = [32, 0], sizes = [32, 128], strides = [1, 1]} : vector<64x128xf32> to vector<32x128xf32>
    %168 = vector.extract_strided_slice %159 {offsets = [64, 0], sizes = [32, 128], strides = [1, 1]} : vector<128x128xf32> to vector<32x128xf32>
    %169 = math.tanh %168 : vector<32x128xf32>
    %170 = vector.extract_strided_slice %159 {offsets = [96, 0], sizes = [32, 128], strides = [1, 1]} : vector<128x128xf32> to vector<32x128xf32>
    %171 = arith.negf %170 : vector<32x128xf32>
    %172 = math.exp %171 : vector<32x128xf32>
    %cst_43 = arith.constant 1.000000e+00 : f32
    %173 = vector.broadcast %cst_43 : f32 to vector<32x128xf32>
    %174 = arith.addf %173, %172 : vector<32x128xf32>
    %175 = arith.divf %173, %174 : vector<32x128xf32>
    %176 = arith.mulf %167, %119 : vector<32x128xf32>
    %177 = arith.mulf %166, %169 : vector<32x128xf32>
    %178 = arith.addf %176, %177 : vector<32x128xf32>
    %179 = math.tanh %178 : vector<32x128xf32>
    %180 = arith.mulf %175, %179 : vector<32x128xf32>
    %c3_i32 = arith.constant 3 : i32
    %181 = vector.broadcast %c3_i32 : i32 to vector<1x128xi32>
    %182 = arith.cmpi eq, %3, %181 : vector<1x128xi32>
    %183 = vector.shape_cast %182 : vector<1x128xi1> to vector<1x128xi1>
    %184 = vector.broadcast %183 : vector<1x128xi1> to vector<32x128xi1>
    %185 = arith.select %184, %180, %126 : vector<32x128xi1>, vector<32x128xf32>
    %c3 = arith.constant 3 : index
    %c0_44 = arith.constant 0 : index
    %c0_45 = arith.constant 0 : index
    %186 = vector.load %arg2[%c3, %c0_44, %c0_45] : memref<8x128x128xf32, #tpu.memory_space<vmem>>, vector<1x128x128xf32>
    %187 = vector.shape_cast %186 : vector<1x128x128xf32> to vector<128x128xf32>
    %188 = arith.truncf %152 : vector<32x128xf32> to vector<32x128xbf16>
    %cst_46 = arith.constant dense<0.000000e+00> : vector<128x128xf32>
    %189 = tpu.matmul %0, %188, %cst_46 {dimension_numbers = #tpu.dot_dimension_numbers<[1], [0], [0], [1], [0, 0, 1, 1], [], []>} : vector<128x32xbf16>, vector<32x128xbf16>, vector<128x128xf32> -> vector<128x128xf32>
    %190 = arith.addf %187, %189 : vector<128x128xf32>
    %191 = vector.extract_strided_slice %190 {offsets = [0, 0], sizes = [64, 128], strides = [1, 1]} : vector<128x128xf32> to vector<64x128xf32>
    %192 = arith.negf %191 : vector<64x128xf32>
    %193 = math.exp %192 : vector<64x128xf32>
    %cst_47 = arith.constant 1.000000e+00 : f32
    %194 = vector.broadcast %cst_47 : f32 to vector<64x128xf32>
    %195 = arith.addf %194, %193 : vector<64x128xf32>
    %196 = arith.divf %194, %195 : vector<64x128xf32>
    %197 = vector.extract_strided_slice %196 {offsets = [0, 0], sizes = [32, 128], strides = [1, 1]} : vector<64x128xf32> to vector<32x128xf32>
    %198 = vector.extract_strided_slice %196 {offsets = [32, 0], sizes = [32, 128], strides = [1, 1]} : vector<64x128xf32> to vector<32x128xf32>
    %199 = vector.extract_strided_slice %190 {offsets = [64, 0], sizes = [32, 128], strides = [1, 1]} : vector<128x128xf32> to vector<32x128xf32>
    %200 = math.tanh %199 : vector<32x128xf32>
    %201 = vector.extract_strided_slice %190 {offsets = [96, 0], sizes = [32, 128], strides = [1, 1]} : vector<128x128xf32> to vector<32x128xf32>
    %202 = arith.negf %201 : vector<32x128xf32>
    %203 = math.exp %202 : vector<32x128xf32>
    %cst_48 = arith.constant 1.000000e+00 : f32
    %204 = vector.broadcast %cst_48 : f32 to vector<32x128xf32>
    %205 = arith.addf %204, %203 : vector<32x128xf32>
    %206 = arith.divf %204, %205 : vector<32x128xf32>
    %207 = arith.mulf %198, %150 : vector<32x128xf32>
    %208 = arith.mulf %197, %200 : vector<32x128xf32>
    %209 = arith.addf %207, %208 : vector<32x128xf32>
    %210 = math.tanh %209 : vector<32x128xf32>
    %211 = arith.mulf %206, %210 : vector<32x128xf32>
    %212 = tpu.concatenate %211, %180 in 0 : vector<32x128xf32>, vector<32x128xf32> -> vector<64x128xf32>
    %213 = arith.truncf %212 : vector<64x128xf32> to vector<64x128xbf16>
    %cst_49 = arith.constant dense<0.000000e+00> : vector<128x128xf32>
    %214 = tpu.matmul %2, %213, %cst_49 {dimension_numbers = #tpu.dot_dimension_numbers<[1], [0], [0], [1], [0, 0, 1, 1], [], []>} : vector<128x64xbf16>, vector<64x128xbf16>, vector<128x128xf32> -> vector<128x128xf32>
    %c0_50 = arith.constant 0 : index
    %c0_51 = arith.constant 0 : index
    %c0_52 = arith.constant 0 : index
    %215 = vector.load %arg5[%c0_50, %c0_51, %c0_52] : memref<1x128x1xf32, #tpu.memory_space<vmem>>, vector<1x128x1xf32>
    %216 = vector.shape_cast %215 : vector<1x128x1xf32> to vector<128x1xf32>
    %217 = vector.broadcast %216 : vector<128x1xf32> to vector<128x128xf32>
    %218 = arith.addf %214, %217 : vector<128x128xf32>
    %219 = vector.extract_strided_slice %218 {offsets = [0, 0], sizes = [64, 128], strides = [1, 1]} : vector<128x128xf32> to vector<64x128xf32>
    %220 = arith.negf %219 : vector<64x128xf32>
    %221 = math.exp %220 : vector<64x128xf32>
    %cst_53 = arith.constant 1.000000e+00 : f32
    %222 = vector.broadcast %cst_53 : f32 to vector<64x128xf32>
    %223 = arith.addf %222, %221 : vector<64x128xf32>
    %224 = arith.divf %222, %223 : vector<64x128xf32>
    %225 = vector.extract_strided_slice %224 {offsets = [0, 0], sizes = [32, 128], strides = [1, 1]} : vector<64x128xf32> to vector<32x128xf32>
    %226 = vector.extract_strided_slice %224 {offsets = [32, 0], sizes = [32, 128], strides = [1, 1]} : vector<64x128xf32> to vector<32x128xf32>
    %227 = vector.extract_strided_slice %218 {offsets = [64, 0], sizes = [32, 128], strides = [1, 1]} : vector<128x128xf32> to vector<32x128xf32>
    %228 = math.tanh %227 : vector<32x128xf32>
    %229 = vector.extract_strided_slice %218 {offsets = [96, 0], sizes = [32, 128], strides = [1, 1]} : vector<128x128xf32> to vector<32x128xf32>
    %230 = arith.negf %229 : vector<32x128xf32>
    %231 = math.exp %230 : vector<32x128xf32>
    %cst_54 = arith.constant 1.000000e+00 : f32
    %232 = vector.broadcast %cst_54 : f32 to vector<32x128xf32>
    %233 = arith.addf %232, %231 : vector<32x128xf32>
    %234 = arith.divf %232, %233 : vector<32x128xf32>
    %235 = arith.mulf %226, %178 : vector<32x128xf32>
    %236 = arith.mulf %225, %228 : vector<32x128xf32>
    %237 = arith.addf %235, %236 : vector<32x128xf32>
    %238 = math.tanh %237 : vector<32x128xf32>
    %239 = arith.mulf %234, %238 : vector<32x128xf32>
    %c4_i32 = arith.constant 4 : i32
    %240 = vector.broadcast %c4_i32 : i32 to vector<1x128xi32>
    %241 = arith.cmpi eq, %3, %240 : vector<1x128xi32>
    %242 = vector.shape_cast %241 : vector<1x128xi1> to vector<1x128xi1>
    %243 = vector.broadcast %242 : vector<1x128xi1> to vector<32x128xi1>
    %244 = arith.select %243, %239, %185 : vector<32x128xi1>, vector<32x128xf32>
    %c4 = arith.constant 4 : index
    %c0_55 = arith.constant 0 : index
    %c0_56 = arith.constant 0 : index
    %245 = vector.load %arg2[%c4, %c0_55, %c0_56] : memref<8x128x128xf32, #tpu.memory_space<vmem>>, vector<1x128x128xf32>
    %246 = vector.shape_cast %245 : vector<1x128x128xf32> to vector<128x128xf32>
    %247 = arith.truncf %211 : vector<32x128xf32> to vector<32x128xbf16>
    %cst_57 = arith.constant dense<0.000000e+00> : vector<128x128xf32>
    %248 = tpu.matmul %0, %247, %cst_57 {dimension_numbers = #tpu.dot_dimension_numbers<[1], [0], [0], [1], [0, 0, 1, 1], [], []>} : vector<128x32xbf16>, vector<32x128xbf16>, vector<128x128xf32> -> vector<128x128xf32>
    %249 = arith.addf %246, %248 : vector<128x128xf32>
    %250 = vector.extract_strided_slice %249 {offsets = [0, 0], sizes = [64, 128], strides = [1, 1]} : vector<128x128xf32> to vector<64x128xf32>
    %251 = arith.negf %250 : vector<64x128xf32>
    %252 = math.exp %251 : vector<64x128xf32>
    %cst_58 = arith.constant 1.000000e+00 : f32
    %253 = vector.broadcast %cst_58 : f32 to vector<64x128xf32>
    %254 = arith.addf %253, %252 : vector<64x128xf32>
    %255 = arith.divf %253, %254 : vector<64x128xf32>
    %256 = vector.extract_strided_slice %255 {offsets = [0, 0], sizes = [32, 128], strides = [1, 1]} : vector<64x128xf32> to vector<32x128xf32>
    %257 = vector.extract_strided_slice %255 {offsets = [32, 0], sizes = [32, 128], strides = [1, 1]} : vector<64x128xf32> to vector<32x128xf32>
    %258 = vector.extract_strided_slice %249 {offsets = [64, 0], sizes = [32, 128], strides = [1, 1]} : vector<128x128xf32> to vector<32x128xf32>
    %259 = math.tanh %258 : vector<32x128xf32>
    %260 = vector.extract_strided_slice %249 {offsets = [96, 0], sizes = [32, 128], strides = [1, 1]} : vector<128x128xf32> to vector<32x128xf32>
    %261 = arith.negf %260 : vector<32x128xf32>
    %262 = math.exp %261 : vector<32x128xf32>
    %cst_59 = arith.constant 1.000000e+00 : f32
    %263 = vector.broadcast %cst_59 : f32 to vector<32x128xf32>
    %264 = arith.addf %263, %262 : vector<32x128xf32>
    %265 = arith.divf %263, %264 : vector<32x128xf32>
    %266 = arith.mulf %257, %209 : vector<32x128xf32>
    %267 = arith.mulf %256, %259 : vector<32x128xf32>
    %268 = arith.addf %266, %267 : vector<32x128xf32>
    %269 = math.tanh %268 : vector<32x128xf32>
    %270 = arith.mulf %265, %269 : vector<32x128xf32>
    %271 = tpu.concatenate %270, %239 in 0 : vector<32x128xf32>, vector<32x128xf32> -> vector<64x128xf32>
    %272 = arith.truncf %271 : vector<64x128xf32> to vector<64x128xbf16>
    %cst_60 = arith.constant dense<0.000000e+00> : vector<128x128xf32>
    %273 = tpu.matmul %2, %272, %cst_60 {dimension_numbers = #tpu.dot_dimension_numbers<[1], [0], [0], [1], [0, 0, 1, 1], [], []>} : vector<128x64xbf16>, vector<64x128xbf16>, vector<128x128xf32> -> vector<128x128xf32>
    %c0_61 = arith.constant 0 : index
    %c0_62 = arith.constant 0 : index
    %c0_63 = arith.constant 0 : index
    %274 = vector.load %arg5[%c0_61, %c0_62, %c0_63] : memref<1x128x1xf32, #tpu.memory_space<vmem>>, vector<1x128x1xf32>
    %275 = vector.shape_cast %274 : vector<1x128x1xf32> to vector<128x1xf32>
    %276 = vector.broadcast %275 : vector<128x1xf32> to vector<128x128xf32>
    %277 = arith.addf %273, %276 : vector<128x128xf32>
    %278 = vector.extract_strided_slice %277 {offsets = [0, 0], sizes = [64, 128], strides = [1, 1]} : vector<128x128xf32> to vector<64x128xf32>
    %279 = arith.negf %278 : vector<64x128xf32>
    %280 = math.exp %279 : vector<64x128xf32>
    %cst_64 = arith.constant 1.000000e+00 : f32
    %281 = vector.broadcast %cst_64 : f32 to vector<64x128xf32>
    %282 = arith.addf %281, %280 : vector<64x128xf32>
    %283 = arith.divf %281, %282 : vector<64x128xf32>
    %284 = vector.extract_strided_slice %283 {offsets = [0, 0], sizes = [32, 128], strides = [1, 1]} : vector<64x128xf32> to vector<32x128xf32>
    %285 = vector.extract_strided_slice %283 {offsets = [32, 0], sizes = [32, 128], strides = [1, 1]} : vector<64x128xf32> to vector<32x128xf32>
    %286 = vector.extract_strided_slice %277 {offsets = [64, 0], sizes = [32, 128], strides = [1, 1]} : vector<128x128xf32> to vector<32x128xf32>
    %287 = math.tanh %286 : vector<32x128xf32>
    %288 = vector.extract_strided_slice %277 {offsets = [96, 0], sizes = [32, 128], strides = [1, 1]} : vector<128x128xf32> to vector<32x128xf32>
    %289 = arith.negf %288 : vector<32x128xf32>
    %290 = math.exp %289 : vector<32x128xf32>
    %cst_65 = arith.constant 1.000000e+00 : f32
    %291 = vector.broadcast %cst_65 : f32 to vector<32x128xf32>
    %292 = arith.addf %291, %290 : vector<32x128xf32>
    %293 = arith.divf %291, %292 : vector<32x128xf32>
    %294 = arith.mulf %285, %237 : vector<32x128xf32>
    %295 = arith.mulf %284, %287 : vector<32x128xf32>
    %296 = arith.addf %294, %295 : vector<32x128xf32>
    %297 = math.tanh %296 : vector<32x128xf32>
    %298 = arith.mulf %293, %297 : vector<32x128xf32>
    %c5_i32 = arith.constant 5 : i32
    %299 = vector.broadcast %c5_i32 : i32 to vector<1x128xi32>
    %300 = arith.cmpi eq, %3, %299 : vector<1x128xi32>
    %301 = vector.shape_cast %300 : vector<1x128xi1> to vector<1x128xi1>
    %302 = vector.broadcast %301 : vector<1x128xi1> to vector<32x128xi1>
    %303 = arith.select %302, %298, %244 : vector<32x128xi1>, vector<32x128xf32>
    %c5 = arith.constant 5 : index
    %c0_66 = arith.constant 0 : index
    %c0_67 = arith.constant 0 : index
    %304 = vector.load %arg2[%c5, %c0_66, %c0_67] : memref<8x128x128xf32, #tpu.memory_space<vmem>>, vector<1x128x128xf32>
    %305 = vector.shape_cast %304 : vector<1x128x128xf32> to vector<128x128xf32>
    %306 = arith.truncf %270 : vector<32x128xf32> to vector<32x128xbf16>
    %cst_68 = arith.constant dense<0.000000e+00> : vector<128x128xf32>
    %307 = tpu.matmul %0, %306, %cst_68 {dimension_numbers = #tpu.dot_dimension_numbers<[1], [0], [0], [1], [0, 0, 1, 1], [], []>} : vector<128x32xbf16>, vector<32x128xbf16>, vector<128x128xf32> -> vector<128x128xf32>
    %308 = arith.addf %305, %307 : vector<128x128xf32>
    %309 = vector.extract_strided_slice %308 {offsets = [0, 0], sizes = [64, 128], strides = [1, 1]} : vector<128x128xf32> to vector<64x128xf32>
    %310 = arith.negf %309 : vector<64x128xf32>
    %311 = math.exp %310 : vector<64x128xf32>
    %cst_69 = arith.constant 1.000000e+00 : f32
    %312 = vector.broadcast %cst_69 : f32 to vector<64x128xf32>
    %313 = arith.addf %312, %311 : vector<64x128xf32>
    %314 = arith.divf %312, %313 : vector<64x128xf32>
    %315 = vector.extract_strided_slice %314 {offsets = [0, 0], sizes = [32, 128], strides = [1, 1]} : vector<64x128xf32> to vector<32x128xf32>
    %316 = vector.extract_strided_slice %314 {offsets = [32, 0], sizes = [32, 128], strides = [1, 1]} : vector<64x128xf32> to vector<32x128xf32>
    %317 = vector.extract_strided_slice %308 {offsets = [64, 0], sizes = [32, 128], strides = [1, 1]} : vector<128x128xf32> to vector<32x128xf32>
    %318 = math.tanh %317 : vector<32x128xf32>
    %319 = vector.extract_strided_slice %308 {offsets = [96, 0], sizes = [32, 128], strides = [1, 1]} : vector<128x128xf32> to vector<32x128xf32>
    %320 = arith.negf %319 : vector<32x128xf32>
    %321 = math.exp %320 : vector<32x128xf32>
    %cst_70 = arith.constant 1.000000e+00 : f32
    %322 = vector.broadcast %cst_70 : f32 to vector<32x128xf32>
    %323 = arith.addf %322, %321 : vector<32x128xf32>
    %324 = arith.divf %322, %323 : vector<32x128xf32>
    %325 = arith.mulf %316, %268 : vector<32x128xf32>
    %326 = arith.mulf %315, %318 : vector<32x128xf32>
    %327 = arith.addf %325, %326 : vector<32x128xf32>
    %328 = math.tanh %327 : vector<32x128xf32>
    %329 = arith.mulf %324, %328 : vector<32x128xf32>
    %330 = tpu.concatenate %329, %298 in 0 : vector<32x128xf32>, vector<32x128xf32> -> vector<64x128xf32>
    %331 = arith.truncf %330 : vector<64x128xf32> to vector<64x128xbf16>
    %cst_71 = arith.constant dense<0.000000e+00> : vector<128x128xf32>
    %332 = tpu.matmul %2, %331, %cst_71 {dimension_numbers = #tpu.dot_dimension_numbers<[1], [0], [0], [1], [0, 0, 1, 1], [], []>} : vector<128x64xbf16>, vector<64x128xbf16>, vector<128x128xf32> -> vector<128x128xf32>
    %c0_72 = arith.constant 0 : index
    %c0_73 = arith.constant 0 : index
    %c0_74 = arith.constant 0 : index
    %333 = vector.load %arg5[%c0_72, %c0_73, %c0_74] : memref<1x128x1xf32, #tpu.memory_space<vmem>>, vector<1x128x1xf32>
    %334 = vector.shape_cast %333 : vector<1x128x1xf32> to vector<128x1xf32>
    %335 = vector.broadcast %334 : vector<128x1xf32> to vector<128x128xf32>
    %336 = arith.addf %332, %335 : vector<128x128xf32>
    %337 = vector.extract_strided_slice %336 {offsets = [0, 0], sizes = [64, 128], strides = [1, 1]} : vector<128x128xf32> to vector<64x128xf32>
    %338 = arith.negf %337 : vector<64x128xf32>
    %339 = math.exp %338 : vector<64x128xf32>
    %cst_75 = arith.constant 1.000000e+00 : f32
    %340 = vector.broadcast %cst_75 : f32 to vector<64x128xf32>
    %341 = arith.addf %340, %339 : vector<64x128xf32>
    %342 = arith.divf %340, %341 : vector<64x128xf32>
    %343 = vector.extract_strided_slice %342 {offsets = [0, 0], sizes = [32, 128], strides = [1, 1]} : vector<64x128xf32> to vector<32x128xf32>
    %344 = vector.extract_strided_slice %342 {offsets = [32, 0], sizes = [32, 128], strides = [1, 1]} : vector<64x128xf32> to vector<32x128xf32>
    %345 = vector.extract_strided_slice %336 {offsets = [64, 0], sizes = [32, 128], strides = [1, 1]} : vector<128x128xf32> to vector<32x128xf32>
    %346 = math.tanh %345 : vector<32x128xf32>
    %347 = vector.extract_strided_slice %336 {offsets = [96, 0], sizes = [32, 128], strides = [1, 1]} : vector<128x128xf32> to vector<32x128xf32>
    %348 = arith.negf %347 : vector<32x128xf32>
    %349 = math.exp %348 : vector<32x128xf32>
    %cst_76 = arith.constant 1.000000e+00 : f32
    %350 = vector.broadcast %cst_76 : f32 to vector<32x128xf32>
    %351 = arith.addf %350, %349 : vector<32x128xf32>
    %352 = arith.divf %350, %351 : vector<32x128xf32>
    %353 = arith.mulf %344, %296 : vector<32x128xf32>
    %354 = arith.mulf %343, %346 : vector<32x128xf32>
    %355 = arith.addf %353, %354 : vector<32x128xf32>
    %356 = math.tanh %355 : vector<32x128xf32>
    %357 = arith.mulf %352, %356 : vector<32x128xf32>
    %c6_i32 = arith.constant 6 : i32
    %358 = vector.broadcast %c6_i32 : i32 to vector<1x128xi32>
    %359 = arith.cmpi eq, %3, %358 : vector<1x128xi32>
    %360 = vector.shape_cast %359 : vector<1x128xi1> to vector<1x128xi1>
    %361 = vector.broadcast %360 : vector<1x128xi1> to vector<32x128xi1>
    %362 = arith.select %361, %357, %303 : vector<32x128xi1>, vector<32x128xf32>
    %c6 = arith.constant 6 : index
    %c0_77 = arith.constant 0 : index
    %c0_78 = arith.constant 0 : index
    %363 = vector.load %arg2[%c6, %c0_77, %c0_78] : memref<8x128x128xf32, #tpu.memory_space<vmem>>, vector<1x128x128xf32>
    %364 = vector.shape_cast %363 : vector<1x128x128xf32> to vector<128x128xf32>
    %365 = arith.truncf %329 : vector<32x128xf32> to vector<32x128xbf16>
    %cst_79 = arith.constant dense<0.000000e+00> : vector<128x128xf32>
    %366 = tpu.matmul %0, %365, %cst_79 {dimension_numbers = #tpu.dot_dimension_numbers<[1], [0], [0], [1], [0, 0, 1, 1], [], []>} : vector<128x32xbf16>, vector<32x128xbf16>, vector<128x128xf32> -> vector<128x128xf32>
    %367 = arith.addf %364, %366 : vector<128x128xf32>
    %368 = vector.extract_strided_slice %367 {offsets = [0, 0], sizes = [64, 128], strides = [1, 1]} : vector<128x128xf32> to vector<64x128xf32>
    %369 = arith.negf %368 : vector<64x128xf32>
    %370 = math.exp %369 : vector<64x128xf32>
    %cst_80 = arith.constant 1.000000e+00 : f32
    %371 = vector.broadcast %cst_80 : f32 to vector<64x128xf32>
    %372 = arith.addf %371, %370 : vector<64x128xf32>
    %373 = arith.divf %371, %372 : vector<64x128xf32>
    %374 = vector.extract_strided_slice %373 {offsets = [0, 0], sizes = [32, 128], strides = [1, 1]} : vector<64x128xf32> to vector<32x128xf32>
    %375 = vector.extract_strided_slice %373 {offsets = [32, 0], sizes = [32, 128], strides = [1, 1]} : vector<64x128xf32> to vector<32x128xf32>
    %376 = vector.extract_strided_slice %367 {offsets = [64, 0], sizes = [32, 128], strides = [1, 1]} : vector<128x128xf32> to vector<32x128xf32>
    %377 = math.tanh %376 : vector<32x128xf32>
    %378 = vector.extract_strided_slice %367 {offsets = [96, 0], sizes = [32, 128], strides = [1, 1]} : vector<128x128xf32> to vector<32x128xf32>
    %379 = arith.negf %378 : vector<32x128xf32>
    %380 = math.exp %379 : vector<32x128xf32>
    %cst_81 = arith.constant 1.000000e+00 : f32
    %381 = vector.broadcast %cst_81 : f32 to vector<32x128xf32>
    %382 = arith.addf %381, %380 : vector<32x128xf32>
    %383 = arith.divf %381, %382 : vector<32x128xf32>
    %384 = arith.mulf %375, %327 : vector<32x128xf32>
    %385 = arith.mulf %374, %377 : vector<32x128xf32>
    %386 = arith.addf %384, %385 : vector<32x128xf32>
    %387 = math.tanh %386 : vector<32x128xf32>
    %388 = arith.mulf %383, %387 : vector<32x128xf32>
    %389 = tpu.concatenate %388, %357 in 0 : vector<32x128xf32>, vector<32x128xf32> -> vector<64x128xf32>
    %390 = arith.truncf %389 : vector<64x128xf32> to vector<64x128xbf16>
    %cst_82 = arith.constant dense<0.000000e+00> : vector<128x128xf32>
    %391 = tpu.matmul %2, %390, %cst_82 {dimension_numbers = #tpu.dot_dimension_numbers<[1], [0], [0], [1], [0, 0, 1, 1], [], []>} : vector<128x64xbf16>, vector<64x128xbf16>, vector<128x128xf32> -> vector<128x128xf32>
    %c0_83 = arith.constant 0 : index
    %c0_84 = arith.constant 0 : index
    %c0_85 = arith.constant 0 : index
    %392 = vector.load %arg5[%c0_83, %c0_84, %c0_85] : memref<1x128x1xf32, #tpu.memory_space<vmem>>, vector<1x128x1xf32>
    %393 = vector.shape_cast %392 : vector<1x128x1xf32> to vector<128x1xf32>
    %394 = vector.broadcast %393 : vector<128x1xf32> to vector<128x128xf32>
    %395 = arith.addf %391, %394 : vector<128x128xf32>
    %396 = vector.extract_strided_slice %395 {offsets = [0, 0], sizes = [64, 128], strides = [1, 1]} : vector<128x128xf32> to vector<64x128xf32>
    %397 = arith.negf %396 : vector<64x128xf32>
    %398 = math.exp %397 : vector<64x128xf32>
    %cst_86 = arith.constant 1.000000e+00 : f32
    %399 = vector.broadcast %cst_86 : f32 to vector<64x128xf32>
    %400 = arith.addf %399, %398 : vector<64x128xf32>
    %401 = arith.divf %399, %400 : vector<64x128xf32>
    %402 = vector.extract_strided_slice %401 {offsets = [0, 0], sizes = [32, 128], strides = [1, 1]} : vector<64x128xf32> to vector<32x128xf32>
    %403 = vector.extract_strided_slice %401 {offsets = [32, 0], sizes = [32, 128], strides = [1, 1]} : vector<64x128xf32> to vector<32x128xf32>
    %404 = vector.extract_strided_slice %395 {offsets = [64, 0], sizes = [32, 128], strides = [1, 1]} : vector<128x128xf32> to vector<32x128xf32>
    %405 = math.tanh %404 : vector<32x128xf32>
    %406 = vector.extract_strided_slice %395 {offsets = [96, 0], sizes = [32, 128], strides = [1, 1]} : vector<128x128xf32> to vector<32x128xf32>
    %407 = arith.negf %406 : vector<32x128xf32>
    %408 = math.exp %407 : vector<32x128xf32>
    %cst_87 = arith.constant 1.000000e+00 : f32
    %409 = vector.broadcast %cst_87 : f32 to vector<32x128xf32>
    %410 = arith.addf %409, %408 : vector<32x128xf32>
    %411 = arith.divf %409, %410 : vector<32x128xf32>
    %412 = arith.mulf %403, %355 : vector<32x128xf32>
    %413 = arith.mulf %402, %405 : vector<32x128xf32>
    %414 = arith.addf %412, %413 : vector<32x128xf32>
    %415 = math.tanh %414 : vector<32x128xf32>
    %416 = arith.mulf %411, %415 : vector<32x128xf32>
    %c7_i32 = arith.constant 7 : i32
    %417 = vector.broadcast %c7_i32 : i32 to vector<1x128xi32>
    %418 = arith.cmpi eq, %3, %417 : vector<1x128xi32>
    %419 = vector.shape_cast %418 : vector<1x128xi1> to vector<1x128xi1>
    %420 = vector.broadcast %419 : vector<1x128xi1> to vector<32x128xi1>
    %421 = arith.select %420, %416, %362 : vector<32x128xi1>, vector<32x128xf32>
    %c7 = arith.constant 7 : index
    %c0_88 = arith.constant 0 : index
    %c0_89 = arith.constant 0 : index
    %422 = vector.load %arg2[%c7, %c0_88, %c0_89] : memref<8x128x128xf32, #tpu.memory_space<vmem>>, vector<1x128x128xf32>
    %423 = vector.shape_cast %422 : vector<1x128x128xf32> to vector<128x128xf32>
    %424 = arith.truncf %388 : vector<32x128xf32> to vector<32x128xbf16>
    %cst_90 = arith.constant dense<0.000000e+00> : vector<128x128xf32>
    %425 = tpu.matmul %0, %424, %cst_90 {dimension_numbers = #tpu.dot_dimension_numbers<[1], [0], [0], [1], [0, 0, 1, 1], [], []>} : vector<128x32xbf16>, vector<32x128xbf16>, vector<128x128xf32> -> vector<128x128xf32>
    %426 = arith.addf %423, %425 : vector<128x128xf32>
    %427 = vector.extract_strided_slice %426 {offsets = [0, 0], sizes = [64, 128], strides = [1, 1]} : vector<128x128xf32> to vector<64x128xf32>
    %428 = arith.negf %427 : vector<64x128xf32>
    %429 = math.exp %428 : vector<64x128xf32>
    %cst_91 = arith.constant 1.000000e+00 : f32
    %430 = vector.broadcast %cst_91 : f32 to vector<64x128xf32>
    %431 = arith.addf %430, %429 : vector<64x128xf32>
    %432 = arith.divf %430, %431 : vector<64x128xf32>
    %433 = vector.extract_strided_slice %432 {offsets = [0, 0], sizes = [32, 128], strides = [1, 1]} : vector<64x128xf32> to vector<32x128xf32>
    %434 = vector.extract_strided_slice %432 {offsets = [32, 0], sizes = [32, 128], strides = [1, 1]} : vector<64x128xf32> to vector<32x128xf32>
    %435 = vector.extract_strided_slice %426 {offsets = [64, 0], sizes = [32, 128], strides = [1, 1]} : vector<128x128xf32> to vector<32x128xf32>
    %436 = math.tanh %435 : vector<32x128xf32>
    %437 = vector.extract_strided_slice %426 {offsets = [96, 0], sizes = [32, 128], strides = [1, 1]} : vector<128x128xf32> to vector<32x128xf32>
    %438 = arith.negf %437 : vector<32x128xf32>
    %439 = math.exp %438 : vector<32x128xf32>
    %cst_92 = arith.constant 1.000000e+00 : f32
    %440 = vector.broadcast %cst_92 : f32 to vector<32x128xf32>
    %441 = arith.addf %440, %439 : vector<32x128xf32>
    %442 = arith.divf %440, %441 : vector<32x128xf32>
    %443 = arith.mulf %434, %386 : vector<32x128xf32>
    %444 = arith.mulf %433, %436 : vector<32x128xf32>
    %445 = arith.addf %443, %444 : vector<32x128xf32>
    %446 = math.tanh %445 : vector<32x128xf32>
    %447 = arith.mulf %442, %446 : vector<32x128xf32>
    %448 = tpu.concatenate %447, %416 in 0 : vector<32x128xf32>, vector<32x128xf32> -> vector<64x128xf32>
    %449 = arith.truncf %448 : vector<64x128xf32> to vector<64x128xbf16>
    %cst_93 = arith.constant dense<0.000000e+00> : vector<128x128xf32>
    %450 = tpu.matmul %2, %449, %cst_93 {dimension_numbers = #tpu.dot_dimension_numbers<[1], [0], [0], [1], [0, 0, 1, 1], [], []>} : vector<128x64xbf16>, vector<64x128xbf16>, vector<128x128xf32> -> vector<128x128xf32>
    %c0_94 = arith.constant 0 : index
    %c0_95 = arith.constant 0 : index
    %c0_96 = arith.constant 0 : index
    %451 = vector.load %arg5[%c0_94, %c0_95, %c0_96] : memref<1x128x1xf32, #tpu.memory_space<vmem>>, vector<1x128x1xf32>
    %452 = vector.shape_cast %451 : vector<1x128x1xf32> to vector<128x1xf32>
    %453 = vector.broadcast %452 : vector<128x1xf32> to vector<128x128xf32>
    %454 = arith.addf %450, %453 : vector<128x128xf32>
    %455 = vector.extract_strided_slice %454 {offsets = [0, 0], sizes = [64, 128], strides = [1, 1]} : vector<128x128xf32> to vector<64x128xf32>
    %456 = arith.negf %455 : vector<64x128xf32>
    %457 = math.exp %456 : vector<64x128xf32>
    %cst_97 = arith.constant 1.000000e+00 : f32
    %458 = vector.broadcast %cst_97 : f32 to vector<64x128xf32>
    %459 = arith.addf %458, %457 : vector<64x128xf32>
    %460 = arith.divf %458, %459 : vector<64x128xf32>
    %461 = vector.extract_strided_slice %460 {offsets = [0, 0], sizes = [32, 128], strides = [1, 1]} : vector<64x128xf32> to vector<32x128xf32>
    %462 = vector.extract_strided_slice %460 {offsets = [32, 0], sizes = [32, 128], strides = [1, 1]} : vector<64x128xf32> to vector<32x128xf32>
    %463 = vector.extract_strided_slice %454 {offsets = [64, 0], sizes = [32, 128], strides = [1, 1]} : vector<128x128xf32> to vector<32x128xf32>
    %464 = math.tanh %463 : vector<32x128xf32>
    %465 = vector.extract_strided_slice %454 {offsets = [96, 0], sizes = [32, 128], strides = [1, 1]} : vector<128x128xf32> to vector<32x128xf32>
    %466 = arith.negf %465 : vector<32x128xf32>
    %467 = math.exp %466 : vector<32x128xf32>
    %cst_98 = arith.constant 1.000000e+00 : f32
    %468 = vector.broadcast %cst_98 : f32 to vector<32x128xf32>
    %469 = arith.addf %468, %467 : vector<32x128xf32>
    %470 = arith.divf %468, %469 : vector<32x128xf32>
    %471 = arith.mulf %462, %414 : vector<32x128xf32>
    %472 = arith.mulf %461, %464 : vector<32x128xf32>
    %473 = arith.addf %471, %472 : vector<32x128xf32>
    %474 = math.tanh %473 : vector<32x128xf32>
    %475 = arith.mulf %470, %474 : vector<32x128xf32>
    %c8_i32 = arith.constant 8 : i32
    %476 = vector.broadcast %c8_i32 : i32 to vector<1x128xi32>
    %477 = arith.cmpi eq, %3, %476 : vector<1x128xi32>
    %478 = vector.shape_cast %477 : vector<1x128xi1> to vector<1x128xi1>
    %479 = vector.broadcast %478 : vector<1x128xi1> to vector<32x128xi1>
    %480 = arith.select %479, %475, %421 : vector<32x128xi1>, vector<32x128xf32>
    %c0_99 = arith.constant 0 : index
    %c0_100 = arith.constant 0 : index
    %481 = vector.load %arg6[%c0_99, %c0_100] : memref<32x1xf32, #tpu.memory_space<vmem>>, vector<32x1xf32>
    %482 = vector.broadcast %481 : vector<32x1xf32> to vector<32x128xf32>
    %483 = arith.mulf %480, %482 : vector<32x128xf32>
    %cst_101 = arith.constant dense<0.000000e+00> : vector<128xf32>
    %484 = vector.multi_reduction <add>, %483, %cst_101 [0] : vector<32x128xf32> to vector<128xf32>
    %485 = vector.shape_cast %484 : vector<128xf32> to vector<1x128xf32>
    %c0_102 = arith.constant 0 : index
    %c0_103 = arith.constant 0 : index
    %486 = vector.load %arg7[%c0_102, %c0_103] : memref<1x1xf32, #tpu.memory_space<vmem>>, vector<1x1xf32>
    %487 = vector.broadcast %486 : vector<1x1xf32> to vector<1x128xf32>
    %488 = arith.addf %485, %487 : vector<1x128xf32>
    %c0_104 = arith.constant 0 : index
    %c0_105 = arith.constant 0 : index
    %489 = vector.load %arg8[%c0_104, %c0_105] : memref<1x128xf32, #tpu.memory_space<vmem>>, vector<1x128xf32>
    tpu.vector_store %arg8[%c0_104, %c0_105], %488 {strides = array<i32>} : memref<1x128xf32, #tpu.memory_space<vmem>>, vector<1x128xf32>,
    return
  }
  func.func @transform_0(%arg0: i32) -> (i32, i32) {
    %c0_i32 = arith.constant 0 : i32
    %c0_i32_0 = arith.constant 0 : i32
    return %c0_i32, %arg0 : i32, i32
  }
  func.func @transform_1(%arg0: i32) -> (i32, i32, i32) {
    %c0_i32 = arith.constant 0 : i32
    %c0_i32_0 = arith.constant 0 : i32
    %c0_i32_1 = arith.constant 0 : i32
    return %c0_i32, %c0_i32_0, %arg0 : i32, i32, i32
  }
  func.func @transform_2(%arg0: i32) -> (i32, i32) {
    %c0_i32 = arith.constant 0 : i32
    %c0_i32_0 = arith.constant 0 : i32
    %c0_i32_1 = arith.constant 0 : i32
    return %c0_i32, %c0_i32_0 : i32, i32
  }
  func.func @transform_3(%arg0: i32) -> (i32, i32, i32) {
    %c0_i32 = arith.constant 0 : i32
    %c0_i32_0 = arith.constant 0 : i32
    %c0_i32_1 = arith.constant 0 : i32
    %c0_i32_2 = arith.constant 0 : i32
    return %c0_i32, %c0_i32_0, %c0_i32_1 : i32, i32, i32
  }
  func.func @transform_4(%arg0: i32) -> (i32, i32, i32) {
    %c0_i32 = arith.constant 0 : i32
    %c0_i32_0 = arith.constant 0 : i32
    %c0_i32_1 = arith.constant 0 : i32
    %c0_i32_2 = arith.constant 0 : i32
    return %c0_i32, %c0_i32_0, %c0_i32_1 : i32, i32, i32
  }
  func.func @transform_5(%arg0: i32) -> (i32, i32) {
    %c0_i32 = arith.constant 0 : i32
    %c0_i32_0 = arith.constant 0 : i32
    %c0_i32_1 = arith.constant 0 : i32
    return %c0_i32, %c0_i32_0 : i32, i32
  }
  func.func @transform_6(%arg0: i32) -> (i32, i32) {
    %c0_i32 = arith.constant 0 : i32
    %c0_i32_0 = arith.constant 0 : i32
    %c0_i32_1 = arith.constant 0 : i32
    return %c0_i32, %c0_i32_0 : i32, i32
  }
  func.func @transform_7(%arg0: i32) -> (i32, i32) {
    %c0_i32 = arith.constant 0 : i32
    %c0_i32_0 = arith.constant 0 : i32
    return %c0_i32, %arg0 : i32, i32
  }
}

</mosaic_0001>

<bundles_post_ra>
// kernel: tpu_custom_call.1
= control target key start
LH: loop header
LB: loop body
LE: loop exit
PB: predicated region body
PF: predicated region fallthrough
CT: control target
= control target key end

     0   :  { %s7331_s0 = inlined_call_operand.vmem [shape: s32[1,128], index: 0, kind: input, shape index: {}]   ;;  %s7332_s1 = inlined_call_operand.hbm [shape: f32[8,128,128], index: 1, kind: input, shape index: {}]   ;;  %s7333_s2 = inlined_call_operand.vmem [shape: bf16[128,32], index: 2, kind: input, shape index: {}]   ;;  %s7334_s3 = inlined_call_operand.vmem [shape: bf16[1,128,64], index: 3, kind: input, shape index: {}]   ;;  %s7335_s4 = inlined_call_operand.vmem [shape: f32[1,128,1], index: 4, kind: input, shape index: {}]   ;;  %s7336_s5 = inlined_call_operand.vmem [shape: f32[32,1], index: 5, kind: input, shape index: {}]   ;;  %s7337_s6 = inlined_call_operand.<no memory space> [shape: f32[1,1], index: 6, kind: input, shape index: {}]   ;;  %s7338_s7 = inlined_call_operand.hbm [shape: f32[1,128], index: 7, kind: output, shape index: {}]  }
   0x1   :  { %v12_v0 = vstv %s7337_s6 }
   0x2   :  { %13 = vst [vmem:[#allocation2] sm:$0x1] %v12_v0 }
   0x3   :  { %14 = vsyncpa [#allocation4], 0 }
   0x4   :  { %15 = vsyncpa [#allocation5], 0  ;;  %s5833_s26 = smov [#allocation3]  }
   0x5   :  { %s23_s27 = sshll.u32 %s5833_s26, 4  ;;  %s24_s27 = int_to_ptr.vmem [resolvable:$true] %s23_s27 }
   0x6   :  { %s5797_s28 = scalar_lea.vmem %s24_s27, 16384  ;;  %p5802_p1 = scmp.lt.s32.totalorder %s24_s27, %s24_s27 }
   0x7   :  { %p5798_p0 = scmp.ne.s32.totalorder %s24_s27, %s5797_s28  ;;  %p5803_p2 = scmp.lt.s32.totalorder %s5797_s28, %s5797_s28 }
   0x9   :  { %p5804_p3 = por %p5803_p2, %p5802_p1 }
   0xb   :  { %p5805_p4 = pnand %p5804_p3, %p5798_p0 }
   0xd   :  { %5808 = shalt.err (!%p5805_p4)
}
   0xe   :  { %s5834_s29 = smov 128   ;;  %s5835_s30 = smov 8  }
   0xf   :  { %29 = dma.hbm_to_vmem [thread:$0]  %s7332_s1, 16384, %s24_s27, [#allocation4], %s5834_s29, %s5834_s29, %s5835_s30  }
  0x10   :  { %5829 = dma.done.wait [#allocation4], 16384  }
  0x11   :  { %5830 = vsyncadd [#allocation4], 4294950912  ;;  %v7339_v1 = vmov 0   ;;  %vm133_vm0 = vcmask 261120   ;;  %v5891_v2 = vld [vmem:[%s7333_s2] sm:$0xff]   ;;  %v5896_v3 = vld [vmem:[%s7333_s2 + $0x8] sm:$0xff]  }
  0x12   :  { %4346 = vmatprep.subr.bf16.mxu0 %v7339_v1  ;;  %4697 = vset.pattern.permute.xlu0 %v7339_v1  ;;  %v5903_v4 = vld [vmem:[%s7333_s2 + $0x10] sm:$0xff]   ;;  %v5912_v5 = vld [vmem:[%s7333_s2 + $0x18] sm:$0xff]   ;;  %v5917_v6 = vld [vmem:[%s7333_s2 + $0x20] sm:$0xff]   ;;  %vm506_vm1 = vcmask 523264  }
  0x13   :  { %4347 = vmatpush3.bf16.msra.mxu0 %v7339_v1  ;;  %4698 = vset.pattern.permute.xlu1 %v7339_v1  ;;  %v5926_v7 = vld [vmem:[%s7333_s2 + $0x28] sm:$0xff]   ;;  %v5931_v8 = vld [vmem:[%s7333_s2 + $0x30] sm:$0xff]   ;;  %v5940_v9 = vld [vmem:[%s7333_s2 + $0x38] sm:$0xff]  }
  0x14   :  { %4348 = vmatprep.mubr.msk.bf16.mxu0 %vm133_vm0, %v5891_v2  ;;  %v5949_v10 = vld [vmem:[%s7334_s3] sm:$0xff]   ;;  %v372_v11 = vld [vmem:[%s7335_s4 + $0x10] sm:$0xff]  ;;  %v373_v13 = vld [vmem:[%s7335_s4 + $0x18] sm:$0xff] }
  0x15   :  { %4368 = vmatprep.mubr.msk.bf16.mxu1 %vm506_vm1, %v5949_v10  ;;  %v376_v12 = vld [vmem:[%s7335_s4 + $0x30] sm:$0xff]  ;;  %398 = vperm.xlu0 %4697, %v372_v11   ;;  %v377_v14 = vld [vmem:[%s7335_s4 + $0x38] sm:$0xff]  ;;  %v370_v15 = vld [vmem:[%s7335_s4] sm:$0xff] }
  0x16   :  { %4349 = vmatmul.mubr.msk.bf16.vlgmr.msra.gmra.mxu0 %vm133_vm0, %v5896_v3  ;;  %418 = vperm.xlu1 %4698, %v376_v12   ;;  %v371_v16 = vld [vmem:[%s7335_s4 + $0x8] sm:$0xff]  ;;  %v374_v17 = vld [vmem:[%s7335_s4 + $0x20] sm:$0xff]  ;;  %v380_v19 = vld [vmem:[%s7335_s4 + $0x50] sm:$0xff] }
  0x17   :  { %4352 = vmatprep.mubr.msk.bf16.mxu0 %vm133_vm0, %v5903_v4  ;;  %v375_v18 = vld [vmem:[%s7335_s4 + $0x28] sm:$0xff]  ;;  %v381_v20 = vld [vmem:[%s7335_s4 + $0x58] sm:$0xff]  ;;  %v384_v21 = vld [vmem:[%s7335_s4 + $0x70] sm:$0xff] }
  0x18   :  { %v385_v22 = vld [vmem:[%s7335_s4 + $0x78] sm:$0xff]  ;;  %v378_v23 = vld [vmem:[%s7335_s4 + $0x40] sm:$0xff]  ;;  %v379_v24 = vld [vmem:[%s7335_s4 + $0x48] sm:$0xff] }
  0x19   :  { %403 = vperm.xlu0 %4697, %v373_v13   ;;  %v79_v25 = vld [vmem:[#allocation3 + $0x10] sm:$0xff]  ;;  %v382_v26 = vld [vmem:[%s7335_s4 + $0x60] sm:$0xff]  ;;  %v383_v27 = vld [vmem:[%s7335_s4 + $0x68] sm:$0xff] }
  0x1a   :  { %423 = vperm.xlu1 %4698, %v377_v14   ;;  %v77_v29 = vld [vmem:[#allocation3] sm:$0xff]  ;;  %v80_v32 = vld [vmem:[#allocation3 + $0x18] sm:$0xff]  ;;  %v78_v38 = vld [vmem:[#allocation3 + $0x8] sm:$0xff] }
  0x1b   :  { %v3773_v35 = vld [vmem:[%s7336_s5] sm:$0xff]  ;;  %v3774_v36 = vld [vmem:[%s7336_s5 + $0x8] sm:$0xff]  ;;  %v83_v42 = vld [vmem:[#allocation3 + $0x30] sm:$0xff] }
  0x1c   :  { %v3775_v45 = vld [vmem:[%s7336_s5 + $0x10] sm:$0xff]  ;;  %v3776_v46 = vld [vmem:[%s7336_s5 + $0x18] sm:$0xff]  ;;  %v81_v48 = vld [vmem:[#allocation3 + $0x20] sm:$0xff] }
  0x1d   :  { %388 = vperm.xlu0 %4697, %v370_v15   ;;  %v84_v52 = vld [vmem:[#allocation3 + $0x38] sm:$0xff]  ;;  %v82_v57 = vld [vmem:[#allocation3 + $0x28] sm:$0xff]  ;;  %v87_v61 = vld [vmem:[#allocation3 + $0x50] sm:$0xff] }
  0x1e   :  { %4353 = vmatmul.mubr.msk.bf16.gmra.mxu0 %vm133_vm0, %v5912_v5  ;;  %393 = vperm.xlu1 %4698, %v371_v16   ;;  %v3810_v55 = vld [vmem:[#allocation2] sm:$0x1]  ;;  %v85_v11 = vld [vmem:[#allocation3 + $0x40] sm:$0xff] }
  0x1f   :  { %4356 = vmatprep.mubr.msk.bf16.mxu0 %vm133_vm0, %v5917_v6  ;;  %v88_v16 = vld [vmem:[#allocation3 + $0x58] sm:$0xff] }
  0x21   :  { %408 = vperm.xlu0 %4697, %v374_v17  }
  0x22   :  { %413 = vperm.xlu1 %4698, %v375_v18  }
  0x25   :  { %438 = vperm.xlu0 %4697, %v380_v19  }
  0x26   :  { %4357 = vmatmul.mubr.msk.bf16.gmra.mxu0 %vm133_vm0, %v5926_v7  ;;  %443 = vperm.xlu1 %4698, %v381_v20  }
  0x27   :  { %4360 = vmatprep.mubr.msk.bf16.mxu0 %vm133_vm0, %v5931_v8 }
  0x29   :  { %458 = vperm.xlu0 %4697, %v384_v21   ;;  %v86_v21 = vld [vmem:[#allocation3 + $0x48] sm:$0xff] }
  0x2a   :  { %463 = vperm.xlu1 %4698, %v385_v22  }
  0x2d   :  { %428 = vperm.xlu0 %4697, %v378_v23  }
  0x2e   :  { %4361 = vmatmul.mubr.msk.bf16.gmra.mxu0 %vm133_vm0, %v5940_v9  ;;  %433 = vperm.xlu1 %4698, %v379_v24  }
  0x2f   :  { %4388 = vmatprep.mubr.msk.bf16.mxu0 %vm133_vm0, %v5891_v2 }
  0x31   :  { %448 = vperm.xlu0 %4697, %v382_v26   ;;  %v91_v26 = vld [vmem:[#allocation3 + $0x70] sm:$0xff] }
  0x32   :  { %453 = vperm.xlu1 %4698, %v383_v27  }
  0x35   :  { %3779 = vperm.xlu0 %4697, %v3773_v35  }
  0x36   :  { %3784 = vperm.xlu1 %4698, %v3774_v36   ;;  %v92_v36 = vld [vmem:[#allocation3 + $0x78] sm:$0xff] }
  0x39   :  { %3789 = vperm.xlu0 %4697, %v3775_v45  }
  0x3a   :  { %3794 = vperm.xlu1 %4698, %v3776_v46  }
  0x3d   :  { %3813 = vperm.xlu0 %4697, %v3810_v55  }
  0xd6   :  { %v4350_v28 = vpop.f32.mrf.mxu0 }
  0xd7   :  { %v257_v30 = vadd.f32 %v4350_v28, %v79_v25 }
  0xd8   :  { %v192_v31 = vpop.f32.mrf.mxu0 }
  0xd9   :  { %v3855_v33 = vmul.f32 -1.442695, %v257_v30  ;;  %v255_v34 = vadd.f32 %v192_v31, %v77_v29  ;;  %v89_v31 = vld [vmem:[#allocation3 + $0x60] sm:$0xff] }
  0xda   :  { %v4351_v37 = vpop.f32.mrf.mxu0 }
  0xdb   :  { %4715 = vpow2.f32 %v3855_v33  ;;  %v3853_v39 = vmul.f32 -1.442695, %v255_v34  ;;  %v258_v40 = vadd.f32 %v4351_v37, %v80_v32 }
  0xdc   :  { %v195_v41 = vpop.f32.mrf.mxu0 }
  0xdd   :  { %4717 = vpow2.f32 %v3853_v39  ;;  %v3856_v43 = vmul.f32 -1.442695, %v258_v40  ;;  %v256_v44 = vadd.f32 %v195_v41, %v78_v38 }
  0xde   :  { %v4354_v47 = vpop.f32.mrf.mxu0 }
  0xdf   :  { %4719 = vpow2.f32 %v3856_v43  ;;  %v3854_v49 = vmul.f32 -1.442695, %v256_v44  ;;  %v261_v50 = vadd.f32 %v4354_v47, %v83_v42  ;;  %v90_v42 = vld [vmem:[#allocation3 + $0x68] sm:$0xff] }
  0xe0   :  { %v208_v51 = vpop.f32.mrf.mxu0 }
  0xe1   :  { %4721 = vpow2.f32 %v3854_v49  ;;  %v3859_v53 = vmul.f32 -1.442695, %v261_v50  ;;  %v259_v54 = vadd.f32 %v208_v51, %v81_v48 }
  0xe2   :  { %v4355_v56 = vpop.f32.mrf.mxu0 }
  0xe3   :  { %4723 = vpow2.f32 %v3859_v53  ;;  %v3857_v58 = vmul.f32 -1.442695, %v259_v54  ;;  %v262_v59 = vadd.f32 %v4355_v56, %v84_v52 }
  0xe4   :  { %v211_v60 = vpop.f32.mrf.mxu0 }
  0xe5   :  { %4725 = vpow2.f32 %v3857_v58  ;;  %v3860_v62 = vmul.f32 -1.442695, %v262_v59  ;;  %v260_v63 = vadd.f32 %v211_v60, %v82_v57 }
  0xe6   :  { %v4358_v0 = vpop.f32.mrf.mxu0 }
  0xe7   :  { %4727 = vpow2.f32 %v3860_v62  ;;  %v3858_v12 = vmul.f32 -1.442695, %v260_v63  ;;  %v265_v13 = vadd.f32 %v4358_v0, %v87_v61 }
  0xe8   :  { %v4716_v14 = vpop.eup %4715  ;;  %v224_v15 = vpop.f32.mrf.mxu0 }
  0xe9   :  { %v297_v17 = vadd.f32 1.0, %v4716_v14  ;;  %4729 = vpow2.f32 %v3858_v12  ;;  %v263_v18 = vadd.f32 %v224_v15, %v85_v11 }
  0xea   :  { %v4718_v19 = vpop.eup %4717  ;;  %v4359_v20 = vpop.f32.mrf.mxu0  ;;  %4731 = vtanh.f32 %v265_v13 }
  0xeb   :  { %v295_v22 = vadd.f32 1.0, %v4718_v19  ;;  %v266_v23 = vadd.f32 %v4359_v20, %v88_v16  ;;  %4733 = vrcp.f32 %v297_v17 }
  0xec   :  { %v4720_v24 = vpop.eup %4719  ;;  %v227_v25 = vpop.f32.mrf.mxu0  ;;  %4735 = vtanh.f32 %v263_v18 }
  0xed   :  { %v298_v27 = vadd.f32 1.0, %v4720_v24  ;;  %v264_v28 = vadd.f32 %v227_v25, %v86_v21  ;;  %4737 = vrcp.f32 %v295_v22 }
  0xee   :  { %v4722_v29 = vpop.eup %4721  ;;  %v4362_v30 = vpop.f32.mrf.mxu0  ;;  %4739 = vtanh.f32 %v266_v23 }
  0xef   :  { %v296_v32 = vadd.f32 1.0, %v4722_v29  ;;  %v269_v33 = vadd.f32 %v4362_v30, %v91_v26  ;;  %4741 = vrcp.f32 %v298_v27 }
  0xf0   :  { %v4724_v34 = vpop.eup %4723  ;;  %v240_v35 = vpop.f32.mrf.mxu0  ;;  %4743 = vtanh.f32 %v264_v28 }
  0xf1   :  { %v301_v37 = vadd.f32 1.0, %v4724_v34  ;;  %v3863_v38 = vmul.f32 -1.442695, %v269_v33  ;;  %v267_v39 = vadd.f32 %v240_v35, %v89_v31  ;;  %4745 = vrcp.f32 %v296_v32 }
  0xf2   :  { %v4726_v40 = vpop.eup %4725  ;;  %v4363_v41 = vpop.f32.mrf.mxu0 }
  0xf3   :  { %4747 = vrcp.f32 %v301_v37  ;;  %v299_v43 = vadd.f32 1.0, %v4726_v40  ;;  %v3861_v44 = vmul.f32 -1.442695, %v267_v39  ;;  %v270_v45 = vadd.f32 %v4363_v41, %v92_v36 }
  0xf4   :  { %v4728_v46 = vpop.eup %4727  ;;  %4749 = vpow2.f32 %v3863_v38  ;;  %v243_v47 = vpop.f32.mrf.mxu0 }
  0xf5   :  { %4751 = vrcp.f32 %v299_v43  ;;  %v302_v48 = vadd.f32 1.0, %v4728_v46  ;;  %v3864_v49 = vmul.f32 -1.442695, %v270_v45  ;;  %v268_v50 = vadd.f32 %v243_v47, %v90_v42  ;;  %v6028_v46 = vld [vmem:[%s7334_s3 + $0x8] sm:$0xff]   ;;  %v6033_v47 = vld [vmem:[%s7334_s3 + $0x10] sm:$0xff]  }
  0xf6   :  { %v4730_v51 = vpop.eup %4729  ;;  %4753 = vpow2.f32 %v3861_v44 }
  0xf7   :  { %4755 = vrcp.f32 %v302_v48  ;;  %v300_v52 = vadd.f32 1.0, %v4730_v51  ;;  %v3862_v53 = vmul.f32 -1.442695, %v268_v50  ;;  %v4732_v54 = vpop.eup %4731  ;;  %v6046_v48 = vld [vmem:[%s7334_s3 + $0x18] sm:$0xff]  }
  0xf8   :  { %4757 = vpow2.f32 %v3864_v49  ;;  %v4734_v55 = vpop.eup %4733  ;;  %v6051_v49 = vld [vmem:[%s7334_s3 + $0x20] sm:$0xff]   ;;  %v738_v50 = vld [vmem:[#allocation3 + $0x90] sm:$0xff] }
  0xf9   :  { %4759 = vrcp.f32 %v300_v52  ;;  %v4736_v56 = vpop.eup %4735  ;;  %v353_v11 = vmul.f32 %v4734_v55, %v4732_v54  ;;  %v736_v54 = vld [vmem:[#allocation3 + $0x80] sm:$0xff] }
  0xfa   :  { %4761 = vpow2.f32 %v3862_v53  ;;  %v4738_v57 = vpop.eup %4737 }
  0xfb   :  { %v4740_v58 = vpop.eup %4739  ;;  %v351_v17 = vmul.f32 %v4738_v57, %v4736_v56 }
  0xfc   :  { %v4742_v59 = vpop.eup %4741 }
  0xfd   :  { %v4744_v60 = vpop.eup %4743  ;;  %v354_v23 = vmul.f32 %v4742_v59, %v4740_v58 }
  0xfe   :  { %v4746_v61 = vpop.eup %4745 }
  0xff   :  { %v352_v29 = vmul.f32 %v4746_v61, %v4744_v60  ;;  %v739_v61 = vld [vmem:[#allocation3 + $0x98] sm:$0xff] }
 0x100   :  { %v4748_v62 = vpop.eup %4747 }
 0x101   :  { %v4750_v63 = vpop.eup %4749  ;;  %v349_v0 = vmul.f32 0.0, %v4748_v62 }
 0x102   :  { %v4752_v12 = vpop.eup %4751  ;;  %v337_v13 = vadd.f32 1.0, %v4750_v63 }
 0x103   :  { %v4754_v14 = vpop.eup %4753  ;;  %v347_v15 = vmul.f32 0.0, %v4752_v12  ;;  %v6013_v16 = vadd.f32 %v353_v11, %v349_v0  ;;  %v737_v0 = vld [vmem:[#allocation3 + $0x88] sm:$0xff] }
 0x104   :  { %v4756_v18 = vpop.eup %4755  ;;  %4763 = vrcp.f32 %v337_v13  ;;  %v335_v19 = vadd.f32 1.0, %v4754_v14 }
 0x105   :  { %v4758_v20 = vpop.eup %4757  ;;  %v350_v21 = vmul.f32 0.0, %v4756_v18  ;;  %4765 = vtanh.f32 %v6013_v16  ;;  %v6016_v22 = vadd.f32 %v351_v17, %v347_v15 }
 0x106   :  { %v4760_v24 = vpop.eup %4759  ;;  %4767 = vrcp.f32 %v335_v19  ;;  %v338_v25 = vadd.f32 1.0, %v4758_v20 }
 0x107   :  { %v4762_v26 = vpop.eup %4761  ;;  %v348_v27 = vmul.f32 0.0, %v4760_v24  ;;  %4769 = vtanh.f32 %v6016_v22  ;;  %v6019_v28 = vadd.f32 %v354_v23, %v350_v21  ;;  %v742_v23 = vld [vmem:[#allocation3 + $0xb0] sm:$0xff] }
 0x108   :  { %4771 = vrcp.f32 %v338_v25  ;;  %v336_v30 = vadd.f32 1.0, %v4762_v26 }
 0x109   :  { %4773 = vtanh.f32 %v6019_v28  ;;  %v6022_v31 = vadd.f32 %v352_v29, %v348_v27  ;;  %v740_v27 = vld [vmem:[#allocation3 + $0xa0] sm:$0xff] }
 0x10a   :  { %4775 = vrcp.f32 %v336_v30 }
 0x10b   :  { %4777 = vtanh.f32 %v6022_v31 }
 0x111   :  { %v4764_v32 = vpop.eup %4763 }
 0x112   :  { %v4766_v33 = vpop.eup %4765 }
 0x113   :  { %v4768_v34 = vpop.eup %4767  ;;  %v365_v39 = vmul.f32 %v4766_v33, %v4764_v32 }
 0x114   :  { %v4770_v35 = vpop.eup %4769 }
 0x115   :  { %v4772_v36 = vpop.eup %4771  ;;  %v363_v43 = vmul.f32 %v4770_v35, %v4768_v34 }
 0x116   :  { %v4774_v37 = vpop.eup %4773 }
 0x117   :  { %v4776_v38 = vpop.eup %4775  ;;  %v366_v40 = vmul.f32 %v4774_v37, %v4772_v36 }
 0x118   :  { %v4778_v41 = vpop.eup %4777 }
 0x119   :  { %v368_v42 = vpack.c.bf16 %v366_v40, %v365_v39  ;;  %v364_v44 = vmul.f32 %v4778_v41, %v4776_v38  ;;  %v743_v40 = vld [vmem:[#allocation3 + $0xb8] sm:$0xff] }
 0x11b   :  { %4364 = vmatprep.subr.bf16.mxu1 %v368_v42  ;;  %4384 = vmatprep.subr.bf16.mxu0 %v368_v42  ;;  %v367_v45 = vpack.c.bf16 %v364_v44, %v363_v43  ;;  %v741_v44 = vld [vmem:[#allocation3 + $0xa8] sm:$0xff] }
 0x11c   :  { %4365 = vmatpush3.bf16.msra.mxu1 %v368_v42  ;;  %4385 = vmatpush3.bf16.msra.mxu0 %v368_v42 }
 0x11d   :  { %4366 = vmatprep.subr.bf16.mxu1 %v367_v45  ;;  %4386 = vmatprep.subr.bf16.mxu0 %v367_v45 }
 0x120   :  { %4367 = vmatpush3.bf16.msra.mxu1 %v367_v45  ;;  %4387 = vmatpush3.bf16.msra.mxu0 %v367_v45 }
 0x123   :  { %4369 = vmatmul.mubr.msk.bf16.vlgmr.msra.gmra.mxu1 %vm506_vm1, %v6028_v46  ;;  %4389 = vmatmul.mubr.msk.bf16.vlgmr.msra.gmra.mxu0 %vm133_vm0, %v5896_v3  ;;  %v6064_v3 = vld [vmem:[%s7334_s3 + $0x28] sm:$0xff]  }
 0x124   :  { %4372 = vmatprep.mubr.msk.bf16.mxu1 %vm506_vm1, %v6033_v47  ;;  %4392 = vmatprep.mubr.msk.bf16.mxu0 %vm133_vm0, %v5903_v4  ;;  %v6069_v4 = vld [vmem:[%s7334_s3 + $0x30] sm:$0xff]  }
 0x12b   :  { %4373 = vmatmul.mubr.msk.bf16.gmra.mxu1 %vm506_vm1, %v6046_v48  ;;  %4393 = vmatmul.mubr.msk.bf16.gmra.mxu0 %vm133_vm0, %v5912_v5  ;;  %v6082_v5 = vld [vmem:[%s7334_s3 + $0x38] sm:$0xff]  }
 0x12c   :  { %4376 = vmatprep.mubr.msk.bf16.mxu1 %vm506_vm1, %v6051_v49  ;;  %4396 = vmatprep.mubr.msk.bf16.mxu0 %vm133_vm0, %v5917_v6  ;;  %v6092_v6 = vpop.permute.xlu0 %398 }
 0x133   :  { %4377 = vmatmul.mubr.msk.bf16.gmra.mxu1 %vm506_vm1, %v6064_v3  ;;  %4397 = vmatmul.mubr.msk.bf16.gmra.mxu0 %vm133_vm0, %v5926_v7  ;;  %v6094_v7 = vpop.permute.xlu1 %418 }
 0x134   :  { %4380 = vmatprep.mubr.msk.bf16.mxu1 %vm506_vm1, %v6069_v4  ;;  %4400 = vmatprep.mubr.msk.bf16.mxu0 %vm133_vm0, %v5931_v8  ;;  %7366 = vst [vmem:[#allocation9_spill] sm:$0xff] %v6094_v7  ;;  %v6096_v8 = vpop.permute.xlu0 %403 }
 0x135   :  { %7367 = vst [vmem:[#allocation10_spill] sm:$0xff] %v6096_v8 }
 0x137   :  { %v6098_v51 = vpop.permute.xlu1 %423 }
 0x138   :  { %7368 = vst [vmem:[#allocation11_spill] sm:$0xff] %v6098_v51  ;;  %v6100_v55 = vpop.permute.xlu0 %388 }
 0x139   :  { %7369 = vst [vmem:[#allocation12_spill] sm:$0xff] %v6100_v55 }
 0x13b   :  { %4381 = vmatmul.mubr.msk.bf16.gmra.mxu1 %vm506_vm1, %v6082_v5  ;;  %4401 = vmatmul.mubr.msk.bf16.gmra.mxu0 %vm133_vm0, %v5940_v9  ;;  %v6104_v11 = vpop.permute.xlu1 %393 }
 0x13c   :  { %4432 = vmatprep.mubr.msk.bf16.mxu0 %vm133_vm0, %v5891_v2  ;;  %4412 = vmatprep.mubr.msk.bf16.mxu1 %vm506_vm1, %v5949_v10  ;;  %7370 = vst [vmem:[#allocation13_spill] sm:$0xff] %v6104_v11  ;;  %v6108_v29 = vpop.permute.xlu0 %408 }
 0x13d   :  { %7371 = vst [vmem:[#allocation14_spill] sm:$0xff] %v6108_v29 }
 0x13f   :  { %v6112_v45 = vpop.permute.xlu1 %413 }
 0x140   :  { %7372 = vst [vmem:[#allocation15_spill] sm:$0xff] %v6112_v45 }
 0x1e3   :  { %v4370_v52 = vpop.f32.mrf.mxu1  ;;  %v4390_v53 = vpop.f32.mrf.mxu0 }
 0x1e4   :  { %v574_v9 = vadd.f32 %v4370_v52, %v6092_v6  ;;  %v851_v2 = vadd.f32 %v4390_v53, %v738_v50 }
 0x1e5   :  { %v565_v56 = vpop.f32.mrf.mxu1  ;;  %v786_v57 = vpop.f32.mrf.mxu0 }
 0x1e6   :  { %v3883_v10 = vmul.f32 -1.442695, %v574_v9  ;;  %v3903_v58 = vmul.f32 -1.442695, %v851_v2  ;;  %v566_v59 = vadd.f32 %v565_v56, %v6100_v55  ;;  %v849_v60 = vadd.f32 %v786_v57, %v736_v54 }
 0x1e7   :  { %v4371_v62 = vpop.f32.mrf.mxu1  ;;  %v4391_v63 = vpop.f32.mrf.mxu0 }
 0x1e8   :  { %4779 = vpow2.f32 %v3883_v10  ;;  %v3881_v12 = vmul.f32 -1.442695, %v566_v59  ;;  %v3901_v13 = vmul.f32 -1.442695, %v849_v60  ;;  %v577_v14 = vadd.f32 %v4371_v62, %v6096_v8 }
 0x1e9   :  { %4781 = vpow2.f32 %v3903_v58  ;;  %v852_v15 = vadd.f32 %v4391_v63, %v739_v61  ;;  %v568_v17 = vpop.f32.mrf.mxu1  ;;  %v789_v18 = vpop.f32.mrf.mxu0 }
 0x1ea   :  { %4783 = vpow2.f32 %v3881_v12  ;;  %v3884_v19 = vmul.f32 -1.442695, %v577_v14  ;;  %v569_v20 = vadd.f32 %v568_v17, %v6104_v11  ;;  %v850_v21 = vadd.f32 %v789_v18, %v737_v0  ;;  %v6124_v14 = vpop.permute.xlu0 %438 }
 0x1eb   :  { %4785 = vpow2.f32 %v3901_v13  ;;  %v3904_v24 = vmul.f32 -1.442695, %v852_v15  ;;  %v4374_v25 = vpop.f32.mrf.mxu1  ;;  %v4394_v26 = vpop.f32.mrf.mxu0  ;;  %7373 = vst [vmem:[#allocation16_spill] sm:$0xff] %v6124_v14 }
 0x1ec   :  { %4787 = vpow2.f32 %v3884_v19  ;;  %v3882_v30 = vmul.f32 -1.442695, %v569_v20  ;;  %v3902_v32 = vmul.f32 -1.442695, %v850_v21  ;;  %v590_v33 = vadd.f32 %v4374_v25, %v6094_v7 }
 0x1ed   :  { %4789 = vpow2.f32 %v3904_v24  ;;  %v855_v34 = vadd.f32 %v4394_v26, %v742_v23  ;;  %v581_v35 = vpop.f32.mrf.mxu1  ;;  %v802_v36 = vpop.f32.mrf.mxu0 }
 0x1ee   :  { %4791 = vpow2.f32 %v3882_v30  ;;  %v3887_v37 = vmul.f32 -1.442695, %v590_v33  ;;  %v582_v38 = vadd.f32 %v581_v35, %v6108_v29  ;;  %v853_v39 = vadd.f32 %v802_v36, %v740_v27  ;;  %v6130_v27 = vpop.permute.xlu1 %443  ;;  %v6134_v36 = vpop.permute.xlu0 %458 }
 0x1ef   :  { %4793 = vpow2.f32 %v3902_v32  ;;  %v3907_v41 = vmul.f32 -1.442695, %v855_v34  ;;  %v4375_v42 = vpop.f32.mrf.mxu1  ;;  %v4395_v43 = vpop.f32.mrf.mxu0  ;;  %7374 = vst [vmem:[#allocation17_spill] sm:$0xff] %v6130_v27  ;;  %7375 = vst [vmem:[#allocation18_spill] sm:$0xff] %v6134_v36 }
 0x1f0   :  { %4795 = vpow2.f32 %v3887_v37  ;;  %v3885_v50 = vmul.f32 -1.442695, %v582_v38  ;;  %v3905_v52 = vmul.f32 -1.442695, %v853_v39  ;;  %v593_v53 = vadd.f32 %v4375_v42, %v6098_v51 }
 0x1f1   :  { %4797 = vpow2.f32 %v3907_v41  ;;  %v856_v54 = vadd.f32 %v4395_v43, %v743_v40  ;;  %v584_v9 = vpop.f32.mrf.mxu1  ;;  %v805_v2 = vpop.f32.mrf.mxu0 }
 0x1f2   :  { %4799 = vpow2.f32 %v3885_v50  ;;  %v3888_v56 = vmul.f32 -1.442695, %v593_v53  ;;  %v585_v57 = vadd.f32 %v584_v9, %v6112_v45  ;;  %v854_v10 = vadd.f32 %v805_v2, %v741_v44  ;;  %v6138_v53 = vpop.permute.xlu1 %463 }
 0x1f3   :  { %4801 = vpow2.f32 %v3905_v52  ;;  %v3908_v58 = vmul.f32 -1.442695, %v856_v54  ;;  %v6116_v59 = vpop.f32.mrf.mxu1  ;;  %v6118_v60 = vpop.f32.mrf.mxu0  ;;  %7376 = vst [vmem:[#allocation19_spill] sm:$0xff] %v6138_v53 }
 0x1f4   :  { %4803 = vpow2.f32 %v3888_v56  ;;  %v3886_v61 = vmul.f32 -1.442695, %v585_v57  ;;  %v3906_v62 = vmul.f32 -1.442695, %v854_v10  ;;  %v6140_v10 = vpop.permute.xlu0 %428 }
 0x1f5   :  { %v4780_v63 = vpop.eup %4779  ;;  %4805 = vpow2.f32 %v3908_v58  ;;  %v6120_v0 = vpop.f32.mrf.mxu1  ;;  %7377 = vst [vmem:[#allocation20_spill] sm:$0xff] %v6140_v10 }
 0x1f6   :  { %v6122_v12 = vpop.f32.mrf.mxu0  ;;  %v4782_v13 = vpop.eup %4781  ;;  %v654_v15 = vadd.f32 1.0, %v4780_v63  ;;  %4807 = vpow2.f32 %v3886_v61 }
 0x1f7   :  { %v4784_v17 = vpop.eup %4783  ;;  %v891_v18 = vadd.f32 1.0, %v4782_v13  ;;  %4809 = vpow2.f32 %v3906_v62  ;;  %v6126_v19 = vpop.f32.mrf.mxu1  ;;  %v746_v13 = vld [vmem:[#allocation3 + $0xd0] sm:$0xff] }
 0x1f8   :  { %v4786_v20 = vpop.eup %4785  ;;  %4811 = vrcp.f32 %v654_v15  ;;  %v652_v21 = vadd.f32 1.0, %v4784_v17  ;;  %v6128_v23 = vpop.f32.mrf.mxu0 }
 0x1f9   :  { %v4788_v24 = vpop.eup %4787  ;;  %4813 = vrcp.f32 %v891_v18  ;;  %v889_v25 = vadd.f32 1.0, %v4786_v20  ;;  %v6132_v32 = vpop.f32.mrf.mxu1  ;;  %v606_v18 = vadd.f32 %v6116_v59, %v6124_v14  ;;  %v609_v59 = vadd.f32 %v6126_v19, %v6130_v27 }
 0x1fa   :  { %v4790_v26 = vpop.eup %4789  ;;  %4815 = vrcp.f32 %v652_v21  ;;  %v655_v30 = vadd.f32 1.0, %v4788_v24  ;;  %v6136_v38 = vpop.f32.mrf.mxu0 }
 0x1fb   :  { %v4792_v33 = vpop.eup %4791  ;;  %4817 = vrcp.f32 %v889_v25  ;;  %v892_v34 = vadd.f32 1.0, %v4790_v26  ;;  %v4382_v43 = vpop.f32.mrf.mxu1  ;;  %v598_v25 = vadd.f32 %v6120_v0, %v6140_v10  ;;  %v744_v26 = vld [vmem:[#allocation3 + $0xc0] sm:$0xff] }
 0x1fc   :  { %v4794_v35 = vpop.eup %4793  ;;  %4819 = vrcp.f32 %v655_v30  ;;  %v653_v37 = vadd.f32 1.0, %v4792_v33  ;;  %v4402_v9 = vpop.f32.mrf.mxu0 }
 0x1fd   :  { %v4796_v39 = vpop.eup %4795  ;;  %4821 = vrcp.f32 %v892_v34  ;;  %v890_v40 = vadd.f32 1.0, %v4794_v35  ;;  %v613_v61 = vpop.f32.mrf.mxu1  ;;  %v859_v34 = vadd.f32 %v6118_v60, %v746_v13  ;;  %v751_v13 = vld [vmem:[#allocation3 + $0xf8] sm:$0xff] }
 0x1fe   :  { %v4798_v41 = vpop.eup %4797  ;;  %4823 = vrcp.f32 %v653_v37  ;;  %v658_v42 = vadd.f32 1.0, %v4796_v39  ;;  %v834_v20 = vpop.f32.mrf.mxu0  ;;  %v747_v39 = vld [vmem:[#allocation3 + $0xd8] sm:$0xff] }
 0x1ff   :  { %v4800_v44 = vpop.eup %4799  ;;  %4825 = vrcp.f32 %v890_v40  ;;  %v895_v50 = vadd.f32 1.0, %v4798_v41  ;;  %v6150_v33 = vpop.permute.xlu1 %433  ;;  %v622_v40 = vadd.f32 %v4382_v43, %v6134_v36  ;;  %v750_v41 = vld [vmem:[#allocation3 + $0xf0] sm:$0xff] }
 0x200   :  { %v4802_v52 = vpop.eup %4801  ;;  %4827 = vrcp.f32 %v658_v42  ;;  %v656_v54 = vadd.f32 1.0, %v4800_v44  ;;  %7378 = vst [vmem:[#allocation21_spill] sm:$0xff] %v6150_v33  ;;  %v4383_v35 = vpop.f32.mrf.mxu1  ;;  %v857_v44 = vadd.f32 %v6122_v12, %v744_v26 }
 0x201   :  { %v4804_v2 = vpop.eup %4803  ;;  %4829 = vrcp.f32 %v895_v50  ;;  %v893_v56 = vadd.f32 1.0, %v4802_v52  ;;  %v6160_v42 = vpop.permute.xlu0 %448  ;;  %v601_v52 = vadd.f32 %v6132_v32, %v6150_v33  ;;  %v3891_v12 = vmul.f32 -1.442695, %v622_v40 }
 0x202   :  { %v4806_v57 = vpop.eup %4805  ;;  %4831 = vrcp.f32 %v656_v54  ;;  %v659_v58 = vadd.f32 1.0, %v4804_v2  ;;  %v4403_v50 = vpop.f32.mrf.mxu0  ;;  %v745_v54 = vld [vmem:[#allocation3 + $0xc8] sm:$0xff]  ;;  %v614_v19 = vadd.f32 %v613_v61, %v6160_v42  ;;  %v748_v2 = vld [vmem:[#allocation3 + $0xe0] sm:$0xff] }
 0x203   :  { %v4808_v62 = vpop.eup %4807  ;;  %4833 = vrcp.f32 %v893_v56  ;;  %v896_v63 = vadd.f32 1.0, %v4806_v57  ;;  %v860_v56 = vadd.f32 %v6128_v23, %v747_v39  ;;  %v863_v57 = vadd.f32 %v4402_v9, %v750_v41  ;;  %v6176_v32 = vpop.permute.xlu1 %453 }
 0x204   :  { %v4810_v15 = vpop.eup %4809  ;;  %4835 = vrcp.f32 %v659_v58  ;;  %v657_v17 = vadd.f32 1.0, %v4808_v62  ;;  %v616_v58 = vpop.f32.mrf.mxu1  ;;  %7379 = vst [vmem:[#allocation22_spill] sm:$0xff] %v6176_v32  ;;  %v858_v61 = vadd.f32 %v6136_v38, %v745_v54  ;;  %v3889_v9 = vmul.f32 -1.442695, %v614_v19 }
 0x205   :  { %v6144_v21 = vpop.eup %4811  ;;  %4837 = vrcp.f32 %v896_v63  ;;  %v894_v24 = vadd.f32 1.0, %v4810_v15  ;;  %v625_v63 = vadd.f32 %v4383_v35, %v6138_v53  ;;  %v864_v35 = vadd.f32 %v4403_v50, %v751_v13 }
 0x206   :  { %v6148_v30 = vpop.eup %4813  ;;  %4839 = vrcp.f32 %v657_v17  ;;  %v861_v17 = vadd.f32 %v834_v20, %v748_v2 }
 0x207   :  { %v6153_v37 = vpop.eup %4815  ;;  %4841 = vrcp.f32 %v894_v24  ;;  %v837_v24 = vpop.f32.mrf.mxu0  ;;  %v3892_v39 = vmul.f32 -1.442695, %v625_v63 }
 0x208   :  { %v6158_v0 = vpop.eup %4817  ;;  %4843 = vtanh.f32 %v606_v18  ;;  %v749_v18 = vld [vmem:[#allocation3 + $0xe8] sm:$0xff] }
 0x209   :  { %v6163_v60 = vpop.eup %4819  ;;  %4845 = vtanh.f32 %v598_v25  ;;  %v617_v25 = vadd.f32 %v616_v58, %v6176_v32  ;;  %v862_v40 = vadd.f32 %v837_v24, %v749_v18 }
 0x20a   :  { %v6168_v43 = vpop.eup %4821  ;;  %4847 = vtanh.f32 %v859_v34  ;;  %v3911_v34 = vmul.f32 -1.442695, %v863_v57 }
 0x20b   :  { %v6171_v62 = vpop.eup %4823  ;;  %4849 = vtanh.f32 %v609_v59  ;;  %v3890_v20 = vmul.f32 -1.442695, %v617_v25  ;;  %v3910_v2 = vmul.f32 -1.442695, %v862_v40 }
 0x20c   :  { %v6174_v15 = vpop.eup %4825  ;;  %4851 = vtanh.f32 %v857_v44  ;;  %v3909_v44 = vmul.f32 -1.442695, %v861_v17 }
 0x20d   :  { %v4828_v23 = vpop.eup %4827  ;;  %4853 = vtanh.f32 %v601_v52  ;;  %v3912_v52 = vmul.f32 -1.442695, %v864_v35 }
 0x20e   :  { %v4830_v26 = vpop.eup %4829  ;;  %4855 = vtanh.f32 %v860_v56  ;;  %v706_v56 = vmul.f32 0.0, %v4828_v23 }
 0x20f   :  { %v4832_v59 = vpop.eup %4831  ;;  %4857 = vpow2.f32 %v3891_v12  ;;  %v943_v13 = vmul.f32 %v4830_v26, %v6013_v16 }
 0x210   :  { %v4834_v41 = vpop.eup %4833  ;;  %4859 = vtanh.f32 %v858_v61  ;;  %v704_v57 = vmul.f32 0.0, %v4832_v59 }
 0x211   :  { %v4836_v38 = vpop.eup %4835  ;;  %4861 = vpow2.f32 %v3889_v9  ;;  %v941_v25 = vmul.f32 %v4834_v41, %v6016_v22 }
 0x212   :  { %v4838_v54 = vpop.eup %4837  ;;  %4863 = vpow2.f32 %v3911_v34  ;;  %v707_v17 = vmul.f32 0.0, %v4836_v38 }
 0x213   :  { %v4840_v19 = vpop.eup %4839  ;;  %4865 = vpow2.f32 %v3892_v39  ;;  %v944_v26 = vmul.f32 %v4838_v54, %v6019_v28 }
 0x214   :  { %v4842_v58 = vpop.eup %4841  ;;  %4867 = vpow2.f32 %v3909_v44 }
 0x215   :  { %v4844_v50 = vpop.eup %4843  ;;  %4869 = vpow2.f32 %v3890_v20  ;;  %v942_v41 = vmul.f32 %v4842_v58, %v6022_v31 }
 0x216   :  { %v4846_v12 = vpop.eup %4845  ;;  %v710_v63 = vmul.f32 %v4844_v50, %v6144_v21  ;;  %4871 = vpow2.f32 %v3912_v52 }
 0x217   :  { %v4848_v61 = vpop.eup %4847  ;;  %v708_v18 = vmul.f32 %v4846_v12, %v6153_v37  ;;  %4873 = vpow2.f32 %v3910_v2 }
 0x218   :  { %v4850_v24 = vpop.eup %4849  ;;  %v6183_v9 = vadd.f32 %v710_v63, %v706_v56  ;;  %v947_v23 = vmul.f32 %v4848_v61, %v6148_v30  ;;  %v705_v56 = vmul.f32 0.0, %v4840_v19 }
 0x219   :  { %v4852_v34 = vpop.eup %4851  ;;  %v6187_v35 = vadd.f32 %v708_v18, %v704_v57  ;;  %v711_v21 = vmul.f32 %v4850_v24, %v6163_v60 }
 0x21a   :  { %v4854_v59 = vpop.eup %4853  ;;  %4875 = vtanh.f32 %v6183_v9  ;;  %v6191_v16 = vadd.f32 %v947_v23, %v943_v13  ;;  %v945_v37 = vmul.f32 %v4852_v34, %v6158_v0 }
 0x21b   :  { %v4856_v39 = vpop.eup %4855  ;;  %4877 = vtanh.f32 %v6187_v35  ;;  %v6196_v30 = vadd.f32 %v711_v21, %v707_v17 }
 0x21c   :  { %v4858_v22 = vpop.eup %4857  ;;  %4879 = vtanh.f32 %v6191_v16  ;;  %v6199_v40 = vadd.f32 %v945_v37, %v941_v25  ;;  %v948_v60 = vmul.f32 %v4856_v39, %v6168_v43 }
 0x21d   :  { %v4860_v44 = vpop.eup %4859  ;;  %4881 = vtanh.f32 %v6196_v30  ;;  %v694_v0 = vadd.f32 1.0, %v4858_v22 }
 0x21e   :  { %v4862_v38 = vpop.eup %4861  ;;  %4883 = vtanh.f32 %v6199_v40  ;;  %v6205_v28 = vadd.f32 %v948_v60, %v944_v26  ;;  %v946_v20 = vmul.f32 %v4860_v44, %v6174_v15  ;;  %v709_v15 = vmul.f32 %v4854_v59, %v6171_v62 }
 0x21f   :  { %v4864_v54 = vpop.eup %4863  ;;  %4885 = vrcp.f32 %v694_v0  ;;  %v692_v52 = vadd.f32 1.0, %v4862_v38 }
 0x220   :  { %v4866_v2 = vpop.eup %4865  ;;  %4887 = vtanh.f32 %v6205_v28  ;;  %v6209_v43 = vadd.f32 %v946_v20, %v942_v41  ;;  %v931_v31 = vadd.f32 1.0, %v4864_v54  ;;  %v6213_v18 = vadd.f32 %v709_v15, %v705_v56 }
 0x221   :  { %v4868_v58 = vpop.eup %4867  ;;  %4889 = vrcp.f32 %v692_v52  ;;  %v695_v50 = vadd.f32 1.0, %v4866_v2 }
 0x222   :  { %v4870_v57 = vpop.eup %4869  ;;  %4891 = vtanh.f32 %v6209_v43  ;;  %v929_v12 = vadd.f32 1.0, %v4868_v58 }
 0x223   :  { %v4872_v63 = vpop.eup %4871  ;;  %4893 = vrcp.f32 %v931_v31  ;;  %v693_v13 = vadd.f32 1.0, %v4870_v57 }
 0x224   :  { %v4874_v61 = vpop.eup %4873  ;;  %4895 = vrcp.f32 %v695_v50  ;;  %v932_v17 = vadd.f32 1.0, %v4872_v63 }
 0x225   :  { %4897 = vrcp.f32 %v929_v12  ;;  %v930_v24 = vadd.f32 1.0, %v4874_v61  ;;  %v6238_v61 = vld [vmem:[%s7333_s2 + $0x10] sm:$0xff]  }
 0x226   :  { %4899 = vrcp.f32 %v693_v13  ;;  %v6231_v13 = vld [vmem:[%s7333_s2 + $0x8] sm:$0xff]  }
 0x227   :  { %v4876_v19 = vpop.eup %4875  ;;  %4901 = vrcp.f32 %v932_v17  ;;  %v6249_v17 = vld [vmem:[%s7333_s2 + $0x18] sm:$0xff]  }
 0x228   :  { %v4878_v23 = vpop.eup %4877  ;;  %4903 = vrcp.f32 %v930_v24  ;;  %v6256_v24 = vld [vmem:[%s7333_s2 + $0x20] sm:$0xff]  }
 0x229   :  { %v4880_v25 = vpop.eup %4879  ;;  %4905 = vtanh.f32 %v6213_v18 }
 0x22a   :  { %v4882_v34 = vpop.eup %4881 }
 0x22b   :  { %v4884_v21 = vpop.eup %4883 }
 0x22c   :  { %v4886_v62 = vpop.eup %4885 }
 0x22d   :  { %v4888_v59 = vpop.eup %4887  ;;  %v6216_v41 = vmul.f32 %v4886_v62, %v4876_v19 }
 0x22e   :  { %v4890_v37 = vpop.eup %4889 }
 0x22f   :  { %v4892_v26 = vpop.eup %4891  ;;  %v6222_v57 = vmul.f32 %v4890_v37, %v4878_v23  ;;  %v1170_v23 = vld [vmem:[#allocation3 + $0x100] sm:$0xff] }
 0x230   :  { %v4894_v39 = vpop.eup %4893 }
 0x231   :  { %v4896_v22 = vpop.eup %4895  ;;  %v959_v52 = vmul.f32 %v4894_v39, %v4880_v25 }
 0x232   :  { %v4898_v60 = vpop.eup %4897  ;;  %v6218_v44 = vmul.f32 %v4896_v22, %v4882_v34 }
 0x233   :  { %v4900_v0 = vpop.eup %4899  ;;  %v957_v58 = vmul.f32 %v4898_v60, %v4884_v21  ;;  %v1173_v21 = vld [vmem:[#allocation3 + $0x118] sm:$0xff] }
 0x234   :  { %v4902_v38 = vpop.eup %4901  ;;  %v964_v20 = vpack.c.bf16 %v6218_v44, %v6216_v41 }
 0x235   :  { %v4904_v54 = vpop.eup %4903  ;;  %v960_v2 = vmul.f32 %v4902_v38, %v4888_v59 }
 0x236   :  { %v4906_v31 = vpop.eup %4905  ;;  %4404 = vmatprep.subr.bf16.mxu1 %v964_v20  ;;  %v958_v56 = vmul.f32 %v4904_v54, %v4892_v26  ;;  %v1171_v26 = vld [vmem:[#allocation3 + $0x108] sm:$0xff] }
 0x237   :  { %v962_v50 = vpack.c.bf16 %v960_v2, %v959_v52  ;;  %4405 = vmatpush3.bf16.msra.mxu1 %v964_v20  ;;  %v6224_v12 = vmul.f32 %v4906_v31, %v4900_v0  ;;  %v1176_v0 = vld [vmem:[#allocation3 + $0x130] sm:$0xff]  ;;  %v1174_v31 = vld [vmem:[#allocation3 + $0x120] sm:$0xff] }
 0x238   :  { %v961_v63 = vpack.c.bf16 %v958_v56, %v957_v58 }
 0x239   :  { %4428 = vmatprep.subr.bf16.mxu0 %v962_v50  ;;  %v963_v15 = vpack.c.bf16 %v6224_v12, %v6222_v57 }
 0x23a   :  { %4429 = vmatpush3.bf16.msra.mxu0 %v962_v50 }
 0x23b   :  { %4406 = vmatprep.subr.bf16.mxu1 %v963_v15  ;;  %4430 = vmatprep.subr.bf16.mxu0 %v961_v63 }
 0x23c   :  { %4407 = vmatpush3.bf16.msra.mxu1 %v963_v15 }
 0x23d   :  { %4408 = vmatprep.subr.bf16.mxu1 %v962_v50 }
 0x23e   :  { %4431 = vmatpush3.bf16.msra.mxu0 %v961_v63 }
 0x240   :  { %4409 = vmatpush3.bf16.msra.mxu1 %v962_v50 }
 0x241   :  { %4433 = vmatmul.mubr.msk.bf16.vlgmr.msra.gmra.mxu0 %vm133_vm0, %v6231_v13  ;;  %4410 = vmatprep.subr.bf16.mxu1 %v961_v63 }
 0x242   :  { %4436 = vmatprep.mubr.msk.bf16.mxu0 %vm133_vm0, %v6238_v61 }
 0x244   :  { %4411 = vmatpush3.bf16.msra.mxu1 %v961_v63 }
 0x247   :  { %4413 = vmatmul.mubr.msk.bf16.vlgmr.msra.gmra.mxu1 %vm506_vm1, %v6028_v46  ;;  %v6267_v46 = vld [vmem:[%s7333_s2 + $0x28] sm:$0xff]  }
 0x248   :  { %4416 = vmatprep.mubr.msk.bf16.mxu1 %vm506_vm1, %v6033_v47  ;;  %v6274_v47 = vld [vmem:[%s7333_s2 + $0x30] sm:$0xff]  }
 0x249   :  { %4437 = vmatmul.mubr.msk.bf16.gmra.mxu0 %vm133_vm0, %v6249_v17 }
 0x24a   :  { %4440 = vmatprep.mubr.msk.bf16.mxu0 %vm133_vm0, %v6256_v24 }
 0x24f   :  { %4417 = vmatmul.mubr.msk.bf16.gmra.mxu1 %vm506_vm1, %v6046_v48  ;;  %v6285_v48 = vld [vmem:[%s7333_s2 + $0x38] sm:$0xff]  }
 0x250   :  { %4420 = vmatprep.mubr.msk.bf16.mxu1 %vm506_vm1, %v6051_v49  ;;  %v6292_v49 = vld [vmem:[%s7333_s2] sm:$0xff]  }
 0x251   :  { %4441 = vmatmul.mubr.msk.bf16.gmra.mxu0 %vm133_vm0, %v6267_v46 }
 0x252   :  { %4444 = vmatprep.mubr.msk.bf16.mxu0 %vm133_vm0, %v6274_v47 }
 0x257   :  { %4421 = vmatmul.mubr.msk.bf16.gmra.mxu1 %vm506_vm1, %v6064_v3  ;;  %v6301_v3 = vld [vmem:[%s7334_s3] sm:$0xff]  }
 0x258   :  { %4424 = vmatprep.mubr.msk.bf16.mxu1 %vm506_vm1, %v6069_v4  ;;  %v1172_v4 = vld [vmem:[#allocation3 + $0x110] sm:$0xff] }
 0x259   :  { %4445 = vmatmul.mubr.msk.bf16.gmra.mxu0 %vm133_vm0, %v6285_v48 }
 0x25a   :  { %4476 = vmatprep.mubr.msk.bf16.mxu0 %vm133_vm0, %v6292_v49 }
 0x25f   :  { %4425 = vmatmul.mubr.msk.bf16.gmra.mxu1 %vm506_vm1, %v6082_v5 }
 0x260   :  { %4456 = vmatprep.mubr.msk.bf16.mxu1 %vm506_vm1, %v6301_v3 }
 0x301   :  { %v4434_v19 = vpop.f32.mrf.mxu0 }
 0x302   :  { %v1285_v25 = vadd.f32 %v4434_v19, %v1172_v4  ;;  %v1177_v19 = vld [vmem:[#allocation3 + $0x138] sm:$0xff] }
 0x303   :  { %v1220_v34 = vpop.f32.mrf.mxu0 }
 0x304   :  { %v3943_v62 = vmul.f32 -1.442695, %v1285_v25  ;;  %v1283_v59 = vadd.f32 %v1220_v34, %v1170_v23 }
 0x305   :  { %v4435_v37 = vpop.f32.mrf.mxu0 }
 0x306   :  { %4907 = vpow2.f32 %v3943_v62  ;;  %v3941_v5 = vmul.f32 -1.442695, %v1283_v59  ;;  %v1286_v39 = vadd.f32 %v4435_v37, %v1173_v21  ;;  %v1175_v37 = vld [vmem:[#allocation3 + $0x128] sm:$0xff] }
 0x307   :  { %v1223_v22 = vpop.f32.mrf.mxu0  ;;  %v4414_v60 = vpop.f32.mrf.mxu1 }
 0x308   :  { %4909 = vpow2.f32 %v3941_v5  ;;  %v3944_v38 = vmul.f32 -1.442695, %v1286_v39  ;;  %v1284_v20 = vadd.f32 %v1223_v22, %v1171_v26  ;;  %v1008_v54 = vadd.f32 %v4414_v60, %v6092_v6 }
 0x309   :  { %v4438_v52 = vpop.f32.mrf.mxu0  ;;  %v999_v2 = vpop.f32.mrf.mxu1 }
 0x30a   :  { %4911 = vpow2.f32 %v3944_v38  ;;  %v3942_v58 = vmul.f32 -1.442695, %v1284_v20  ;;  %v3923_v56 = vmul.f32 -1.442695, %v1008_v54  ;;  %v1289_v50 = vadd.f32 %v4438_v52, %v1176_v0 }
 0x30b   :  { %v1000_v63 = vadd.f32 %v999_v2, %v6100_v55  ;;  %v1236_v15 = vpop.f32.mrf.mxu0  ;;  %v4415_v4 = vpop.f32.mrf.mxu1 }
 0x30c   :  { %4913 = vpow2.f32 %v3942_v58  ;;  %v3947_v23 = vmul.f32 -1.442695, %v1289_v50  ;;  %v1287_v25 = vadd.f32 %v1236_v15, %v1174_v31  ;;  %v1011_v34 = vadd.f32 %v4415_v4, %v6096_v8  ;;  %v1180_v15 = vld [vmem:[#allocation3 + $0x150] sm:$0xff] }
 0x30d   :  { %4915 = vpow2.f32 %v3923_v56  ;;  %v3921_v21 = vmul.f32 -1.442695, %v1000_v63  ;;  %v4439_v62 = vpop.f32.mrf.mxu0  ;;  %v1002_v59 = vpop.f32.mrf.mxu1 }
 0x30e   :  { %4917 = vpow2.f32 %v3947_v23  ;;  %v3945_v26 = vmul.f32 -1.442695, %v1287_v25  ;;  %v3924_v5 = vmul.f32 -1.442695, %v1011_v34  ;;  %v1290_v39 = vadd.f32 %v4439_v62, %v1177_v19 }
 0x30f   :  { %4919 = vpow2.f32 %v3921_v21  ;;  %v1003_v22 = vadd.f32 %v1002_v59, %v6104_v11  ;;  %v1239_v60 = vpop.f32.mrf.mxu0  ;;  %v4418_v0 = vpop.f32.mrf.mxu1 }
 0x310   :  { %4921 = vpow2.f32 %v3945_v26  ;;  %v3948_v38 = vmul.f32 -1.442695, %v1290_v39  ;;  %v1288_v20 = vadd.f32 %v1239_v60, %v1175_v37  ;;  %v1024_v54 = vadd.f32 %v4418_v0, %v6094_v7 }
 0x311   :  { %4923 = vpow2.f32 %v3924_v5  ;;  %v3922_v52 = vmul.f32 -1.442695, %v1003_v22  ;;  %v1015_v2 = vpop.f32.mrf.mxu1  ;;  %v4442_v31 = vpop.f32.mrf.mxu0 }
 0x312   :  { %4925 = vpow2.f32 %v3948_v38  ;;  %v3946_v58 = vmul.f32 -1.442695, %v1288_v20  ;;  %v3927_v56 = vmul.f32 -1.442695, %v1024_v54  ;;  %v1016_v50 = vadd.f32 %v1015_v2, %v6108_v29 }
 0x313   :  { %v4908_v63 = vpop.eup %4907  ;;  %v4419_v4 = vpop.f32.mrf.mxu1  ;;  %v1293_v37 = vadd.f32 %v4442_v31, %v1180_v15 }
 0x314   :  { %v1252_v19 = vpop.f32.mrf.mxu0  ;;  %v1325_v23 = vadd.f32 1.0, %v4908_v63  ;;  %4927 = vpow2.f32 %v3946_v58  ;;  %v3925_v25 = vmul.f32 -1.442695, %v1016_v50  ;;  %v1027_v34 = vadd.f32 %v4419_v4, %v6098_v51 }
 0x315   :  { %v4910_v21 = vpop.eup %4909  ;;  %4929 = vpow2.f32 %v3927_v56  ;;  %v1018_v62 = vpop.f32.mrf.mxu1 }
 0x316   :  { %v1323_v59 = vadd.f32 1.0, %v4910_v21  ;;  %4931 = vpow2.f32 %v3922_v52  ;;  %v4443_v26 = vpop.f32.mrf.mxu0  ;;  %v3928_v39 = vmul.f32 -1.442695, %v1027_v34 }
 0x317   :  { %v4912_v5 = vpop.eup %4911  ;;  %4933 = vpow2.f32 %v3925_v25  ;;  %v4422_v22 = vpop.f32.mrf.mxu1 }
 0x318   :  { %4935 = vrcp.f32 %v1325_v23  ;;  %v1326_v60 = vadd.f32 1.0, %v4912_v5  ;;  %v1255_v2 = vpop.f32.mrf.mxu0 }
 0x319   :  { %v4914_v0 = vpop.eup %4913  ;;  %4937 = vrcp.f32 %v1323_v59  ;;  %v6312_v38 = vpop.f32.mrf.mxu1  ;;  %v1178_v59 = vld [vmem:[#allocation3 + $0x140] sm:$0xff] }
 0x31a   :  { %v4916_v20 = vpop.eup %4915  ;;  %v1324_v54 = vadd.f32 1.0, %v4914_v0  ;;  %4939 = vtanh.f32 %v1293_v37  ;;  %v4446_v25 = vpop.f32.mrf.mxu0 }
 0x31b   :  { %v4918_v58 = vpop.eup %4917  ;;  %v1088_v56 = vadd.f32 1.0, %v4916_v20  ;;  %4941 = vpow2.f32 %v3928_v39  ;;  %v6314_v52 = vpop.f32.mrf.mxu1  ;;  %v1019_v39 = vadd.f32 %v1018_v62, %v6112_v45  ;;  %v1179_v45 = vld [vmem:[#allocation3 + $0x148] sm:$0xff] }
 0x31c   :  { %v4920_v31 = vpop.eup %4919  ;;  %4943 = vrcp.f32 %v1326_v60  ;;  %v1329_v50 = vadd.f32 1.0, %v4918_v58  ;;  %v1181_v58 = vld [vmem:[#allocation3 + $0x158] sm:$0xff]  ;;  %v1292_v7 = vadd.f32 %v1255_v2, %v1179_v45 }
 0x31d   :  { %v4922_v63 = vpop.eup %4921  ;;  %4945 = vrcp.f32 %v1324_v54  ;;  %v1086_v15 = vadd.f32 1.0, %v4920_v31  ;;  %v6316_v37 = vpop.f32.mrf.mxu1  ;;  %v1291_v54 = vadd.f32 %v1252_v19, %v1178_v59  ;;  %v3926_v51 = vmul.f32 -1.442695, %v1019_v39  ;;  %v1182_v59 = vld [vmem:[#allocation3 + $0x160] sm:$0xff] }
 0x31e   :  { %v4924_v4 = vpop.eup %4923  ;;  %4947 = vrcp.f32 %v1329_v50  ;;  %v1327_v23 = vadd.f32 1.0, %v4922_v63  ;;  %v1268_v31 = vpop.f32.mrf.mxu0  ;;  %v1294_v62 = vadd.f32 %v4443_v26, %v1181_v58  ;;  %v1183_v58 = vld [vmem:[#allocation3 + $0x168] sm:$0xff] }
 0x31f   :  { %v4926_v34 = vpop.eup %4925  ;;  %4949 = vrcp.f32 %v1088_v56  ;;  %v1089_v21 = vadd.f32 1.0, %v4924_v4  ;;  %v1184_v56 = vld [vmem:[#allocation3 + $0x170] sm:$0xff]  ;;  %v4426_v4 = vpop.f32.mrf.mxu1  ;;  %v1295_v26 = vadd.f32 %v1268_v31, %v1182_v59 }
 0x320   :  { %4951 = vrcp.f32 %v1086_v15  ;;  %v1330_v5 = vadd.f32 1.0, %v4926_v34  ;;  %v1297_v19 = vadd.f32 %v4446_v25, %v1184_v56 }
 0x321   :  { %v4928_v0 = vpop.eup %4927  ;;  %4953 = vrcp.f32 %v1327_v23 }
 0x322   :  { %v4930_v60 = vpop.eup %4929  ;;  %4955 = vrcp.f32 %v1089_v21  ;;  %v1328_v20 = vadd.f32 1.0, %v4928_v0  ;;  %v1040_v21 = vadd.f32 %v4422_v22, %v6124_v14  ;;  %v4447_v0 = vpop.f32.mrf.mxu0  ;;  %v3951_v25 = vmul.f32 -1.442695, %v1297_v19 }
 0x323   :  { %v4932_v50 = vpop.eup %4931  ;;  %4957 = vrcp.f32 %v1330_v5  ;;  %v1092_v63 = vadd.f32 1.0, %v4930_v60  ;;  %v1047_v5 = vpop.f32.mrf.mxu1 }
 0x324   :  { %v4934_v1 = vpop.eup %4933  ;;  %4959 = vrcp.f32 %v1328_v20  ;;  %v1185_v20 = vld [vmem:[#allocation3 + $0x178] sm:$0xff] }
 0x325   :  { %v4936_v15 = vpop.eup %4935  ;;  %4961 = vrcp.f32 %v1092_v63  ;;  %v1090_v34 = vadd.f32 1.0, %v4934_v1  ;;  %v1032_v1 = vadd.f32 %v6312_v38, %v6140_v10  ;;  %v1271_v63 = vpop.f32.mrf.mxu0  ;;  %v1298_v45 = vadd.f32 %v4447_v0, %v1185_v20 }
 0x326   :  { %v4938_v23 = vpop.eup %4937  ;;  %4963 = vtanh.f32 %v1291_v54  ;;  %v4427_v2 = vpop.f32.mrf.mxu1  ;;  %v1056_v38 = vadd.f32 %v4426_v4, %v6134_v36 }
 0x327   :  { %v4940_v29 = vpop.eup %4939  ;;  %4965 = vrcp.f32 %v1090_v34  ;;  %v3952_v59 = vmul.f32 -1.442695, %v1298_v45 }
 0x328   :  { %v4942_v60 = vpop.eup %4941  ;;  %4967 = vpow2.f32 %v3926_v51  ;;  %v1381_v22 = vmul.f32 %v4940_v29, %v4936_v15  ;;  %v1043_v51 = vadd.f32 %v6314_v52, %v6130_v27  ;;  %v3949_v29 = vmul.f32 -1.442695, %v1295_v26  ;;  %v1050_v0 = vpop.f32.mrf.mxu1 }
 0x329   :  { %v4944_v39 = vpop.eup %4943  ;;  %v1093_v11 = vadd.f32 1.0, %v4942_v60  ;;  %4969 = vtanh.f32 %v1294_v62  ;;  %v1087_v62 = vadd.f32 1.0, %v4932_v50  ;;  %v1296_v15 = vadd.f32 %v1271_v63, %v1183_v58 }
 0x32a   :  { %v6322_v54 = vpop.eup %4945  ;;  %4971 = vtanh.f32 %v1040_v21  ;;  %v1059_v50 = vadd.f32 %v4427_v2, %v6138_v53 }
 0x32b   :  { %v4948_v56 = vpop.eup %4947  ;;  %4973 = vrcp.f32 %v1093_v11  ;;  %v1048_v11 = vadd.f32 %v1047_v5, %v6160_v42  ;;  %v3950_v20 = vmul.f32 -1.442695, %v1296_v15 }
 0x32c   :  { %v4950_v34 = vpop.eup %4949  ;;  %v1377_v60 = vmul.f32 %v4948_v56, %v6191_v16  ;;  %4975 = vtanh.f32 %v1292_v7  ;;  %v3931_v7 = vmul.f32 -1.442695, %v1056_v38  ;;  %v3932_v58 = vmul.f32 -1.442695, %v1059_v50 }
 0x32d   :  { %v4952_v31 = vpop.eup %4951  ;;  %4977 = vtanh.f32 %v1032_v1  ;;  %v3929_v26 = vmul.f32 -1.442695, %v1048_v11 }
 0x32e   :  { %v4954_v21 = vpop.eup %4953  ;;  %v6328_v19 = vadd.f32 %v1381_v22, %v1377_v60  ;;  %4979 = vpow2.f32 %v3951_v25  ;;  %v1051_v22 = vadd.f32 %v1050_v0, %v6176_v32 }
 0x32f   :  { %v4956_v52 = vpop.eup %4955  ;;  %4981 = vtanh.f32 %v1043_v51  ;;  %v1375_v5 = vmul.f32 %v4954_v21, %v6199_v40  ;;  %v1035_v51 = vadd.f32 %v6316_v37, %v6150_v33 }
 0x330   :  { %v4958_v16 = vpop.eup %4957  ;;  %4983 = vrcp.f32 %v1087_v62 }
 0x331   :  { %v4960_v4 = vpop.eup %4959  ;;  %4985 = vpow2.f32 %v3949_v29  ;;  %v1378_v2 = vmul.f32 %v4958_v16, %v6205_v28  ;;  %v3930_v29 = vmul.f32 -1.442695, %v1051_v22 }
 0x332   :  { %v4962_v1 = vpop.eup %4961  ;;  %4987 = vtanh.f32 %v6328_v19  ;;  %v1376_v37 = vmul.f32 %v4960_v4, %v6209_v43 }
 0x333   :  { %v4964_v25 = vpop.eup %4963  ;;  %4989 = vpow2.f32 %v3952_v59  ;;  %v1140_v38 = vmul.f32 %v4962_v1, %v6183_v9 }
 0x334   :  { %v4966_v63 = vpop.eup %4965  ;;  %v1379_v56 = vmul.f32 %v4964_v25, %v4938_v23  ;;  %4991 = vpow2.f32 %v3931_v7 }
 0x335   :  { %v4968_v45 = vpop.eup %4967  ;;  %4993 = vpow2.f32 %v3950_v20  ;;  %v1138_v50 = vmul.f32 %v4966_v63, %v6187_v35 }
 0x336   :  { %v4970_v62 = vpop.eup %4969  ;;  %v1091_v60 = vadd.f32 1.0, %v4968_v45  ;;  %4995 = vpow2.f32 %v3929_v26  ;;  %v6339_v40 = vadd.f32 %v1379_v56, %v1375_v5  ;;  %v726_v56 = vlaneseq  ;;  %v6364_v45 = vld [vmem:[%s7331_s0] sm:$0x1] }
 0x337   :  { %v4972_v15 = vpop.eup %4971  ;;  %v1382_v21 = vmul.f32 %v4970_v62, %v4944_v39  ;;  %4997 = vpow2.f32 %v3932_v58  ;;  %vm724_vm2 = vcmp.eq.s32.totalorder %v6364_v45, 1  ;;  %vm1158_vm3 = vcmp.eq.s32.totalorder %v6364_v45, 2 }
 0x338   :  { %v4974_v23 = vpop.eup %4973  ;;  %v1144_v11 = vmul.f32 %v4972_v15, %v4950_v34  ;;  %4999 = vtanh.f32 %v1035_v51  ;;  %vm1592_vm6 = vcmp.eq.s32.totalorder %v6364_v45, 3  ;;  %v6554_v45 = vld [vmem:[%s7333_s2 + $0x10] sm:$0xff]  }
 0x339   :  { %v4976_v59 = vpop.eup %4975  ;;  %5001 = vrcp.f32 %v1091_v60  ;;  %v6342_v28 = vadd.f32 %v1382_v21, %v1378_v2  ;;  %v1141_v34 = vmul.f32 %v4974_v23, %v6196_v30  ;;  %v727_v21 = vshrl.u32 %v726_v56, 7 }
 0x33a   :  { %v4978_v0 = vpop.eup %4977  ;;  %v6345_v9 = vadd.f32 %v1144_v11, %v1140_v38  ;;  %v1380_v16 = vmul.f32 %v4976_v59, %v6322_v54  ;;  %5003 = vpow2.f32 %v3930_v29 }
 0x33b   :  { %v4980_v7 = vpop.eup %4979  ;;  %5005 = vtanh.f32 %v6339_v40  ;;  %v1142_v39 = vmul.f32 %v4978_v0, %v4952_v31 }
 0x33c   :  { %v4982_v43 = vpop.eup %4981  ;;  %5007 = vtanh.f32 %v6342_v28  ;;  %v6351_v4 = vadd.f32 %v1380_v16, %v1376_v37  ;;  %v1365_v20 = vadd.f32 1.0, %v4980_v7  ;;  %v7380_v16 = vmov 0  }
 0x33d   :  { %v4984_v1 = vpop.eup %4983  ;;  %5009 = vtanh.f32 %v6345_v9  ;;  %v6354_v35 = vadd.f32 %v1142_v39, %v1138_v50  ;;  %v1145_v26 = vmul.f32 %v4982_v43, %v4956_v52  ;;  %v725_v7 = vsel %vm724_vm2, 1, %v7380_v16 }
 0x33e   :  { %v4986_v54 = vpop.eup %4985  ;;  %5011 = vtanh.f32 %v6351_v4  ;;  %v6372_v43 = vsub.s32 0, %v727_v21 }
 0x33f   :  { %v4988_v22 = vpop.eup %4987  ;;  %5013 = vtanh.f32 %v6354_v35  ;;  %v6358_v31 = vadd.f32 %v1145_v26, %v1141_v34  ;;  %v1363_v30 = vadd.f32 1.0, %v4986_v54 }
 0x340   :  { %v4990_v25 = vpop.eup %4989  ;;  %5015 = vrcp.f32 %v1365_v20  ;;  %v1159_v20 = vsel %vm1158_vm3, 1, %v7380_v16 }
 0x341   :  { %v4992_v5 = vpop.eup %4991  ;;  %5017 = vtanh.f32 %v6358_v31  ;;  %v1366_v58 = vadd.f32 1.0, %v4990_v25 }
 0x342   :  { %v4994_v63 = vpop.eup %4993  ;;  %5019 = vrcp.f32 %v1363_v30  ;;  %v1128_v51 = vadd.f32 1.0, %v4992_v5  ;;  %v1163_v30 = vrot.slane %v1159_v20, %v6372_v43 }
 0x343   :  { %v4996_v52 = vpop.eup %4995  ;;  %5021 = vrcp.f32 %v1366_v58  ;;  %v1364_v2 = vadd.f32 1.0, %v4994_v63 }
 0x344   :  { %v4998_v62 = vpop.eup %4997  ;;  %5023 = vrcp.f32 %v1128_v51  ;;  %v1126_v60 = vadd.f32 1.0, %v4996_v52  ;;  %vm6382_vm5 = vcmp.eq.s32.totalorder %v1163_v30, 1  ;;  %v1604_v30 = vld [vmem:[#allocation3 + $0x180] sm:$0xff] }
 0x345   :  { %v5000_v38 = vpop.eup %4999  ;;  %5025 = vrcp.f32 %v1364_v2  ;;  %v1129_v29 = vadd.f32 1.0, %v4998_v62 }
 0x346   :  { %v5002_v15 = vpop.eup %5001  ;;  %5027 = vrcp.f32 %v1126_v60  ;;  %v1143_v37 = vmul.f32 %v5000_v38, %v4984_v1  ;;  %v729_v1 = vrot.slane %v725_v7, %v6372_v43 }
 0x347   :  { %v5004_v23 = vpop.eup %5003  ;;  %v1139_v11 = vmul.f32 %v5002_v15, %v6213_v18  ;;  %5029 = vrcp.f32 %v1129_v29 }
 0x348   :  { %v5006_v59 = vpop.eup %5005  ;;  %v1127_v50 = vadd.f32 1.0, %v5004_v23  ;;  %vm6378_vm4 = vcmp.eq.s32.totalorder %v729_v1, 1 }
 0x349   :  { %v5008_v0 = vpop.eup %5007  ;;  %v6370_v39 = vadd.f32 %v1143_v37, %v1139_v11  ;;  %v733_v29 = vsel %vm6378_vm4, %v6216_v41, 0.0  ;;  %v734_v41 = vsel %vm6378_vm4, %v6218_v44, 0.0  ;;  %v732_v1 = vsel %vm6378_vm4, %v6224_v12, 0.0  ;;  %v6425_v12 = vld [vmem:[%s7334_s3 + $0x8] sm:$0xff]  }
 0x34a   :  { %v5010_v34 = vpop.eup %5009  ;;  %5031 = vrcp.f32 %v1127_v50  ;;  %v731_v50 = vsel %vm6378_vm4, %v6222_v57, 0.0 }
 0x34b   :  { %v5012_v26 = vpop.eup %5011  ;;  %5033 = vtanh.f32 %v6370_v39 }
 0x34c   :  { %v5014_v18 = vpop.eup %5013 }
 0x34d   :  { %v5016_v54 = vpop.eup %5015 }
 0x34e   :  { %v5018_v25 = vpop.eup %5017  ;;  %v1393_v51 = vmul.f32 %v5016_v54, %v4988_v22 }
 0x34f   :  { %v5020_v5 = vpop.eup %5019 }
 0x350   :  { %v5022_v58 = vpop.eup %5021  ;;  %v1391_v21 = vmul.f32 %v5020_v5, %v5006_v59 }
 0x351   :  { %v5024_v56 = vpop.eup %5023  ;;  %v1394_v52 = vmul.f32 %v5022_v58, %v5008_v0  ;;  %v1607_v58 = vld [vmem:[#allocation3 + $0x198] sm:$0xff] }
 0x352   :  { %v5026_v62 = vpop.eup %5025  ;;  %v1156_v60 = vmul.f32 %v5024_v56, %v5010_v34 }
 0x353   :  { %v5028_v38 = vpop.eup %5027  ;;  %v1396_v15 = vpack.c.bf16 %v1394_v52, %v1393_v51  ;;  %v1392_v23 = vmul.f32 %v5026_v62, %v5012_v26  ;;  %v1605_v52 = vld [vmem:[#allocation3 + $0x188] sm:$0xff] }
 0x354   :  { %v5030_v11 = vpop.eup %5029  ;;  %v6391_v37 = vsel %vm6382_vm5, %v1156_v60, %v733_v29  ;;  %v1154_v22 = vmul.f32 %v5028_v38, %v5014_v18  ;;  %v1610_v38 = vld [vmem:[#allocation3 + $0x1b0] sm:$0xff] }
 0x355   :  { %4472 = vmatprep.subr.bf16.mxu0 %v1396_v15  ;;  %v1395_v0 = vpack.c.bf16 %v1392_v23, %v1391_v21  ;;  %v1157_v7 = vmul.f32 %v5030_v11, %v5018_v25 }
 0x356   :  { %4473 = vmatpush3.bf16.msra.mxu0 %v1396_v15  ;;  %v6401_v59 = vsel %vm6382_vm5, %v1154_v22, %v731_v50  ;;  %v1611_v50 = vld [vmem:[#allocation3 + $0x1b8] sm:$0xff] }
 0x357   :  { %v5032_v34 = vpop.eup %5031  ;;  %4474 = vmatprep.subr.bf16.mxu0 %v1395_v0  ;;  %v6405_v20 = vsel %vm6382_vm5, %v1157_v7, %v734_v41  ;;  %v1398_v26 = vpack.c.bf16 %v1157_v7, %v1156_v60 }
 0x358   :  { %v5034_v57 = vpop.eup %5033 }
 0x359   :  { %4448 = vmatprep.subr.bf16.mxu1 %v1398_v26  ;;  %v1155_v18 = vmul.f32 %v5034_v57, %v5032_v34  ;;  %v1609_v34 = vld [vmem:[#allocation3 + $0x1a8] sm:$0xff] }
 0x35a   :  { %4475 = vmatpush3.bf16.msra.mxu0 %v1395_v0  ;;  %4449 = vmatpush3.bf16.msra.mxu1 %v1398_v26 }
 0x35b   :  { %v6412_v44 = vsel %vm6382_vm5, %v1155_v18, %v732_v1  ;;  %v1397_v54 = vpack.c.bf16 %v1155_v18, %v1154_v22 }
 0x35d   :  { %4477 = vmatmul.mubr.msk.bf16.vlgmr.msra.gmra.mxu0 %vm133_vm0, %v6231_v13  ;;  %4450 = vmatprep.subr.bf16.mxu1 %v1397_v54  ;;  %v6432_v13 = vld [vmem:[%s7334_s3 + $0x10] sm:$0xff]  }
 0x35e   :  { %4451 = vmatpush3.bf16.msra.mxu1 %v1397_v54  ;;  %4480 = vmatprep.mubr.msk.bf16.mxu0 %vm133_vm0, %v6238_v61  ;;  %v6443_v61 = vld [vmem:[%s7334_s3 + $0x18] sm:$0xff]  }
 0x35f   :  { %4452 = vmatprep.subr.bf16.mxu1 %v1396_v15 }
 0x362   :  { %4453 = vmatpush3.bf16.msra.mxu1 %v1396_v15 }
 0x363   :  { %4454 = vmatprep.subr.bf16.mxu1 %v1395_v0 }
 0x365   :  { %4481 = vmatmul.mubr.msk.bf16.gmra.mxu0 %vm133_vm0, %v6249_v17  ;;  %v6450_v17 = vld [vmem:[%s7334_s3 + $0x20] sm:$0xff]  }
 0x366   :  { %4455 = vmatpush3.bf16.msra.mxu1 %v1395_v0  ;;  %4484 = vmatprep.mubr.msk.bf16.mxu0 %vm133_vm0, %v6256_v24  ;;  %v6461_v24 = vld [vmem:[%s7334_s3 + $0x28] sm:$0xff]  }
 0x369   :  { %4457 = vmatmul.mubr.msk.bf16.vlgmr.msra.gmra.mxu1 %vm506_vm1, %v6425_v12 }
 0x36a   :  { %4460 = vmatprep.mubr.msk.bf16.mxu1 %vm506_vm1, %v6432_v13 }
 0x36d   :  { %4485 = vmatmul.mubr.msk.bf16.gmra.mxu0 %vm133_vm0, %v6267_v46  ;;  %v6468_v46 = vld [vmem:[%s7334_s3 + $0x30] sm:$0xff]  }
 0x36e   :  { %4488 = vmatprep.mubr.msk.bf16.mxu0 %vm133_vm0, %v6274_v47  ;;  %v6475_v47 = vld [vmem:[%s7334_s3 + $0x38] sm:$0xff]  }
 0x371   :  { %4461 = vmatmul.mubr.msk.bf16.gmra.mxu1 %vm506_vm1, %v6443_v61 }
 0x372   :  { %4464 = vmatprep.mubr.msk.bf16.mxu1 %vm506_vm1, %v6450_v17 }
 0x375   :  { %4489 = vmatmul.mubr.msk.bf16.gmra.mxu0 %vm133_vm0, %v6285_v48  ;;  %v1606_v48 = vld [vmem:[#allocation3 + $0x190] sm:$0xff] }
 0x376   :  { %4520 = vmatprep.mubr.msk.bf16.mxu0 %vm133_vm0, %v6292_v49 }
 0x379   :  { %4465 = vmatmul.mubr.msk.bf16.gmra.mxu1 %vm506_vm1, %v6461_v24 }
 0x37a   :  { %4468 = vmatprep.mubr.msk.bf16.mxu1 %vm506_vm1, %v6468_v46 }
 0x381   :  { %4469 = vmatmul.mubr.msk.bf16.gmra.mxu1 %vm506_vm1, %v6475_v47 }
 0x382   :  { %4500 = vmatprep.mubr.msk.bf16.mxu1 %vm506_vm1, %v6301_v3  ;;  %v1608_v3 = vld [vmem:[#allocation3 + $0x1a0] sm:$0xff] }
 0x41d   :  { %v4478_v49 = vpop.f32.mrf.mxu0 }
 0x41e   :  { %v1719_v25 = vadd.f32 %v4478_v49, %v1606_v48 }
 0x41f   :  { %v1654_v5 = vpop.f32.mrf.mxu0 }
 0x420   :  { %v3983_v63 = vmul.f32 -1.442695, %v1719_v25  ;;  %v1717_v56 = vadd.f32 %v1654_v5, %v1604_v30  ;;  %v1614_v5 = vld [vmem:[#allocation3 + $0x1d0] sm:$0xff] }
 0x421   :  { %v4479_v51 = vpop.f32.mrf.mxu0 }
 0x422   :  { %5035 = vpow2.f32 %v3983_v63  ;;  %v3981_v2 = vmul.f32 -1.442695, %v1717_v56  ;;  %v1720_v62 = vadd.f32 %v4479_v51, %v1607_v58 }
 0x423   :  { %v1657_v60 = vpop.f32.mrf.mxu0 }
 0x424   :  { %5037 = vpow2.f32 %v3981_v2  ;;  %v3984_v29 = vmul.f32 -1.442695, %v1720_v62  ;;  %v1718_v15 = vadd.f32 %v1657_v60, %v1605_v52 }
 0x425   :  { %v4482_v21 = vpop.f32.mrf.mxu0 }
 0x426   :  { %5039 = vpow2.f32 %v3984_v29  ;;  %v3982_v23 = vmul.f32 -1.442695, %v1718_v15  ;;  %v1723_v11 = vadd.f32 %v4482_v21, %v1610_v38  ;;  %v1612_v21 = vld [vmem:[#allocation3 + $0x1c0] sm:$0xff] }
 0x427   :  { %v1670_v22 = vpop.f32.mrf.mxu0 }
 0x428   :  { %5041 = vpow2.f32 %v3982_v23  ;;  %v3987_v0 = vmul.f32 -1.442695, %v1723_v11  ;;  %v1721_v7 = vadd.f32 %v1670_v22, %v1608_v3  ;;  %v7385_v11 = vld [vmem:[#allocation13_spill] sm:$0xff] }
 0x429   :  { %v4483_v41 = vpop.f32.mrf.mxu0  ;;  %v4458_v26 = vpop.f32.mrf.mxu1 }
 0x42a   :  { %5043 = vpow2.f32 %v3987_v0  ;;  %v3985_v57 = vmul.f32 -1.442695, %v1721_v7  ;;  %v1724_v18 = vadd.f32 %v4483_v41, %v1611_v50  ;;  %v1442_v1 = vadd.f32 %v4458_v26, %v6092_v6 }
 0x42b   :  { %v1673_v54 = vpop.f32.mrf.mxu0  ;;  %v1433_v48 = vpop.f32.mrf.mxu1 }
 0x42c   :  { %5045 = vpow2.f32 %v3985_v57  ;;  %v3988_v49 = vmul.f32 -1.442695, %v1724_v18  ;;  %v1722_v30 = vadd.f32 %v1673_v54, %v1609_v34  ;;  %v3963_v25 = vmul.f32 -1.442695, %v1442_v1  ;;  %v1615_v1 = vld [vmem:[#allocation3 + $0x1d8] sm:$0xff] }
 0x42d   :  { %v1434_v58 = vadd.f32 %v1433_v48, %v6100_v55  ;;  %v4486_v63 = vpop.f32.mrf.mxu0  ;;  %v4459_v56 = vpop.f32.mrf.mxu1 }
 0x42e   :  { %5047 = vpow2.f32 %v3988_v49  ;;  %v3986_v51 = vmul.f32 -1.442695, %v1722_v30  ;;  %v1445_v52 = vadd.f32 %v4459_v56, %v6096_v8  ;;  %v1727_v60 = vadd.f32 %v4486_v63, %v1614_v5  ;;  %v7386_v49 = vld [vmem:[#allocation9_spill] sm:$0xff] }
 0x42f   :  { %v5036_v2 = vpop.eup %5035  ;;  %5049 = vpow2.f32 %v3963_v25  ;;  %v3961_v62 = vmul.f32 -1.442695, %v1434_v58  ;;  %v1686_v38 = vpop.f32.mrf.mxu0 }
 0x430   :  { %v1436_v29 = vpop.f32.mrf.mxu1  ;;  %v1759_v15 = vadd.f32 1.0, %v5036_v2  ;;  %5051 = vpow2.f32 %v3986_v51  ;;  %v3964_v23 = vmul.f32 -1.442695, %v1445_v52  ;;  %v1725_v34 = vadd.f32 %v1686_v38, %v1612_v21  ;;  %v1613_v21 = vld [vmem:[#allocation3 + $0x1c8] sm:$0xff] }
 0x431   :  { %v5038_v3 = vpop.eup %5037  ;;  %5053 = vpow2.f32 %v3961_v62  ;;  %v1437_v22 = vadd.f32 %v1436_v29, %v7385_v11  ;;  %v4487_v50 = vpop.f32.mrf.mxu0 }
 0x432   :  { %v4462_v0 = vpop.f32.mrf.mxu1  ;;  %5055 = vrcp.f32 %v1759_v15  ;;  %v1757_v7 = vadd.f32 1.0, %v5038_v3  ;;  %v1728_v63 = vadd.f32 %v4487_v50, %v1615_v1  ;;  %v7387_v3 = vld [vmem:[#allocation14_spill] sm:$0xff] }
 0x433   :  { %v5040_v41 = vpop.eup %5039  ;;  %5057 = vtanh.f32 %v1727_v60  ;;  %v1689_v26 = vpop.f32.mrf.mxu0  ;;  %v3962_v48 = vmul.f32 -1.442695, %v1437_v22  ;;  %v1458_v30 = vadd.f32 %v4462_v0, %v7386_v49  ;;  %v1618_v60 = vld [vmem:[#allocation3 + $0x1f0] sm:$0xff] }
 0x434   :  { %v1449_v57 = vpop.f32.mrf.mxu1  ;;  %5059 = vrcp.f32 %v1757_v7  ;;  %v1760_v18 = vadd.f32 1.0, %v5040_v41 }
 0x435   :  { %v5042_v54 = vpop.eup %5041  ;;  %5061 = vpow2.f32 %v3964_v23  ;;  %v4490_v56 = vpop.f32.mrf.mxu0  ;;  %v3967_v62 = vmul.f32 -1.442695, %v1458_v30  ;;  %v1450_v23 = vadd.f32 %v1449_v57, %v7387_v3  ;;  %v1726_v30 = vadd.f32 %v1689_v26, %v1613_v21  ;;  %v1619_v3 = vld [vmem:[#allocation3 + $0x1f8] sm:$0xff] }
 0x436   :  { %v4463_v25 = vpop.f32.mrf.mxu1  ;;  %5063 = vrcp.f32 %v1760_v18  ;;  %v1758_v5 = vadd.f32 1.0, %v5042_v54  ;;  %v1731_v41 = vadd.f32 %v4490_v56, %v1618_v60  ;;  %v7389_v60 = vld [vmem:[#allocation15_spill] sm:$0xff] }
 0x437   :  { %v5044_v58 = vpop.eup %5043  ;;  %5065 = vtanh.f32 %v1725_v34  ;;  %v1702_v22 = vpop.f32.mrf.mxu0  ;;  %v1616_v34 = vld [vmem:[#allocation3 + $0x1e0] sm:$0xff] }
 0x438   :  { %v1452_v51 = vpop.f32.mrf.mxu1  ;;  %5067 = vrcp.f32 %v1758_v5  ;;  %v1763_v52 = vadd.f32 1.0, %v5044_v58  ;;  %v7388_v5 = vld [vmem:[#allocation11_spill] sm:$0xff]  ;;  %v3991_v56 = vmul.f32 -1.442695, %v1731_v41 }
 0x439   :  { %v5046_v2 = vpop.eup %5045  ;;  %5069 = vpow2.f32 %v3962_v48  ;;  %v1461_v58 = vadd.f32 %v4463_v25, %v7388_v5  ;;  %v4491_v49 = vpop.f32.mrf.mxu0 }
 0x43a   :  { %v4466_v38 = vpop.f32.mrf.mxu1  ;;  %5071 = vrcp.f32 %v1763_v52  ;;  %v1761_v29 = vadd.f32 1.0, %v5046_v2  ;;  %v3965_v52 = vmul.f32 -1.442695, %v1450_v23  ;;  %v1729_v2 = vadd.f32 %v1702_v22, %v1616_v34 }
 0x43b   :  { %v5048_v15 = vpop.eup %5047  ;;  %5073 = vtanh.f32 %v1728_v63  ;;  %v3968_v26 = vmul.f32 -1.442695, %v1461_v58  ;;  %v1732_v21 = vadd.f32 %v4491_v49, %v1619_v3  ;;  %v1474_v49 = vadd.f32 %v4466_v38, %v6124_v14 }
 0x43c   :  { %v6487_v0 = vpop.f32.mrf.mxu1  ;;  %v5050_v50 = vpop.eup %5049  ;;  %5075 = vrcp.f32 %v1761_v29  ;;  %v1764_v7 = vadd.f32 1.0, %v5048_v15 }
 0x43d   :  { %v5052_v18 = vpop.eup %5051  ;;  %v1522_v1 = vadd.f32 1.0, %v5050_v50  ;;  %5077 = vpow2.f32 %v3967_v62  ;;  %v1453_v50 = vadd.f32 %v1452_v51, %v7389_v60 }
 0x43e   :  { %v5054_v54 = vpop.eup %5053  ;;  %5079 = vrcp.f32 %v1764_v7  ;;  %v1762_v48 = vadd.f32 1.0, %v5052_v18  ;;  %v4467_v29 = vpop.f32.mrf.mxu1 }
 0x43f   :  { %v5056_v63 = vpop.eup %5055  ;;  %5081 = vrcp.f32 %v1522_v1  ;;  %v1520_v57 = vadd.f32 1.0, %v5054_v54  ;;  %v3989_v1 = vmul.f32 -1.442695, %v1729_v2  ;;  %v3966_v34 = vmul.f32 -1.442695, %v1453_v50  ;;  %v1617_v54 = vld [vmem:[#allocation3 + $0x1e8] sm:$0xff] }
 0x440   :  { %v5058_v15 = vpop.eup %5057  ;;  %5083 = vrcp.f32 %v1762_v48  ;;  %v6491_v23 = vpop.f32.mrf.mxu1 }
 0x441   :  { %v5060_v62 = vpop.eup %5059  ;;  %5085 = vrcp.f32 %v1520_v57  ;;  %v1705_v48 = vpop.f32.mrf.mxu0  ;;  %v1815_v60 = vmul.f32 %v5058_v15, %v5056_v63  ;;  %v3992_v57 = vmul.f32 -1.442695, %v1732_v21 }
 0x442   :  { %v5062_v7 = vpop.eup %5061  ;;  %5087 = vtanh.f32 %v1726_v30  ;;  %v1730_v3 = vadd.f32 %v1705_v48, %v1617_v54 }
 0x443   :  { %v5064_v25 = vpop.eup %5063  ;;  %v1523_v18 = vadd.f32 1.0, %v5062_v7  ;;  %5089 = vpow2.f32 %v3965_v52  ;;  %v4470_v52 = vpop.f32.mrf.mxu1 }
 0x444   :  { %v5066_v22 = vpop.eup %5065  ;;  %5091 = vpow2.f32 %v3991_v56  ;;  %v3990_v38 = vmul.f32 -1.442695, %v1730_v3 }
 0x445   :  { %v5068_v41 = vpop.eup %5067  ;;  %5093 = vrcp.f32 %v1523_v18  ;;  %v1813_v56 = vmul.f32 %v5066_v22, %v5060_v62 }
 0x446   :  { %v5070_v51 = vpop.eup %5069  ;;  %5095 = vpow2.f32 %v3968_v26 }
 0x447   :  { %v5072_v30 = vpop.eup %5071  ;;  %v1521_v58 = vadd.f32 1.0, %v5070_v51  ;;  %5097 = vpow2.f32 %v3989_v1  ;;  %v1481_v1 = vpop.f32.mrf.mxu1 }
 0x448   :  { %v5074_v2 = vpop.eup %5073  ;;  %v1811_v7 = vmul.f32 %v5072_v30, %v6328_v19  ;;  %5099 = vpow2.f32 %v3966_v34  ;;  %v1477_v34 = vadd.f32 %v4467_v29, %v6130_v27 }
 0x449   :  { %v5076_v50 = vpop.eup %5075  ;;  %5101 = vrcp.f32 %v1521_v58  ;;  %v1816_v15 = vmul.f32 %v5074_v2, %v5064_v25  ;;  %v4471_v51 = vpop.f32.mrf.mxu1 }
 0x44a   :  { %v5078_v5 = vpop.eup %5077  ;;  %v6495_v18 = vadd.f32 %v1815_v60, %v1811_v7  ;;  %v1809_v63 = vmul.f32 %v5076_v50, %v6339_v40  ;;  %5103 = vpow2.f32 %v3992_v57  ;;  %v1466_v40 = vadd.f32 %v6487_v0, %v6140_v10 }
 0x44b   :  { %v5080_v26 = vpop.eup %5079  ;;  %v1526_v21 = vadd.f32 1.0, %v5078_v5  ;;  %5105 = vtanh.f32 %v1474_v49  ;;  %v1484_v29 = vpop.f32.mrf.mxu1  ;;  %v1482_v50 = vadd.f32 %v1481_v1, %v6160_v42 }
 0x44c   :  { %v6498_v54 = vpop.eup %5081  ;;  %5107 = vtanh.f32 %v6495_v18  ;;  %v6501_v19 = vadd.f32 %v1813_v56, %v1809_v63  ;;  %v1812_v62 = vmul.f32 %v5080_v26, %v6342_v28  ;;  %v1493_v26 = vadd.f32 %v4471_v51, %v6138_v53 }
 0x44d   :  { %v5084_v22 = vpop.eup %5083  ;;  %5109 = vrcp.f32 %v1526_v21  ;;  %v3969_v1 = vmul.f32 -1.442695, %v1482_v50 }
 0x44e   :  { %v6506_v60 = vpop.eup %5085  ;;  %5111 = vtanh.f32 %v6501_v19  ;;  %v6509_v5 = vadd.f32 %v1816_v15, %v1812_v62  ;;  %v1810_v25 = vmul.f32 %v5084_v22, %v6351_v4  ;;  %v1490_v4 = vadd.f32 %v4470_v52, %v6134_v36 }
 0x44f   :  { %v5088_v48 = vpop.eup %5087  ;;  %5113 = vpow2.f32 %v3990_v38  ;;  %v1469_v15 = vadd.f32 %v6491_v23, %v6150_v33  ;;  %v1485_v52 = vadd.f32 %v1484_v29, %v6176_v32 }
 0x450   :  { %v5090_v57 = vpop.eup %5089  ;;  %5115 = vtanh.f32 %v6509_v5  ;;  %v1814_v28 = vmul.f32 %v5088_v48, %v5068_v41  ;;  %v3971_v22 = vmul.f32 -1.442695, %v1490_v4  ;;  %v3972_v48 = vmul.f32 -1.442695, %v1493_v26 }
 0x451   :  { %v5092_v30 = vpop.eup %5091  ;;  %v1524_v58 = vadd.f32 1.0, %v5090_v57  ;;  %5117 = vtanh.f32 %v1466_v40  ;;  %v3970_v23 = vmul.f32 -1.442695, %v1485_v52 }
 0x452   :  { %v5094_v0 = vpop.eup %5093  ;;  %v6514_v49 = vadd.f32 %v1814_v28, %v1810_v25  ;;  %v1799_v3 = vadd.f32 1.0, %v5092_v30  ;;  %5119 = vtanh.f32 %v1477_v34 }
 0x453   :  { %v5096_v2 = vpop.eup %5095  ;;  %5121 = vrcp.f32 %v1524_v58 }
 0x454   :  { %v5098_v7 = vpop.eup %5097  ;;  %5123 = vtanh.f32 %v6514_v49  ;;  %v1527_v56 = vadd.f32 1.0, %v5096_v2 }
 0x455   :  { %v5100_v41 = vpop.eup %5099  ;;  %5125 = vrcp.f32 %v1799_v3  ;;  %v1797_v63 = vadd.f32 1.0, %v5098_v7 }
 0x456   :  { %v5102_v21 = vpop.eup %5101  ;;  %5127 = vrcp.f32 %v1527_v56  ;;  %v1525_v38 = vadd.f32 1.0, %v5100_v41 }
 0x457   :  { %v5104_v62 = vpop.eup %5103  ;;  %5129 = vrcp.f32 %v1797_v63 }
 0x458   :  { %v5106_v40 = vpop.eup %5105  ;;  %5131 = vrcp.f32 %v1525_v38  ;;  %v1800_v25 = vadd.f32 1.0, %v5104_v62 }
 0x459   :  { %v5108_v34 = vpop.eup %5107  ;;  %5133 = vtanh.f32 %v1469_v15  ;;  %v1578_v41 = vmul.f32 %v5106_v40, %v6498_v54 }
 0x45a   :  { %v5110_v57 = vpop.eup %5109  ;;  %5135 = vrcp.f32 %v1800_v25 }
 0x45b   :  { %v5112_v28 = vpop.eup %5111  ;;  %5137 = vpow2.f32 %v3971_v22  ;;  %v1574_v29 = vmul.f32 %v5110_v57, %v6345_v9 }
 0x45c   :  { %v5114_v51 = vpop.eup %5113  ;;  %5139 = vpow2.f32 %v3969_v1 }
 0x45d   :  { %v5116_v30 = vpop.eup %5115  ;;  %v1798_v58 = vadd.f32 1.0, %v5114_v51  ;;  %5141 = vpow2.f32 %v3972_v48  ;;  %v6527_v38 = vadd.f32 %v1578_v41, %v1574_v29 }
 0x45e   :  { %v5118_v3 = vpop.eup %5117  ;;  %5143 = vpow2.f32 %v3970_v23 }
 0x45f   :  { %v5120_v2 = vpop.eup %5119  ;;  %5145 = vrcp.f32 %v1798_v58  ;;  %v1576_v15 = vmul.f32 %v5118_v3, %v6506_v60 }
 0x460   :  { %v5122_v4 = vpop.eup %5121  ;;  %v1579_v62 = vmul.f32 %v5120_v2, %v5094_v0  ;;  %5147 = vtanh.f32 %v6527_v38 }
 0x461   :  { %v5124_v7 = vpop.eup %5123  ;;  %v1572_v56 = vmul.f32 %v5122_v4, %v6354_v35 }
 0x462   :  { %v5126_v50 = vpop.eup %5125 }
 0x463   :  { %v5128_v63 = vpop.eup %5127  ;;  %v6530_v25 = vadd.f32 %v1576_v15, %v1572_v56  ;;  %v1827_v60 = vmul.f32 %v5126_v50, %v5108_v34  ;;  %v1593_v56 = vsel %vm1592_vm6, 1, %v7380_v16  ;;  %v6547_v15 = vld [vmem:[%s7333_s2 + $0x8] sm:$0xff]  }
 0x464   :  { %v5130_v26 = vpop.eup %5129  ;;  %v1575_v52 = vmul.f32 %v5128_v63, %v6358_v31  ;;  %v1597_v41 = vrot.slane %v1593_v56, %v6372_v43 }
 0x465   :  { %v5132_v22 = vpop.eup %5131  ;;  %5149 = vtanh.f32 %v6530_v25 }
 0x466   :  { %v5134_v9 = vpop.eup %5133  ;;  %v6532_v1 = vadd.f32 %v1579_v62, %v1575_v52  ;;  %v1573_v35 = vmul.f32 %v5132_v22, %v6370_v39  ;;  %vm6558_vm7 = vcmp.eq.s32.totalorder %v1597_v41, 1  ;;  %v2039_v41 = vld [vmem:[#allocation3 + $0x208] sm:$0xff]  ;;  %v6789_v52 = vld [vmem:[%s7334_s3 + $0x20] sm:$0xff]  }
 0x467   :  { %v5136_v48 = vpop.eup %5135  ;;  %v1577_v57 = vmul.f32 %v5134_v9, %v5102_v21 }
 0x468   :  { %v5138_v54 = vpop.eup %5137  ;;  %v1828_v40 = vmul.f32 %v5136_v48, %v5116_v30  ;;  %5151 = vtanh.f32 %v6532_v1  ;;  %v1825_v30 = vmul.f32 %v5130_v26, %v5112_v28 }
 0x469   :  { %v5140_v23 = vpop.eup %5139  ;;  %v6537_v31 = vadd.f32 %v1577_v57, %v1573_v35  ;;  %v1562_v0 = vadd.f32 1.0, %v5138_v54 }
 0x46a   :  { %v5142_v51 = vpop.eup %5141  ;;  %v1560_v58 = vadd.f32 1.0, %v5140_v23  ;;  %v1830_v3 = vpack.c.bf16 %v1828_v40, %v1827_v60 }
 0x46b   :  { %v5144_v2 = vpop.eup %5143  ;;  %5153 = vtanh.f32 %v6537_v31  ;;  %v1563_v39 = vadd.f32 1.0, %v5142_v51  ;;  %v6587_v51 = vld [vmem:[%s7333_s2 + $0x18] sm:$0xff]  }
 0x46c   :  { %5155 = vrcp.f32 %v1562_v0  ;;  %v1561_v21 = vadd.f32 1.0, %v5144_v2  ;;  %4516 = vmatprep.subr.bf16.mxu0 %v1830_v3  ;;  %v5146_v34 = vpop.eup %5145 }
 0x46d   :  { %5157 = vrcp.f32 %v1560_v58  ;;  %4517 = vmatpush3.bf16.msra.mxu0 %v1830_v3  ;;  %v1826_v4 = vmul.f32 %v5146_v34, %v5124_v7  ;;  %v5148_v50 = vpop.eup %5147  ;;  %v6614_v34 = vld [vmem:[%s7333_s2 + $0x30] sm:$0xff]  }
 0x46e   :  { %5159 = vrcp.f32 %v1563_v39  ;;  %v6600_v39 = vld [vmem:[%s7333_s2 + $0x20] sm:$0xff]   ;;  %v2043_v58 = vld [vmem:[#allocation3 + $0x228] sm:$0xff] }
 0x46f   :  { %5161 = vrcp.f32 %v1561_v21  ;;  %v1829_v29 = vpack.c.bf16 %v1826_v4, %v1825_v30  ;;  %v6607_v21 = vld [vmem:[%s7333_s2 + $0x28] sm:$0xff]   ;;  %v6621_v30 = vld [vmem:[%s7333_s2 + $0x38] sm:$0xff]   ;;  %v6628_v4 = vld [vmem:[%s7333_s2] sm:$0xff]  }
 0x471   :  { %4518 = vmatprep.subr.bf16.mxu0 %v1829_v29 }
 0x472   :  { %4519 = vmatpush3.bf16.msra.mxu0 %v1829_v29  ;;  %v5150_v63 = vpop.eup %5149 }
 0x475   :  { %4521 = vmatmul.mubr.msk.bf16.vlgmr.msra.gmra.mxu0 %vm133_vm0, %v6547_v15  ;;  %v5152_v28 = vpop.eup %5151 }
 0x476   :  { %4524 = vmatprep.mubr.msk.bf16.mxu0 %vm133_vm0, %v6554_v45 }
 0x478   :  { %v5154_v7 = vpop.eup %5153 }
 0x479   :  { %v5156_v26 = vpop.eup %5155 }
 0x47a   :  { %v5158_v62 = vpop.eup %5157  ;;  %v6562_v22 = vmul.f32 %v5156_v26, %v5148_v50 }
 0x47b   :  { %v5160_v9 = vpop.eup %5159  ;;  %v6564_v35 = vmul.f32 %v5158_v62, %v5150_v63 }
 0x47c   :  { %v5162_v48 = vpop.eup %5161  ;;  %v6566_v57 = vmul.f32 %v5160_v9, %v5152_v28 }
 0x47d   :  { %v6572_v60 = vmul.f32 %v5162_v48, %v5154_v7  ;;  %4525 = vmatmul.mubr.msk.bf16.gmra.mxu0 %vm133_vm0, %v6587_v51  ;;  %v2044_v7 = vld [vmem:[#allocation3 + $0x230] sm:$0xff]  ;;  %v2042_v48 = vld [vmem:[#allocation3 + $0x220] sm:$0xff] }
 0x47e   :  { %v1832_v0 = vpack.c.bf16 %v6566_v57, %v6562_v22  ;;  %4528 = vmatprep.mubr.msk.bf16.mxu0 %vm133_vm0, %v6600_v39 }
 0x47f   :  { %v1831_v2 = vpack.c.bf16 %v6572_v60, %v6564_v35 }
 0x480   :  { %4492 = vmatprep.subr.bf16.mxu1 %v1832_v0 }
 0x481   :  { %4493 = vmatpush3.bf16.msra.mxu1 %v1832_v0 }
 0x482   :  { %4494 = vmatprep.subr.bf16.mxu1 %v1831_v2 }
 0x485   :  { %4495 = vmatpush3.bf16.msra.mxu1 %v1831_v2  ;;  %4529 = vmatmul.mubr.msk.bf16.gmra.mxu0 %vm133_vm0, %v6607_v21 }
 0x486   :  { %4496 = vmatprep.subr.bf16.mxu1 %v1830_v3  ;;  %4532 = vmatprep.mubr.msk.bf16.mxu0 %vm133_vm0, %v6614_v34 }
 0x489   :  { %4497 = vmatpush3.bf16.msra.mxu1 %v1830_v3 }
 0x48a   :  { %4498 = vmatprep.subr.bf16.mxu1 %v1829_v29 }
 0x48d   :  { %4499 = vmatpush3.bf16.msra.mxu1 %v1829_v29  ;;  %4533 = vmatmul.mubr.msk.bf16.gmra.mxu0 %vm133_vm0, %v6621_v30 }
 0x48e   :  { %4564 = vmatprep.mubr.msk.bf16.mxu0 %vm133_vm0, %v6628_v4 }
 0x490   :  { %4501 = vmatmul.mubr.msk.bf16.vlgmr.msra.gmra.mxu1 %vm506_vm1, %v6425_v12  ;;  %v6649_v12 = vld [vmem:[%s7334_s3] sm:$0xff]  }
 0x491   :  { %4504 = vmatprep.mubr.msk.bf16.mxu1 %vm506_vm1, %v6432_v13  ;;  %v2040_v13 = vld [vmem:[#allocation3 + $0x210] sm:$0xff] }
 0x498   :  { %4505 = vmatmul.mubr.msk.bf16.gmra.mxu1 %vm506_vm1, %v6443_v61 }
 0x499   :  { %4508 = vmatprep.mubr.msk.bf16.mxu1 %vm506_vm1, %v6450_v17  ;;  %v2038_v17 = vld [vmem:[#allocation3 + $0x200] sm:$0xff] }
 0x4a0   :  { %4509 = vmatmul.mubr.msk.bf16.gmra.mxu1 %vm506_vm1, %v6461_v24  ;;  %v2041_v24 = vld [vmem:[#allocation3 + $0x218] sm:$0xff] }
 0x4a1   :  { %4512 = vmatprep.mubr.msk.bf16.mxu1 %vm506_vm1, %v6468_v46 }
 0x4a8   :  { %4513 = vmatmul.mubr.msk.bf16.gmra.mxu1 %vm506_vm1, %v6475_v47 }
 0x4a9   :  { %4544 = vmatprep.mubr.msk.bf16.mxu1 %vm506_vm1, %v6649_v12 }
 0x535   :  { %v4522_v61 = vpop.f32.mrf.mxu0 }
 0x536   :  { %v2153_v3 = vadd.f32 %v4522_v61, %v2040_v13  ;;  %v2045_v61 = vld [vmem:[#allocation3 + $0x238] sm:$0xff] }
 0x537   :  { %v2088_v29 = vpop.f32.mrf.mxu0 }
 0x538   :  { %v4023_v56 = vmul.f32 -1.442695, %v2153_v3  ;;  %v2151_v50 = vadd.f32 %v2088_v29, %v2038_v17 }
 0x539   :  { %v4523_v46 = vpop.f32.mrf.mxu0 }
 0x53a   :  { %5163 = vpow2.f32 %v4023_v56  ;;  %v4021_v47 = vmul.f32 -1.442695, %v2151_v50  ;;  %v2154_v63 = vadd.f32 %v4523_v46, %v2041_v24  ;;  %v2048_v46 = vld [vmem:[#allocation3 + $0x250] sm:$0xff] }
 0x53b   :  { %v2091_v28 = vpop.f32.mrf.mxu0 }
 0x53c   :  { %5165 = vpow2.f32 %v4021_v47  ;;  %v4024_v26 = vmul.f32 -1.442695, %v2154_v63  ;;  %v2152_v62 = vadd.f32 %v2091_v28, %v2039_v41  ;;  %v2046_v28 = vld [vmem:[#allocation3 + $0x240] sm:$0xff] }
 0x53d   :  { %v4526_v9 = vpop.f32.mrf.mxu0 }
 0x53e   :  { %5167 = vpow2.f32 %v4024_v26  ;;  %v4022_v0 = vmul.f32 -1.442695, %v2152_v62  ;;  %v2157_v2 = vadd.f32 %v4526_v9, %v2044_v7 }
 0x53f   :  { %v2104_v13 = vpop.f32.mrf.mxu0 }
 0x540   :  { %5169 = vpow2.f32 %v4022_v0  ;;  %v4027_v3 = vmul.f32 -1.442695, %v2157_v2  ;;  %v2155_v17 = vadd.f32 %v2104_v13, %v2042_v48  ;;  %v2049_v0 = vld [vmem:[#allocation3 + $0x258] sm:$0xff] }
 0x541   :  { %v4527_v29 = vpop.f32.mrf.mxu0 }
 0x542   :  { %5171 = vpow2.f32 %v4027_v3  ;;  %v4025_v56 = vmul.f32 -1.442695, %v2155_v17  ;;  %v2158_v24 = vadd.f32 %v4527_v29, %v2045_v61  ;;  %v2047_v17 = vld [vmem:[#allocation3 + $0x248] sm:$0xff] }
 0x543   :  { %v2107_v50 = vpop.f32.mrf.mxu0 }
 0x544   :  { %5173 = vpow2.f32 %v4025_v56  ;;  %v4028_v47 = vmul.f32 -1.442695, %v2158_v24  ;;  %v2156_v41 = vadd.f32 %v2107_v50, %v2043_v58  ;;  %v2052_v24 = vld [vmem:[#allocation3 + $0x270] sm:$0xff] }
 0x545   :  { %v4530_v63 = vpop.f32.mrf.mxu0 }
 0x546   :  { %5175 = vpow2.f32 %v4028_v47  ;;  %v4026_v26 = vmul.f32 -1.442695, %v2156_v41  ;;  %v2161_v7 = vadd.f32 %v4530_v63, %v2048_v46 }
 0x547   :  { %v5164_v62 = vpop.eup %5163  ;;  %v2120_v9 = vpop.f32.mrf.mxu0 }
 0x548   :  { %v2193_v2 = vadd.f32 1.0, %v5164_v62  ;;  %5177 = vpow2.f32 %v4026_v26  ;;  %v2159_v48 = vadd.f32 %v2120_v9, %v2046_v28  ;;  %v2050_v28 = vld [vmem:[#allocation3 + $0x260] sm:$0xff] }
 0x549   :  { %v5166_v13 = vpop.eup %5165  ;;  %v4531_v3 = vpop.f32.mrf.mxu0  ;;  %5179 = vtanh.f32 %v2161_v7 }
 0x54a   :  { %v2191_v61 = vadd.f32 1.0, %v5166_v13  ;;  %v2162_v29 = vadd.f32 %v4531_v3, %v2049_v0  ;;  %5181 = vrcp.f32 %v2193_v2  ;;  %v2053_v3 = vld [vmem:[#allocation3 + $0x278] sm:$0xff] }
 0x54b   :  { %v5168_v56 = vpop.eup %5167  ;;  %v2123_v58 = vpop.f32.mrf.mxu0  ;;  %5183 = vtanh.f32 %v2159_v48 }
 0x54c   :  { %v2194_v50 = vadd.f32 1.0, %v5168_v56  ;;  %v2160_v47 = vadd.f32 %v2123_v58, %v2047_v17  ;;  %5185 = vrcp.f32 %v2191_v61 }
 0x54d   :  { %v5170_v46 = vpop.eup %5169  ;;  %v4534_v41 = vpop.f32.mrf.mxu0  ;;  %5187 = vtanh.f32 %v2162_v29 }
 0x54e   :  { %v2192_v63 = vadd.f32 1.0, %v5170_v46  ;;  %v2165_v26 = vadd.f32 %v4534_v41, %v2052_v24  ;;  %5189 = vrcp.f32 %v2194_v50  ;;  %v2051_v46 = vld [vmem:[#allocation3 + $0x268] sm:$0xff] }
 0x54f   :  { %v5172_v62 = vpop.eup %5171  ;;  %v2136_v13 = vpop.f32.mrf.mxu0  ;;  %5191 = vtanh.f32 %v2160_v47 }
 0x550   :  { %v4502_v9 = vpop.f32.mrf.mxu1  ;;  %v2197_v7 = vadd.f32 1.0, %v5172_v62  ;;  %v4031_v2 = vmul.f32 -1.442695, %v2165_v26  ;;  %5193 = vrcp.f32 %v2192_v63  ;;  %v2163_v17 = vadd.f32 %v2136_v13, %v2050_v28 }
 0x551   :  { %v1876_v0 = vadd.f32 %v4502_v9, %v6092_v6  ;;  %v5174_v56 = vpop.eup %5173  ;;  %v4535_v61 = vpop.f32.mrf.mxu0 }
 0x552   :  { %v1867_v48 = vpop.f32.mrf.mxu1  ;;  %5195 = vrcp.f32 %v2197_v7  ;;  %v2195_v58 = vadd.f32 1.0, %v5174_v56  ;;  %v2166_v62 = vadd.f32 %v4535_v61, %v2053_v3  ;;  %v4029_v28 = vmul.f32 -1.442695, %v2163_v17 }
 0x553   :  { %v4003_v29 = vmul.f32 -1.442695, %v1876_v0  ;;  %v1868_v24 = vadd.f32 %v1867_v48, %v6100_v55  ;;  %v5176_v50 = vpop.eup %5175  ;;  %5197 = vpow2.f32 %v4031_v2  ;;  %v2139_v23 = vpop.f32.mrf.mxu0 }
 0x554   :  { %v4503_v41 = vpop.f32.mrf.mxu1  ;;  %5199 = vrcp.f32 %v2195_v58  ;;  %v2198_v47 = vadd.f32 1.0, %v5176_v50  ;;  %v2164_v7 = vadd.f32 %v2139_v23, %v2051_v46  ;;  %v4032_v58 = vmul.f32 -1.442695, %v2166_v62 }
 0x555   :  { %v4001_v26 = vmul.f32 -1.442695, %v1868_v24  ;;  %v1879_v9 = vadd.f32 %v4503_v41, %v6096_v8  ;;  %v5178_v63 = vpop.eup %5177  ;;  %5201 = vpow2.f32 %v4003_v29  ;;  %v7392_v24 = vld [vmem:[#allocation9_spill] sm:$0xff] }
 0x556   :  { %v1870_v13 = vpop.f32.mrf.mxu1  ;;  %5203 = vrcp.f32 %v2198_v47  ;;  %v2196_v0 = vadd.f32 1.0, %v5178_v63  ;;  %v5180_v40 = vpop.eup %5179  ;;  %v4030_v46 = vmul.f32 -1.442695, %v2164_v7  ;;  %v7393_v47 = vld [vmem:[#allocation14_spill] sm:$0xff] }
 0x557   :  { %v4004_v56 = vmul.f32 -1.442695, %v1879_v9  ;;  %v1871_v48 = vadd.f32 %v1870_v13, %v7385_v11  ;;  %5205 = vpow2.f32 %v4001_v26  ;;  %v5182_v3 = vpop.eup %5181 }
 0x558   :  { %v4506_v2 = vpop.f32.mrf.mxu1  ;;  %5207 = vrcp.f32 %v2196_v0  ;;  %v5184_v41 = vpop.eup %5183  ;;  %v7394_v0 = vld [vmem:[#allocation11_spill] sm:$0xff] }
 0x559   :  { %v4002_v61 = vmul.f32 -1.442695, %v1871_v48  ;;  %v1892_v50 = vadd.f32 %v4506_v2, %v7392_v24  ;;  %5209 = vpow2.f32 %v4004_v56  ;;  %v5186_v17 = vpop.eup %5185  ;;  %v2249_v56 = vmul.f32 %v5182_v3, %v5180_v40 }
 0x55a   :  { %v1883_v29 = vpop.f32.mrf.mxu1  ;;  %5211 = vpow2.f32 %v4029_v28  ;;  %v5188_v63 = vpop.eup %5187  ;;  %v7395_v28 = vld [vmem:[#allocation15_spill] sm:$0xff]  ;;  %v2247_v8 = vmul.f32 %v5186_v17, %v5184_v41 }
 0x55b   :  { %v4007_v23 = vmul.f32 -1.442695, %v1892_v50  ;;  %v1884_v9 = vadd.f32 %v1883_v29, %v7393_v47  ;;  %5213 = vpow2.f32 %v4002_v61  ;;  %v5190_v26 = vpop.eup %5189 }
 0x55c   :  { %v4507_v13 = vpop.f32.mrf.mxu1  ;;  %5215 = vpow2.f32 %v4032_v58  ;;  %v5192_v62 = vpop.eup %5191  ;;  %v2250_v3 = vmul.f32 %v5190_v26, %v5188_v63 }
 0x55d   :  { %v4005_v54 = vmul.f32 -1.442695, %v1884_v9  ;;  %v1895_v48 = vadd.f32 %v4507_v13, %v7394_v0  ;;  %5217 = vpow2.f32 %v4007_v23  ;;  %v5194_v24 = vpop.eup %5193 }
 0x55e   :  { %v1886_v2 = vpop.f32.mrf.mxu1  ;;  %5219 = vpow2.f32 %v4030_v46  ;;  %v2248_v41 = vmul.f32 %v5194_v24, %v5192_v62 }
 0x55f   :  { %v4008_v11 = vmul.f32 -1.442695, %v1895_v48  ;;  %v1887_v50 = vadd.f32 %v1886_v2, %v7395_v28  ;;  %v5196_v7 = vpop.eup %5195  ;;  %5221 = vpow2.f32 %v4005_v54 }
 0x560   :  { %v4510_v29 = vpop.f32.mrf.mxu1  ;;  %v5198_v47 = vpop.eup %5197  ;;  %v2245_v61 = vmul.f32 %v5196_v7, %v6495_v18 }
 0x561   :  { %5223 = vpow2.f32 %v4008_v11  ;;  %v4006_v58 = vmul.f32 -1.442695, %v1887_v50  ;;  %v5200_v9 = vpop.eup %5199  ;;  %v2233_v13 = vadd.f32 1.0, %v5198_v47 }
 0x562   :  { %v1899_v0 = vpop.f32.mrf.mxu1  ;;  %v5202_v23 = vpop.eup %5201  ;;  %v6662_v55 = vadd.f32 %v2249_v56, %v2245_v61  ;;  %v2243_v40 = vmul.f32 %v5200_v9, %v6501_v19 }
 0x563   :  { %5225 = vpow2.f32 %v4006_v58  ;;  %v5204_v46 = vpop.eup %5203  ;;  %v1956_v48 = vadd.f32 1.0, %v5202_v23 }
 0x564   :  { %5227 = vrcp.f32 %v2233_v13  ;;  %v4511_v54 = vpop.f32.mrf.mxu1  ;;  %v5206_v2 = vpop.eup %5205  ;;  %v6666_v18 = vadd.f32 %v2247_v8, %v2243_v40  ;;  %v2246_v11 = vmul.f32 %v5204_v46, %v6509_v5 }
 0x565   :  { %5229 = vtanh.f32 %v6662_v55  ;;  %v5208_v17 = vpop.eup %5207  ;;  %v1954_v47 = vadd.f32 1.0, %v5206_v2 }
 0x566   :  { %5231 = vrcp.f32 %v1956_v48  ;;  %v1902_v56 = vpop.f32.mrf.mxu1  ;;  %v5210_v50 = vpop.eup %5209  ;;  %v6670_v19 = vadd.f32 %v2250_v3, %v2246_v11  ;;  %v2244_v63 = vmul.f32 %v5208_v17, %v6514_v49 }
 0x567   :  { %5233 = vtanh.f32 %v6666_v18  ;;  %v5212_v26 = vpop.eup %5211  ;;  %v1957_v7 = vadd.f32 1.0, %v5210_v50 }
 0x568   :  { %5235 = vrcp.f32 %v1954_v47  ;;  %v4514_v61 = vpop.f32.mrf.mxu1  ;;  %v5214_v8 = vpop.eup %5213  ;;  %v6674_v5 = vadd.f32 %v2248_v41, %v2244_v63  ;;  %v2231_v24 = vadd.f32 1.0, %v5212_v26  ;;  %v1908_v47 = vadd.f32 %v4510_v29, %v6124_v14 }
 0x569   :  { %5237 = vtanh.f32 %v6670_v19  ;;  %v5216_v62 = vpop.eup %5215  ;;  %v1955_v58 = vadd.f32 1.0, %v5214_v8  ;;  %v1924_v50 = vadd.f32 %v4514_v61, %v6134_v36  ;;  %v1900_v8 = vadd.f32 %v1899_v0, %v6140_v10 }
 0x56a   :  { %5239 = vrcp.f32 %v1957_v7  ;;  %v1915_v9 = vpop.f32.mrf.mxu1  ;;  %v5218_v13 = vpop.eup %5217  ;;  %v2234_v23 = vadd.f32 1.0, %v5216_v62  ;;  %v1903_v29 = vadd.f32 %v1902_v56, %v6150_v33 }
 0x56b   :  { %5241 = vtanh.f32 %v6674_v5  ;;  %v5220_v40 = vpop.eup %5219  ;;  %v1960_v49 = vadd.f32 1.0, %v5218_v13 }
 0x56c   :  { %5243 = vrcp.f32 %v2231_v24  ;;  %v4515_v3 = vpop.f32.mrf.mxu1  ;;  %v5222_v46 = vpop.eup %5221  ;;  %v2232_v48 = vadd.f32 1.0, %v5220_v40  ;;  %v1916_v24 = vadd.f32 %v1915_v9, %v6160_v42 }
 0x56d   :  { %5245 = vrcp.f32 %v1955_v58  ;;  %v1958_v11 = vadd.f32 1.0, %v5222_v46  ;;  %v1911_v58 = vadd.f32 %v4511_v54, %v6130_v27  ;;  %v1927_v13 = vadd.f32 %v4515_v3, %v6138_v53 }
 0x56e   :  { %v5224_v2 = vpop.eup %5223  ;;  %5247 = vrcp.f32 %v2234_v23  ;;  %v1918_v63 = vpop.f32.mrf.mxu1  ;;  %v4009_v0 = vmul.f32 -1.442695, %v1916_v24 }
 0x56f   :  { %5249 = vrcp.f32 %v1960_v49  ;;  %v1961_v41 = vadd.f32 1.0, %v5224_v2  ;;  %v1919_v61 = vadd.f32 %v1918_v63, %v6176_v32  ;;  %v4011_v49 = vmul.f32 -1.442695, %v1924_v50 }
 0x570   :  { %v5226_v17 = vpop.eup %5225  ;;  %5251 = vrcp.f32 %v2232_v48  ;;  %v4012_v9 = vmul.f32 -1.442695, %v1927_v13 }
 0x571   :  { %v5228_v26 = vpop.eup %5227  ;;  %5253 = vrcp.f32 %v1958_v11  ;;  %v1959_v7 = vadd.f32 1.0, %v5226_v17  ;;  %v4010_v54 = vmul.f32 -1.442695, %v1919_v61 }
 0x572   :  { %v5230_v62 = vpop.eup %5229  ;;  %5255 = vrcp.f32 %v1961_v41 }
 0x573   :  { %v5232_v23 = vpop.eup %5231  ;;  %5257 = vrcp.f32 %v1959_v7 }
 0x574   :  { %v5234_v40 = vpop.eup %5233  ;;  %5259 = vtanh.f32 %v1908_v47  ;;  %v2261_v47 = vmul.f32 %v5230_v62, %v5228_v26 }
 0x575   :  { %v5236_v46 = vpop.eup %5235  ;;  %5261 = vtanh.f32 %v1900_v8 }
 0x576   :  { %v5238_v48 = vpop.eup %5237  ;;  %5263 = vtanh.f32 %v1911_v58 }
 0x577   :  { %v5240_v2 = vpop.eup %5239  ;;  %5265 = vtanh.f32 %v1903_v29 }
 0x578   :  { %v5242_v11 = vpop.eup %5241  ;;  %5267 = vpow2.f32 %v4011_v49 }
 0x579   :  { %v5244_v3 = vpop.eup %5243  ;;  %5269 = vpow2.f32 %v4009_v0 }
 0x57a   :  { %v5246_v41 = vpop.eup %5245  ;;  %5271 = vpow2.f32 %v4012_v9  ;;  %v2259_v24 = vmul.f32 %v5244_v3, %v5234_v40 }
 0x57b   :  { %v5248_v56 = vpop.eup %5247  ;;  %5273 = vpow2.f32 %v4010_v54 }
 0x57c   :  { %v5250_v17 = vpop.eup %5249  ;;  %v2262_v50 = vmul.f32 %v5248_v56, %v5238_v48 }
 0x57d   :  { %v5252_v63 = vpop.eup %5251  ;;  %v2008_v61 = vmul.f32 %v5250_v17, %v6527_v38 }
 0x57e   :  { %v5254_v7 = vpop.eup %5253  ;;  %v6685_v8 = vpack.c.bf16 %v2262_v50, %v2261_v47  ;;  %v2260_v58 = vmul.f32 %v5252_v63, %v5242_v11 }
 0x57f   :  { %v5256_v13 = vpop.eup %5255  ;;  %v2006_v9 = vmul.f32 %v5254_v7, %v6530_v25 }
 0x580   :  { %v5258_v29 = vpop.eup %5257  ;;  %4560 = vmatprep.subr.bf16.mxu0 %v6685_v8  ;;  %v6689_v49 = vpack.c.bf16 %v2260_v58, %v2259_v24  ;;  %v2009_v48 = vmul.f32 %v5256_v13, %v6532_v1  ;;  %v6716_v24 = vld [vmem:[%s7331_s0] sm:$0x1] }
 0x581   :  { %v5260_v0 = vpop.eup %5259  ;;  %4561 = vmatpush3.bf16.msra.mxu0 %v6685_v8  ;;  %v2007_v11 = vmul.f32 %v5258_v29, %v6537_v31  ;;  %vm2026_vm8 = vcmp.eq.s32.totalorder %v6716_v24, 4  ;;  %vm2460_vm10 = vcmp.eq.s32.totalorder %v6716_v24, 5  ;;  %v6920_v24 = vld [vmem:[%s7333_s2 + $0x38] sm:$0xff]  }
 0x582   :  { %v5262_v26 = vpop.eup %5261  ;;  %v2012_v62 = vmul.f32 %v5260_v0, %v5232_v23  ;;  %4562 = vmatprep.subr.bf16.mxu0 %v6689_v49 }
 0x583   :  { %v5264_v40 = vpop.eup %5263  ;;  %v2010_v54 = vmul.f32 %v5262_v26, %v5236_v46 }
 0x584   :  { %v5266_v38 = vpop.eup %5265  ;;  %v6696_v3 = vadd.f32 %v2012_v62, %v2008_v61  ;;  %v2013_v56 = vmul.f32 %v5264_v40, %v5240_v2  ;;  %v7396_v40 = vsel %vm6558_vm7, %v6562_v22, %v6391_v37  ;;  %v7399_v37 = vsel %vm6558_vm7, %v6572_v60, %v6412_v44  ;;  %v6782_v44 = vld [vmem:[%s7334_s3 + $0x18] sm:$0xff]  }
 0x585   :  { %v5268_v17 = vpop.eup %5267  ;;  %v6698_v47 = vadd.f32 %v2010_v54, %v2006_v9  ;;  %v2011_v25 = vmul.f32 %v5266_v38, %v5246_v41  ;;  %4563 = vmatpush3.bf16.msra.mxu0 %v6689_v49  ;;  %v6810_v60 = vld [vmem:[%s7334_s3 + $0x38] sm:$0xff]  }
 0x586   :  { %v5270_v50 = vpop.eup %5269  ;;  %5275 = vtanh.f32 %v6696_v3  ;;  %v6702_v1 = vadd.f32 %v2013_v56, %v2009_v48  ;;  %v1996_v23 = vadd.f32 1.0, %v5268_v17 }
 0x587   :  { %v5272_v63 = vpop.eup %5271  ;;  %5277 = vtanh.f32 %v6698_v47  ;;  %v6705_v31 = vadd.f32 %v2011_v25, %v2007_v11  ;;  %v1994_v46 = vadd.f32 1.0, %v5270_v50 }
 0x588   :  { %v5274_v7 = vpop.eup %5273  ;;  %5279 = vtanh.f32 %v6702_v1  ;;  %v1997_v2 = vadd.f32 1.0, %v5272_v63  ;;  %4565 = vmatmul.mubr.msk.bf16.vlgmr.msra.gmra.mxu0 %vm133_vm0, %v6547_v15  ;;  %v2027_v15 = vsel %vm2026_vm8, 1, %v7380_v16 }
 0x589   :  { %5281 = vtanh.f32 %v6705_v31  ;;  %v1995_v41 = vadd.f32 1.0, %v5274_v7  ;;  %4568 = vmatprep.mubr.msk.bf16.mxu0 %vm133_vm0, %v6554_v45  ;;  %v2031_v58 = vrot.slane %v2027_v15, %v6372_v43 }
 0x58a   :  { %5283 = vrcp.f32 %v1996_v23  ;;  %v2475_v23 = vld [vmem:[#allocation3 + $0x298] sm:$0xff] }
 0x58b   :  { %5285 = vrcp.f32 %v1994_v46  ;;  %vm2032_vm9 = vcmp.eq.s32.totalorder %v2031_v58, 1  ;;  %v2478_v58 = vld [vmem:[#allocation3 + $0x2b0] sm:$0xff] }
 0x58c   :  { %5287 = vrcp.f32 %v1997_v2  ;;  %v2473_v2 = vld [vmem:[#allocation3 + $0x288] sm:$0xff] }
 0x58d   :  { %5289 = vrcp.f32 %v1995_v41 }
 0x590   :  { %4569 = vmatmul.mubr.msk.bf16.gmra.mxu0 %vm133_vm0, %v6587_v51 }
 0x591   :  { %4572 = vmatprep.mubr.msk.bf16.mxu0 %vm133_vm0, %v6600_v39 }
 0x593   :  { %v5276_v45 = vpop.eup %5275 }
 0x594   :  { %v5278_v13 = vpop.eup %5277 }
 0x595   :  { %v5280_v29 = vpop.eup %5279 }
 0x596   :  { %v5282_v61 = vpop.eup %5281 }
 0x597   :  { %v5284_v0 = vpop.eup %5283 }
 0x598   :  { %v5286_v9 = vpop.eup %5285  ;;  %v2024_v26 = vmul.f32 %v5284_v0, %v5276_v45  ;;  %4573 = vmatmul.mubr.msk.bf16.gmra.mxu0 %vm133_vm0, %v6607_v21  ;;  %v7397_v21 = vsel %vm6558_vm7, %v6564_v35, %v6401_v59  ;;  %v6768_v59 = vld [vmem:[%s7334_s3 + $0x8] sm:$0xff]  }
 0x599   :  { %v5288_v62 = vpop.eup %5287  ;;  %v2022_v51 = vmul.f32 %v5286_v9, %v5278_v13  ;;  %4576 = vmatprep.mubr.msk.bf16.mxu0 %vm133_vm0, %v6614_v34  ;;  %v7398_v34 = vsel %vm6558_vm7, %v6566_v57, %v6405_v20  ;;  %v6775_v20 = vld [vmem:[%s7334_s3 + $0x10] sm:$0xff]   ;;  %v6796_v35 = vld [vmem:[%s7334_s3 + $0x28] sm:$0xff]  }
 0x59a   :  { %v5290_v48 = vpop.eup %5289  ;;  %v2025_v39 = vmul.f32 %v5288_v62, %v5280_v29  ;;  %v6734_v54 = vsel %vm2032_vm9, %v2024_v26, %v7396_v40  ;;  %v6803_v57 = vld [vmem:[%s7334_s3 + $0x30] sm:$0xff]   ;;  %v2479_v62 = vld [vmem:[#allocation3 + $0x2b8] sm:$0xff] }
 0x59b   :  { %v2023_v11 = vmul.f32 %v5290_v48, %v5282_v61  ;;  %v6741_v38 = vsel %vm2032_vm9, %v2022_v51, %v7397_v21  ;;  %v2477_v40 = vld [vmem:[#allocation3 + $0x2a8] sm:$0xff] }
 0x59c   :  { %v6748_v56 = vsel %vm2032_vm9, %v2025_v39, %v7398_v34  ;;  %v2266_v17 = vpack.c.bf16 %v2025_v39, %v2024_v26 }
 0x59d   :  { %v6755_v22 = vsel %vm2032_vm9, %v2023_v11, %v7399_v37  ;;  %v2265_v25 = vpack.c.bf16 %v2023_v11, %v2022_v51 }
 0x59e   :  { %4536 = vmatprep.subr.bf16.mxu1 %v2266_v17 }
 0x59f   :  { %4537 = vmatpush3.bf16.msra.mxu1 %v2266_v17  ;;  %v2482_v17 = vld [vmem:[#allocation3 + $0x2d0] sm:$0xff] }
 0x5a0   :  { %4538 = vmatprep.subr.bf16.mxu1 %v2265_v25  ;;  %4577 = vmatmul.mubr.msk.bf16.gmra.mxu0 %vm133_vm0, %v6621_v30  ;;  %v2474_v30 = vld [vmem:[#allocation3 + $0x290] sm:$0xff] }
 0x5a1   :  { %4608 = vmatprep.mubr.msk.bf16.mxu0 %vm133_vm0, %v6628_v4 }
 0x5a3   :  { %4539 = vmatpush3.bf16.msra.mxu1 %v2265_v25 }
 0x5a4   :  { %4540 = vmatprep.subr.bf16.mxu1 %v6685_v8 }
 0x5a7   :  { %4541 = vmatpush3.bf16.msra.mxu1 %v6685_v8  ;;  %v2472_v8 = vld [vmem:[#allocation3 + $0x280] sm:$0xff] }
 0x5a8   :  { %4542 = vmatprep.subr.bf16.mxu1 %v6689_v49 }
 0x5ab   :  { %4543 = vmatpush3.bf16.msra.mxu1 %v6689_v49 }
 0x5ae   :  { %4545 = vmatmul.mubr.msk.bf16.vlgmr.msra.gmra.mxu1 %vm506_vm1, %v6768_v59 }
 0x5af   :  { %4548 = vmatprep.mubr.msk.bf16.mxu1 %vm506_vm1, %v6775_v20 }
 0x5b6   :  { %4549 = vmatmul.mubr.msk.bf16.gmra.mxu1 %vm506_vm1, %v6782_v44 }
 0x5b7   :  { %4552 = vmatprep.mubr.msk.bf16.mxu1 %vm506_vm1, %v6789_v52 }
 0x5be   :  { %4553 = vmatmul.mubr.msk.bf16.gmra.mxu1 %vm506_vm1, %v6796_v35 }
 0x5bf   :  { %4556 = vmatprep.mubr.msk.bf16.mxu1 %vm506_vm1, %v6803_v57 }
 0x5c6   :  { %4557 = vmatmul.mubr.msk.bf16.gmra.mxu1 %vm506_vm1, %v6810_v60 }
 0x5c7   :  { %4588 = vmatprep.mubr.msk.bf16.mxu1 %vm506_vm1, %v6649_v12  ;;  %v2476_v12 = vld [vmem:[#allocation3 + $0x2a0] sm:$0xff] }
 0x648   :  { %v4566_v4 = vpop.f32.mrf.mxu0 }
 0x649   :  { %v2587_v49 = vadd.f32 %v4566_v4, %v2474_v30  ;;  %v2480_v4 = vld [vmem:[#allocation3 + $0x2c0] sm:$0xff] }
 0x64a   :  { %v2522_v50 = vpop.f32.mrf.mxu0 }
 0x64b   :  { %v4063_v63 = vmul.f32 -1.442695, %v2587_v49  ;;  %v2585_v46 = vadd.f32 %v2522_v50, %v2472_v8 }
 0x64c   :  { %v4567_v7 = vpop.f32.mrf.mxu0 }
 0x64d   :  { %5291 = vpow2.f32 %v4063_v63  ;;  %v4061_v41 = vmul.f32 -1.442695, %v2585_v46  ;;  %v2588_v15 = vadd.f32 %v4567_v7, %v2475_v23  ;;  %v2483_v63 = vld [vmem:[#allocation3 + $0x2d8] sm:$0xff] }
 0x64e   :  { %v2525_v45 = vpop.f32.mrf.mxu0 }
 0x64f   :  { %5293 = vpow2.f32 %v4061_v41  ;;  %v4064_v13 = vmul.f32 -1.442695, %v2588_v15  ;;  %v2586_v29 = vadd.f32 %v2525_v45, %v2473_v2  ;;  %v2481_v15 = vld [vmem:[#allocation3 + $0x2c8] sm:$0xff] }
 0x650   :  { %v4570_v61 = vpop.f32.mrf.mxu0 }
 0x651   :  { %5295 = vpow2.f32 %v4064_v13  ;;  %v4062_v0 = vmul.f32 -1.442695, %v2586_v29  ;;  %v2591_v9 = vadd.f32 %v4570_v61, %v2478_v58  ;;  %v2486_v61 = vld [vmem:[#allocation3 + $0x2f0] sm:$0xff] }
 0x652   :  { %v2538_v26 = vpop.f32.mrf.mxu0 }
 0x653   :  { %5297 = vpow2.f32 %v4062_v0  ;;  %v4067_v51 = vmul.f32 -1.442695, %v2591_v9  ;;  %v2589_v48 = vadd.f32 %v2538_v26, %v2476_v12 }
 0x654   :  { %v4571_v39 = vpop.f32.mrf.mxu0 }
 0x655   :  { %5299 = vpow2.f32 %v4067_v51  ;;  %v4065_v11 = vmul.f32 -1.442695, %v2589_v48  ;;  %v2592_v21 = vadd.f32 %v4571_v39, %v2479_v62  ;;  %v2484_v62 = vld [vmem:[#allocation3 + $0x2e0] sm:$0xff] }
 0x656   :  { %v2541_v34 = vpop.f32.mrf.mxu0 }
 0x657   :  { %5301 = vpow2.f32 %v4065_v11  ;;  %v4068_v37 = vmul.f32 -1.442695, %v2592_v21  ;;  %v2590_v25 = vadd.f32 %v2541_v34, %v2477_v40  ;;  %v2487_v11 = vld [vmem:[#allocation3 + $0x2f8] sm:$0xff] }
 0x658   :  { %v4574_v30 = vpop.f32.mrf.mxu0 }
 0x659   :  { %5303 = vpow2.f32 %v4068_v37  ;;  %v4066_v8 = vmul.f32 -1.442695, %v2590_v25  ;;  %v2595_v49 = vadd.f32 %v4574_v30, %v2482_v17  ;;  %v2485_v30 = vld [vmem:[#allocation3 + $0x2e8] sm:$0xff] }
 0x65a   :  { %v5292_v50 = vpop.eup %5291  ;;  %v2554_v23 = vpop.f32.mrf.mxu0 }
 0x65b   :  { %v2627_v46 = vadd.f32 1.0, %v5292_v50  ;;  %5305 = vpow2.f32 %v4066_v8  ;;  %v2593_v7 = vadd.f32 %v2554_v23, %v2480_v4 }
 0x65c   :  { %v5294_v2 = vpop.eup %5293  ;;  %v4575_v41 = vpop.f32.mrf.mxu0  ;;  %5307 = vtanh.f32 %v2595_v49 }
 0x65d   :  { %v2625_v45 = vadd.f32 1.0, %v5294_v2  ;;  %v2596_v58 = vadd.f32 %v4575_v41, %v2483_v63  ;;  %5309 = vrcp.f32 %v2627_v46 }
 0x65e   :  { %v5296_v13 = vpop.eup %5295  ;;  %v2557_v29 = vpop.f32.mrf.mxu0  ;;  %5311 = vtanh.f32 %v2593_v7 }
 0x65f   :  { %v2628_v12 = vadd.f32 1.0, %v5296_v13  ;;  %v2594_v0 = vadd.f32 %v2557_v29, %v2481_v15  ;;  %5313 = vrcp.f32 %v2625_v45 }
 0x660   :  { %v5298_v9 = vpop.eup %5297  ;;  %v4578_v26 = vpop.f32.mrf.mxu0  ;;  %5315 = vtanh.f32 %v2596_v58 }
 0x661   :  { %v2626_v51 = vadd.f32 1.0, %v5298_v9  ;;  %v2599_v48 = vadd.f32 %v4578_v26, %v2486_v61  ;;  %5317 = vrcp.f32 %v2628_v12 }
 0x662   :  { %v5300_v39 = vpop.eup %5299  ;;  %v2570_v40 = vpop.f32.mrf.mxu0  ;;  %5319 = vtanh.f32 %v2594_v0 }
 0x663   :  { %v2631_v21 = vadd.f32 1.0, %v5300_v39  ;;  %v4071_v34 = vmul.f32 -1.442695, %v2599_v48  ;;  %v2597_v17 = vadd.f32 %v2570_v40, %v2484_v62  ;;  %5321 = vrcp.f32 %v2626_v51  ;;  %v7400_v40 = vld [vmem:[#allocation12_spill] sm:$0xff] }
 0x664   :  { %v5302_v37 = vpop.eup %5301  ;;  %v4579_v25 = vpop.f32.mrf.mxu0 }
 0x665   :  { %5323 = vrcp.f32 %v2631_v21  ;;  %v2629_v4 = vadd.f32 1.0, %v5302_v37  ;;  %v4069_v8 = vmul.f32 -1.442695, %v2597_v17  ;;  %v2600_v49 = vadd.f32 %v4579_v25, %v2487_v11 }
 0x666   :  { %v5304_v50 = vpop.eup %5303  ;;  %5325 = vpow2.f32 %v4071_v34  ;;  %v2573_v23 = vpop.f32.mrf.mxu0 }
 0x667   :  { %5327 = vrcp.f32 %v2629_v4  ;;  %v2632_v63 = vadd.f32 1.0, %v5304_v50  ;;  %v4072_v46 = vmul.f32 -1.442695, %v2600_v49  ;;  %v2598_v7 = vadd.f32 %v2573_v23, %v2485_v30 }
 0x668   :  { %v5306_v2 = vpop.eup %5305  ;;  %5329 = vpow2.f32 %v4069_v8 }
 0x669   :  { %5331 = vrcp.f32 %v2632_v63  ;;  %v2630_v41 = vadd.f32 1.0, %v5306_v2  ;;  %v4070_v15 = vmul.f32 -1.442695, %v2598_v7  ;;  %v5308_v45 = vpop.eup %5307 }
 0x66a   :  { %5333 = vpow2.f32 %v4072_v46  ;;  %v5310_v58 = vpop.eup %5309 }
 0x66b   :  { %5335 = vrcp.f32 %v2630_v41  ;;  %v5312_v13 = vpop.eup %5311  ;;  %v2683_v48 = vmul.f32 %v5310_v58, %v5308_v45 }
 0x66c   :  { %5337 = vpow2.f32 %v4070_v15  ;;  %v5314_v29 = vpop.eup %5313  ;;  %v7401_v15 = vld [vmem:[#allocation10_spill] sm:$0xff] }
 0x66d   :  { %v5316_v61 = vpop.eup %5315  ;;  %v2681_v25 = vmul.f32 %v5314_v29, %v5312_v13 }
 0x66e   :  { %v4546_v12 = vpop.f32.mrf.mxu1  ;;  %v5318_v0 = vpop.eup %5317 }
 0x66f   :  { %v2310_v9 = vadd.f32 %v4546_v12, %v6092_v6  ;;  %v5320_v26 = vpop.eup %5319  ;;  %v2684_v46 = vmul.f32 %v5318_v0, %v5316_v61  ;;  %v7402_v12 = vld [vmem:[#allocation13_spill] sm:$0xff] }
 0x670   :  { %v2301_v62 = vpop.f32.mrf.mxu1  ;;  %v5322_v51 = vpop.eup %5321  ;;  %v7403_v61 = vld [vmem:[#allocation9_spill] sm:$0xff] }
 0x671   :  { %v4043_v39 = vmul.f32 -1.442695, %v2310_v9  ;;  %v2302_v11 = vadd.f32 %v2301_v62, %v7400_v40  ;;  %v2682_v2 = vmul.f32 %v5322_v51, %v5320_v26 }
 0x672   :  { %v5324_v21 = vpop.eup %5323  ;;  %v4547_v34 = vpop.f32.mrf.mxu1 }
 0x673   :  { %v5326_v17 = vpop.eup %5325  ;;  %v2679_v37 = vmul.f32 %v5324_v21, %v6662_v55  ;;  %5339 = vpow2.f32 %v4043_v39  ;;  %v4041_v30 = vmul.f32 -1.442695, %v2302_v11  ;;  %v2313_v45 = vadd.f32 %v4547_v34, %v7401_v15  ;;  %v7404_v34 = vld [vmem:[#allocation14_spill] sm:$0xff] }
 0x674   :  { %v5328_v4 = vpop.eup %5327  ;;  %v2667_v8 = vadd.f32 1.0, %v5326_v17  ;;  %v2304_v49 = vpop.f32.mrf.mxu1 }
 0x675   :  { %v5330_v50 = vpop.eup %5329  ;;  %v6819_v23 = vadd.f32 %v2683_v48, %v2679_v37  ;;  %v2677_v63 = vmul.f32 %v5328_v4, %v6666_v18  ;;  %5341 = vpow2.f32 %v4041_v30  ;;  %v2305_v9 = vadd.f32 %v2304_v49, %v7402_v12  ;;  %v7405_v30 = vld [vmem:[#allocation11_spill] sm:$0xff] }
 0x676   :  { %v5332_v7 = vpop.eup %5331  ;;  %5343 = vrcp.f32 %v2667_v8  ;;  %v2665_v41 = vadd.f32 1.0, %v5330_v50  ;;  %v4550_v55 = vpop.f32.mrf.mxu1  ;;  %v4044_v21 = vmul.f32 -1.442695, %v2313_v45 }
 0x677   :  { %v5334_v58 = vpop.eup %5333  ;;  %5345 = vtanh.f32 %v6819_v23  ;;  %v6824_v13 = vadd.f32 %v2681_v25, %v2677_v63  ;;  %v2680_v29 = vmul.f32 %v5332_v7, %v6670_v19  ;;  %v2326_v0 = vadd.f32 %v4550_v55, %v7403_v61 }
 0x678   :  { %v5336_v62 = vpop.eup %5335  ;;  %5347 = vrcp.f32 %v2665_v41  ;;  %v2668_v18 = vadd.f32 1.0, %v5334_v58  ;;  %v2317_v26 = vpop.f32.mrf.mxu1  ;;  %v4042_v25 = vmul.f32 -1.442695, %v2305_v9 }
 0x679   :  { %v5338_v51 = vpop.eup %5337  ;;  %5349 = vtanh.f32 %v6824_v13  ;;  %v6830_v48 = vadd.f32 %v2684_v46, %v2680_v29  ;;  %v2678_v39 = vmul.f32 %v5336_v62, %v6674_v5  ;;  %v2318_v19 = vadd.f32 %v2317_v26, %v7404_v34 }
 0x67a   :  { %5351 = vrcp.f32 %v2668_v18  ;;  %v2666_v11 = vadd.f32 1.0, %v5338_v51  ;;  %v4551_v17 = vpop.f32.mrf.mxu1  ;;  %v4047_v8 = vmul.f32 -1.442695, %v2326_v0 }
 0x67b   :  { %5353 = vtanh.f32 %v6830_v48  ;;  %v6835_v37 = vadd.f32 %v2682_v2, %v2678_v39  ;;  %v2329_v4 = vadd.f32 %v4551_v17, %v7405_v30  ;;  %v4045_v50 = vmul.f32 -1.442695, %v2318_v19 }
 0x67c   :  { %5355 = vrcp.f32 %v2666_v11  ;;  %v2320_v49 = vpop.f32.mrf.mxu1 }
 0x67d   :  { %5357 = vtanh.f32 %v6835_v37  ;;  %v2321_v5 = vadd.f32 %v2320_v49, %v7395_v28  ;;  %v4048_v63 = vmul.f32 -1.442695, %v2329_v4 }
 0x67e   :  { %5359 = vpow2.f32 %v4044_v21  ;;  %v4554_v46 = vpop.f32.mrf.mxu1 }
 0x67f   :  { %5361 = vpow2.f32 %v4042_v25  ;;  %v4046_v41 = vmul.f32 -1.442695, %v2321_v5  ;;  %v2342_v18 = vadd.f32 %v4554_v46, %v6124_v14 }
 0x680   :  { %v5340_v7 = vpop.eup %5339  ;;  %5363 = vpow2.f32 %v4047_v8  ;;  %v2333_v2 = vpop.f32.mrf.mxu1 }
 0x681   :  { %5365 = vpow2.f32 %v4045_v50  ;;  %v2390_v55 = vadd.f32 1.0, %v5340_v7  ;;  %v2334_v51 = vadd.f32 %v2333_v2, %v6140_v10 }
 0x682   :  { %v5342_v45 = vpop.eup %5341  ;;  %5367 = vpow2.f32 %v4048_v63  ;;  %v4555_v58 = vpop.f32.mrf.mxu1 }
 0x683   :  { %v5344_v29 = vpop.eup %5343  ;;  %v2388_v9 = vadd.f32 1.0, %v5342_v45  ;;  %5369 = vpow2.f32 %v4046_v41  ;;  %v2345_v11 = vadd.f32 %v4555_v58, %v6130_v27 }
 0x684   :  { %v5346_v62 = vpop.eup %5345  ;;  %v2336_v0 = vpop.f32.mrf.mxu1  ;;  %5371 = vrcp.f32 %v2390_v55 }
 0x685   :  { %v5348_v26 = vpop.eup %5347  ;;  %5373 = vrcp.f32 %v2388_v9  ;;  %v2337_v17 = vadd.f32 %v2336_v0, %v6150_v33  ;;  %v2695_v49 = vmul.f32 %v5346_v62, %v5344_v29 }
 0x686   :  { %v5350_v39 = vpop.eup %5349  ;;  %v4558_v21 = vpop.f32.mrf.mxu1  ;;  %5375 = vtanh.f32 %v2342_v18 }
 0x687   :  { %v5352_v19 = vpop.eup %5351  ;;  %v2358_v25 = vadd.f32 %v4558_v21, %v6134_v36  ;;  %5377 = vtanh.f32 %v2334_v51  ;;  %v2693_v62 = vmul.f32 %v5350_v39, %v5348_v26 }
 0x688   :  { %v5354_v4 = vpop.eup %5353  ;;  %v2349_v8 = vpop.f32.mrf.mxu1  ;;  %5379 = vtanh.f32 %v2345_v11 }
 0x689   :  { %v5356_v50 = vpop.eup %5355  ;;  %v4051_v5 = vmul.f32 -1.442695, %v2358_v25  ;;  %v2350_v63 = vadd.f32 %v2349_v8, %v6160_v42  ;;  %v2696_v46 = vmul.f32 %v5354_v4, %v5352_v19  ;;  %5381 = vtanh.f32 %v2337_v17 }
 0x68a   :  { %v5358_v7 = vpop.eup %5357  ;;  %v4559_v41 = vpop.f32.mrf.mxu1 }
 0x68b   :  { %v5360_v2 = vpop.eup %5359  ;;  %v4049_v45 = vmul.f32 -1.442695, %v2350_v63  ;;  %v2361_v55 = vadd.f32 %v4559_v41, %v6138_v53  ;;  %v6847_v58 = vpack.c.bf16 %v2696_v46, %v2695_v49  ;;  %5383 = vpow2.f32 %v4051_v5  ;;  %v6859_v41 = vld [vmem:[%s7333_s2 + $0x8] sm:$0xff]  }
 0x68c   :  { %v5362_v9 = vpop.eup %5361  ;;  %v2391_v18 = vadd.f32 1.0, %v5360_v2  ;;  %v2352_v29 = vpop.f32.mrf.mxu1  ;;  %v2694_v0 = vmul.f32 %v5358_v7, %v5356_v50 }
 0x68d   :  { %v5364_v51 = vpop.eup %5363  ;;  %v2389_v21 = vadd.f32 1.0, %v5362_v9  ;;  %5385 = vpow2.f32 %v4049_v45  ;;  %v2353_v19 = vadd.f32 %v2352_v29, %v6176_v32  ;;  %4604 = vmatprep.subr.bf16.mxu0 %v6847_v58  ;;  %v4052_v49 = vmul.f32 -1.442695, %v2361_v55  ;;  %v6866_v45 = vld [vmem:[%s7333_s2 + $0x10] sm:$0xff]  }
 0x68e   :  { %v5366_v11 = vpop.eup %5365  ;;  %5387 = vrcp.f32 %v2391_v18  ;;  %v2394_v17 = vadd.f32 1.0, %v5364_v51  ;;  %4605 = vmatpush3.bf16.msra.mxu0 %v6847_v58  ;;  %v6852_v25 = vpack.c.bf16 %v2694_v0, %v2693_v62 }
 0x68f   :  { %v5368_v4 = vpop.eup %5367  ;;  %5389 = vrcp.f32 %v2389_v21  ;;  %v2392_v8 = vadd.f32 1.0, %v5366_v11  ;;  %v4050_v50 = vmul.f32 -1.442695, %v2353_v19  ;;  %v6873_v11 = vld [vmem:[%s7333_s2 + $0x18] sm:$0xff]  }
 0x690   :  { %5391 = vrcp.f32 %v2394_v17  ;;  %v2395_v26 = vadd.f32 1.0, %v5368_v4  ;;  %4606 = vmatprep.subr.bf16.mxu0 %v6852_v25  ;;  %v5370_v39 = vpop.eup %5369  ;;  %7406 = vst [vmem:[#allocation15_spill] sm:$0xff] %v6873_v11 }
 0x691   :  { %5393 = vrcp.f32 %v2392_v8  ;;  %v2393_v5 = vadd.f32 1.0, %v5370_v39  ;;  %v5372_v63 = vpop.eup %5371 }
 0x692   :  { %5395 = vrcp.f32 %v2395_v26  ;;  %4607 = vmatpush3.bf16.msra.mxu0 %v6852_v25  ;;  %v5374_v46 = vpop.eup %5373 }
 0x693   :  { %5397 = vpow2.f32 %v4052_v49  ;;  %v5376_v7 = vpop.eup %5375  ;;  %v6881_v49 = vld [vmem:[%s7333_s2 + $0x20] sm:$0xff]  }
 0x694   :  { %5399 = vrcp.f32 %v2393_v5  ;;  %v5378_v2 = vpop.eup %5377  ;;  %v2446_v8 = vmul.f32 %v5376_v7, %v5372_v63  ;;  %7407 = vst [vmem:[#allocation12_spill] sm:$0xff] %v6881_v49 }
 0x695   :  { %5401 = vpow2.f32 %v4050_v50  ;;  %4609 = vmatmul.mubr.msk.bf16.vlgmr.msra.gmra.mxu0 %vm133_vm0, %v6859_v41  ;;  %v5380_v55 = vpop.eup %5379  ;;  %v2444_v50 = vmul.f32 %v5378_v2, %v5374_v46 }
 0x696   :  { %4612 = vmatprep.mubr.msk.bf16.mxu0 %vm133_vm0, %v6866_v45  ;;  %v5382_v9 = vpop.eup %5381 }
 0x698   :  { %v5384_v18 = vpop.eup %5383 }
 0x699   :  { %v2430_v51 = vadd.f32 1.0, %v5384_v18 }
 0x69a   :  { %v5386_v29 = vpop.eup %5385 }
 0x69b   :  { %v5388_v62 = vpop.eup %5387  ;;  %v2428_v19 = vadd.f32 1.0, %v5386_v29  ;;  %5403 = vrcp.f32 %v2430_v51 }
 0x69c   :  { %v5390_v0 = vpop.eup %5389 }
 0x69d   :  { %v5392_v21 = vpop.eup %5391  ;;  %4613 = vmatmul.mubr.msk.bf16.gmra.mxu0 %vm133_vm0, %v6873_v11  ;;  %v2447_v11 = vmul.f32 %v5388_v62, %v5380_v55  ;;  %5405 = vrcp.f32 %v2428_v19  ;;  %v2445_v46 = vmul.f32 %v5390_v0, %v5382_v9  ;;  %v6902_v55 = vld [vmem:[%s7333_s2 + $0x28] sm:$0xff]   ;;  %v2461_v9 = vsel %vm2460_vm10, 1, %v7380_v16  ;;  %v5779_v19 = vld [vmem:[%s7333_s2] sm:$0xff]  }
 0x69e   :  { %v5394_v17 = vpop.eup %5393  ;;  %v2442_v4 = vmul.f32 %v5392_v21, %v6696_v3  ;;  %4616 = vmatprep.mubr.msk.bf16.mxu0 %vm133_vm0, %v6881_v49  ;;  %v2465_v62 = vrot.slane %v2461_v9, %v6372_v43 }
 0x69f   :  { %v5396_v26 = vpop.eup %5395  ;;  %v2440_v39 = vmul.f32 %v5394_v17, %v6698_v47  ;;  %v7124_v17 = vld [vmem:[%s7334_s3 + $0x18] sm:$0xff]  }
 0x6a0   :  { %v5398_v5 = vpop.eup %5397  ;;  %v6886_v18 = vadd.f32 %v2446_v8, %v2442_v4  ;;  %v2443_v29 = vmul.f32 %v5396_v26, %v6702_v1  ;;  %vm6928_vm11 = vcmp.eq.s32.totalorder %v2465_v62, 1 }
 0x6a1   :  { %v5400_v3 = vpop.eup %5399  ;;  %v6889_v63 = vadd.f32 %v2444_v50, %v2440_v39  ;;  %v2431_v7 = vadd.f32 1.0, %v5398_v5 }
 0x6a2   :  { %v5402_v21 = vpop.eup %5401  ;;  %5407 = vtanh.f32 %v6886_v18  ;;  %v6892_v49 = vadd.f32 %v2447_v11, %v2443_v29  ;;  %v2441_v47 = vmul.f32 %v5400_v3, %v6705_v31  ;;  %v6911_v31 = vld [vmem:[%s7333_s2 + $0x30] sm:$0xff]  }
 0x6a3   :  { %5409 = vtanh.f32 %v6889_v63  ;;  %v2429_v2 = vadd.f32 1.0, %v5402_v21 }
 0x6a4   :  { %5411 = vtanh.f32 %v6892_v49  ;;  %v6897_v1 = vadd.f32 %v2445_v46, %v2441_v47  ;;  %v2911_v47 = vld [vmem:[#allocation3 + $0x328] sm:$0xff] }
 0x6a5   :  { %5413 = vrcp.f32 %v2431_v7  ;;  %4617 = vmatmul.mubr.msk.bf16.gmra.mxu0 %vm133_vm0, %v6902_v55 }
 0x6a6   :  { %5415 = vtanh.f32 %v6897_v1  ;;  %4620 = vmatprep.mubr.msk.bf16.mxu0 %vm133_vm0, %v6911_v31 }
 0x6a7   :  { %5417 = vrcp.f32 %v2429_v2 }
 0x6a8   :  { %v5404_v0 = vpop.eup %5403 }
 0x6aa   :  { %v5406_v51 = vpop.eup %5405 }
 0x6ad   :  { %4621 = vmatmul.mubr.msk.bf16.gmra.mxu0 %vm133_vm0, %v6920_v24 }
 0x6ae   :  { %4652 = vmatprep.mubr.msk.bf16.mxu0 %vm133_vm0, %v5779_v19  ;;  %v2907_v19 = vld [vmem:[#allocation3 + $0x308] sm:$0xff] }
 0x6af   :  { %v5408_v11 = vpop.eup %5407 }
 0x6b0   :  { %v5410_v4 = vpop.eup %5409  ;;  %v6932_v8 = vmul.f32 %v5408_v11, %v5404_v0 }
 0x6b1   :  { %v5412_v26 = vpop.eup %5411  ;;  %v6934_v39 = vmul.f32 %v5410_v4, %v5406_v51 }
 0x6b2   :  { %v5414_v50 = vpop.eup %5413 }
 0x6b3   :  { %v5416_v29 = vpop.eup %5415  ;;  %v6940_v3 = vmul.f32 %v5414_v50, %v5412_v26  ;;  %v2912_v26 = vld [vmem:[#allocation3 + $0x330] sm:$0xff] }
 0x6b4   :  { %v5418_v21 = vpop.eup %5417 }
 0x6b5   :  { %v2700_v46 = vpack.c.bf16 %v6940_v3, %v6932_v8  ;;  %v6952_v2 = vmul.f32 %v5418_v21, %v5416_v29 }
 0x6b7   :  { %4580 = vmatprep.subr.bf16.mxu1 %v2700_v46  ;;  %v2699_v62 = vpack.c.bf16 %v6952_v2, %v6934_v39 }
 0x6b8   :  { %4581 = vmatpush3.bf16.msra.mxu1 %v2700_v46  ;;  %v2910_v46 = vld [vmem:[#allocation3 + $0x320] sm:$0xff] }
 0x6b9   :  { %4582 = vmatprep.subr.bf16.mxu1 %v2699_v62 }
 0x6bc   :  { %4583 = vmatpush3.bf16.msra.mxu1 %v2699_v62 }
 0x6bd   :  { %4584 = vmatprep.subr.bf16.mxu1 %v6847_v58 }
 0x6c0   :  { %4585 = vmatpush3.bf16.msra.mxu1 %v6847_v58 }
 0x6c1   :  { %4586 = vmatprep.subr.bf16.mxu1 %v6852_v25 }
 0x6c4   :  { %4587 = vmatpush3.bf16.msra.mxu1 %v6852_v25 }
 0x6c7   :  { %4589 = vmatmul.mubr.msk.bf16.vlgmr.msra.gmra.mxu1 %vm506_vm1, %v6768_v59  ;;  %v6981_v59 = vld [vmem:[%s7334_s3] sm:$0xff]  }
 0x6c8   :  { %4592 = vmatprep.mubr.msk.bf16.mxu1 %vm506_vm1, %v6775_v20  ;;  %v2908_v20 = vld [vmem:[#allocation3 + $0x310] sm:$0xff] }
 0x6cf   :  { %4593 = vmatmul.mubr.msk.bf16.gmra.mxu1 %vm506_vm1, %v6782_v44 }
 0x6d0   :  { %4596 = vmatprep.mubr.msk.bf16.mxu1 %vm506_vm1, %v6789_v52  ;;  %v2906_v52 = vld [vmem:[#allocation3 + $0x300] sm:$0xff] }
 0x6d7   :  { %4597 = vmatmul.mubr.msk.bf16.gmra.mxu1 %vm506_vm1, %v6796_v35  ;;  %v2909_v35 = vld [vmem:[#allocation3 + $0x318] sm:$0xff] }
 0x6d8   :  { %4600 = vmatprep.mubr.msk.bf16.mxu1 %vm506_vm1, %v6803_v57 }
 0x6df   :  { %4601 = vmatmul.mubr.msk.bf16.gmra.mxu1 %vm506_vm1, %v6810_v60 }
 0x6e0   :  { %4632 = vmatprep.mubr.msk.bf16.mxu1 %vm506_vm1, %v6981_v59 }
 0x755   :  { %v4610_v44 = vpop.f32.mrf.mxu0 }
 0x756   :  { %v3021_v58 = vadd.f32 %v4610_v44, %v2908_v20  ;;  %v2913_v44 = vld [vmem:[#allocation3 + $0x338] sm:$0xff] }
 0x757   :  { %v2956_v25 = vpop.f32.mrf.mxu0 }
 0x758   :  { %v4103_v0 = vmul.f32 -1.442695, %v3021_v58  ;;  %v3019_v51 = vadd.f32 %v2956_v25, %v2906_v52 }
 0x759   :  { %v4611_v57 = vpop.f32.mrf.mxu0 }
 0x75a   :  { %5419 = vpow2.f32 %v4103_v0  ;;  %v4101_v60 = vmul.f32 -1.442695, %v3019_v51  ;;  %v3022_v11 = vadd.f32 %v4611_v57, %v2909_v35  ;;  %v2916_v57 = vld [vmem:[#allocation3 + $0x350] sm:$0xff] }
 0x75b   :  { %v2959_v4 = vpop.f32.mrf.mxu0 }
 0x75c   :  { %5421 = vpow2.f32 %v4101_v60  ;;  %v4104_v50 = vmul.f32 -1.442695, %v3022_v11  ;;  %v3020_v29 = vadd.f32 %v2959_v4, %v2907_v19  ;;  %v2914_v4 = vld [vmem:[#allocation3 + $0x340] sm:$0xff] }
 0x75d   :  { %v4614_v21 = vpop.f32.mrf.mxu0 }
 0x75e   :  { %5423 = vpow2.f32 %v4104_v50  ;;  %v4102_v62 = vmul.f32 -1.442695, %v3020_v29  ;;  %v3025_v9 = vadd.f32 %v4614_v21, %v2912_v26 }
 0x75f   :  { %v2972_v20 = vpop.f32.mrf.mxu0 }
 0x760   :  { %5425 = vpow2.f32 %v4102_v62  ;;  %v4107_v58 = vmul.f32 -1.442695, %v3025_v9  ;;  %v3023_v52 = vadd.f32 %v2972_v20, %v2910_v46  ;;  %v2917_v62 = vld [vmem:[#allocation3 + $0x358] sm:$0xff] }
 0x761   :  { %v4615_v25 = vpop.f32.mrf.mxu0 }
 0x762   :  { %5427 = vpow2.f32 %v4107_v58  ;;  %v4105_v0 = vmul.f32 -1.442695, %v3023_v52  ;;  %v3026_v35 = vadd.f32 %v4615_v25, %v2913_v44  ;;  %v2915_v52 = vld [vmem:[#allocation3 + $0x348] sm:$0xff] }
 0x763   :  { %v2975_v51 = vpop.f32.mrf.mxu0 }
 0x764   :  { %5429 = vpow2.f32 %v4105_v0  ;;  %v4108_v60 = vmul.f32 -1.442695, %v3026_v35  ;;  %v3024_v19 = vadd.f32 %v2975_v51, %v2911_v47  ;;  %v2920_v35 = vld [vmem:[#allocation3 + $0x370] sm:$0xff] }
 0x765   :  { %v4618_v11 = vpop.f32.mrf.mxu0 }
 0x766   :  { %5431 = vpow2.f32 %v4108_v60  ;;  %v4106_v50 = vmul.f32 -1.442695, %v3024_v19  ;;  %v3029_v26 = vadd.f32 %v4618_v11, %v2916_v57  ;;  %v2918_v11 = vld [vmem:[#allocation3 + $0x360] sm:$0xff] }
 0x767   :  { %v5420_v29 = vpop.eup %5419  ;;  %v2988_v21 = vpop.f32.mrf.mxu0 }
 0x768   :  { %v3061_v9 = vadd.f32 1.0, %v5420_v29  ;;  %5433 = vpow2.f32 %v4106_v50  ;;  %v3027_v46 = vadd.f32 %v2988_v21, %v2914_v4 }
 0x769   :  { %v5422_v20 = vpop.eup %5421  ;;  %v4619_v58 = vpop.f32.mrf.mxu0  ;;  %5435 = vtanh.f32 %v3029_v26 }
 0x76a   :  { %v3059_v44 = vadd.f32 1.0, %v5422_v20  ;;  %v3030_v25 = vadd.f32 %v4619_v58, %v2917_v62  ;;  %5437 = vrcp.f32 %v3061_v9  ;;  %v2921_v20 = vld [vmem:[#allocation3 + $0x378] sm:$0xff] }
 0x76b   :  { %v5424_v0 = vpop.eup %5423  ;;  %v2991_v47 = vpop.f32.mrf.mxu0  ;;  %5439 = vtanh.f32 %v3027_v46  ;;  %v2919_v46 = vld [vmem:[#allocation3 + $0x368] sm:$0xff] }
 0x76c   :  { %v3062_v51 = vadd.f32 1.0, %v5424_v0  ;;  %v3028_v60 = vadd.f32 %v2991_v47, %v2915_v52  ;;  %5441 = vrcp.f32 %v3059_v44 }
 0x76d   :  { %v5426_v57 = vpop.eup %5425  ;;  %v4622_v19 = vpop.f32.mrf.mxu0  ;;  %5443 = vtanh.f32 %v3030_v25 }
 0x76e   :  { %v3060_v29 = vadd.f32 1.0, %v5426_v57  ;;  %v3033_v4 = vadd.f32 %v4622_v19, %v2920_v35  ;;  %5445 = vrcp.f32 %v3062_v51 }
 0x76f   :  { %v5428_v50 = vpop.eup %5427  ;;  %v3004_v21 = vpop.f32.mrf.mxu0  ;;  %5447 = vtanh.f32 %v3028_v60 }
 0x770   :  { %v3065_v26 = vadd.f32 1.0, %v5428_v50  ;;  %v4111_v62 = vmul.f32 -1.442695, %v3033_v4  ;;  %v3031_v9 = vadd.f32 %v3004_v21, %v2918_v11  ;;  %5449 = vrcp.f32 %v3060_v29 }
 0x771   :  { %v5430_v58 = vpop.eup %5429  ;;  %v4623_v0 = vpop.f32.mrf.mxu0 }
 0x772   :  { %5451 = vrcp.f32 %v3065_v26  ;;  %v3063_v52 = vadd.f32 1.0, %v5430_v58  ;;  %v4109_v44 = vmul.f32 -1.442695, %v3031_v9  ;;  %v3034_v47 = vadd.f32 %v4623_v0, %v2921_v20 }
 0x773   :  { %v5432_v7 = vpop.eup %5431  ;;  %5453 = vpow2.f32 %v4111_v62  ;;  %v3007_v25 = vpop.f32.mrf.mxu0 }
 0x774   :  { %5455 = vrcp.f32 %v3063_v52  ;;  %v3066_v35 = vadd.f32 1.0, %v5432_v7  ;;  %v4112_v51 = vmul.f32 -1.442695, %v3034_v47  ;;  %v3032_v57 = vadd.f32 %v3007_v25, %v2919_v46 }
 0x775   :  { %v5434_v19 = vpop.eup %5433  ;;  %5457 = vpow2.f32 %v4109_v44 }
 0x776   :  { %5459 = vrcp.f32 %v3066_v35  ;;  %v3064_v60 = vadd.f32 1.0, %v5434_v19  ;;  %v4110_v11 = vmul.f32 -1.442695, %v3032_v57  ;;  %v5436_v4 = vpop.eup %5435 }
 0x777   :  { %5461 = vpow2.f32 %v4112_v51  ;;  %v5438_v29 = vpop.eup %5437 }
 0x778   :  { %5463 = vrcp.f32 %v3064_v60  ;;  %v5440_v50 = vpop.eup %5439  ;;  %v3117_v58 = vmul.f32 %v5438_v29, %v5436_v4 }
 0x779   :  { %5465 = vpow2.f32 %v4110_v11  ;;  %v5442_v21 = vpop.eup %5441 }
 0x77a   :  { %v5444_v20 = vpop.eup %5443  ;;  %v3115_v52 = vmul.f32 %v5442_v21, %v5440_v50 }
 0x77b   :  { %v5446_v26 = vpop.eup %5445 }
 0x77c   :  { %v5448_v62 = vpop.eup %5447  ;;  %v3118_v57 = vmul.f32 %v5446_v26, %v5444_v20 }
 0x77d   :  { %v5450_v9 = vpop.eup %5449 }
 0x77f   :  { %v5452_v7 = vpop.eup %5451 }
 0x780   :  { %v5454_v0 = vpop.eup %5453  ;;  %v3113_v46 = vmul.f32 %v5452_v7, %v6819_v23  ;;  %v3116_v23 = vmul.f32 %v5450_v9, %v5448_v62 }
 0x781   :  { %v5456_v44 = vpop.eup %5455  ;;  %v3101_v47 = vadd.f32 1.0, %v5454_v0 }
 0x782   :  { %v5458_v25 = vpop.eup %5457  ;;  %v6986_v35 = vadd.f32 %v3117_v58, %v3113_v46  ;;  %v3111_v51 = vmul.f32 %v5456_v44, %v6824_v13 }
 0x783   :  { %v5460_v19 = vpop.eup %5459  ;;  %5467 = vrcp.f32 %v3101_v47  ;;  %v3099_v60 = vadd.f32 1.0, %v5458_v25 }
 0x784   :  { %v5462_v11 = vpop.eup %5461  ;;  %5469 = vtanh.f32 %v6986_v35  ;;  %v6990_v4 = vadd.f32 %v3115_v52, %v3111_v51  ;;  %v3114_v29 = vmul.f32 %v5460_v19, %v6830_v48 }
 0x785   :  { %v5464_v50 = vpop.eup %5463  ;;  %5471 = vrcp.f32 %v3099_v60  ;;  %v3102_v21 = vadd.f32 1.0, %v5462_v11 }
 0x786   :  { %7410 = vst [vmem:[#allocation10_spill] sm:$0xff] %v6990_v4  ;;  %v5466_v7 = vpop.eup %5465  ;;  %5473 = vtanh.f32 %v6990_v4  ;;  %v6994_v58 = vadd.f32 %v3118_v57, %v3114_v29  ;;  %v3112_v13 = vmul.f32 %v5464_v50, %v6835_v37 }
 0x787   :  { %5475 = vrcp.f32 %v3102_v21  ;;  %v3100_v20 = vadd.f32 1.0, %v5466_v7  ;;  %v4590_v26 = vpop.f32.mrf.mxu1 }
 0x788   :  { %5477 = vtanh.f32 %v6994_v58  ;;  %v6998_v0 = vadd.f32 %v3116_v23, %v3112_v13  ;;  %v2744_v48 = vadd.f32 %v4590_v26, %v6092_v6 }
 0x789   :  { %5479 = vrcp.f32 %v3100_v20  ;;  %v2735_v62 = vpop.f32.mrf.mxu1 }
 0x78a   :  { %5481 = vtanh.f32 %v6998_v0  ;;  %v4083_v9 = vmul.f32 -1.442695, %v2744_v48  ;;  %v2736_v46 = vadd.f32 %v2735_v62, %v7400_v40 }
 0x78b   :  { %v4591_v52 = vpop.f32.mrf.mxu1 }
 0x78c   :  { %5483 = vpow2.f32 %v4083_v9  ;;  %v4081_v44 = vmul.f32 -1.442695, %v2736_v46  ;;  %v2747_v37 = vadd.f32 %v4591_v52, %v7401_v15 }
 0x78d   :  { %v2738_v47 = vpop.f32.mrf.mxu1 }
 0x78e   :  { %5485 = vpow2.f32 %v4081_v44  ;;  %v4084_v25 = vmul.f32 -1.442695, %v2747_v37  ;;  %v2739_v51 = vadd.f32 %v2738_v47, %v7402_v12 }
 0x78f   :  { %v4594_v57 = vpop.f32.mrf.mxu1 }
 0x790   :  { %v5468_v19 = vpop.eup %5467  ;;  %5487 = vpow2.f32 %v4084_v25  ;;  %v4082_v60 = vmul.f32 -1.442695, %v2739_v51  ;;  %v2760_v11 = vadd.f32 %v4594_v57, %v7403_v61 }
 0x791   :  { %v5470_v29 = vpop.eup %5469  ;;  %v2751_v23 = vpop.f32.mrf.mxu1 }
 0x792   :  { %v5472_v50 = vpop.eup %5471  ;;  %5489 = vpow2.f32 %v4082_v60  ;;  %v4087_v21 = vmul.f32 -1.442695, %v2760_v11  ;;  %v2752_v7 = vadd.f32 %v2751_v23, %v7404_v34  ;;  %v3129_v52 = vmul.f32 %v5470_v29, %v5468_v19 }
 0x793   :  { %v5474_v13 = vpop.eup %5473  ;;  %v4595_v20 = vpop.f32.mrf.mxu1 }
 0x794   :  { %v5476_v26 = vpop.eup %5475  ;;  %5491 = vpow2.f32 %v4087_v21  ;;  %v4085_v48 = vmul.f32 -1.442695, %v2752_v7  ;;  %v2763_v62 = vadd.f32 %v4595_v20, %v7405_v30  ;;  %v3127_v20 = vmul.f32 %v5474_v13, %v5472_v50 }
 0x795   :  { %v5478_v9 = vpop.eup %5477  ;;  %v2754_v46 = vpop.f32.mrf.mxu1 }
 0x796   :  { %v5480_v44 = vpop.eup %5479  ;;  %5493 = vpow2.f32 %v4085_v48  ;;  %v4088_v37 = vmul.f32 -1.442695, %v2763_v62  ;;  %v2755_v47 = vadd.f32 %v2754_v46, %v7395_v28  ;;  %v3130_v25 = vmul.f32 %v5478_v9, %v5476_v26 }
 0x797   :  { %v5482_v51 = vpop.eup %5481  ;;  %v4598_v57 = vpop.f32.mrf.mxu1 }
 0x798   :  { %5495 = vpow2.f32 %v4088_v37  ;;  %v4086_v60 = vmul.f32 -1.442695, %v2755_v47  ;;  %v2776_v11 = vadd.f32 %v4598_v57, %v6124_v14  ;;  %v7010_v23 = vpack.c.bf16 %v3130_v25, %v3129_v52 }
 0x799   :  { %v5484_v21 = vpop.eup %5483  ;;  %v2767_v7 = vpop.f32.mrf.mxu1  ;;  %v3128_v5 = vmul.f32 %v5482_v51, %v5480_v44 }
 0x79a   :  { %v2824_v4 = vadd.f32 1.0, %v5484_v21  ;;  %5497 = vpow2.f32 %v4086_v60  ;;  %v2768_v19 = vadd.f32 %v2767_v7, %v6140_v10  ;;  %4648 = vmatprep.subr.bf16.mxu0 %v7010_v23 }
 0x79b   :  { %v5486_v29 = vpop.eup %5485  ;;  %v4599_v26 = vpop.f32.mrf.mxu1  ;;  %4649 = vmatpush3.bf16.msra.mxu0 %v7010_v23  ;;  %v7015_v48 = vpack.c.bf16 %v3128_v5, %v3127_v20  ;;  %5499 = vtanh.f32 %v2776_v11 }
 0x79c   :  { %v2822_v62 = vadd.f32 1.0, %v5486_v29  ;;  %v2779_v9 = vadd.f32 %v4599_v26, %v6130_v27  ;;  %5501 = vrcp.f32 %v2824_v4 }
 0x79d   :  { %v5488_v46 = vpop.eup %5487  ;;  %v2770_v50 = vpop.f32.mrf.mxu1  ;;  %4650 = vmatprep.subr.bf16.mxu0 %v7015_v48  ;;  %5503 = vtanh.f32 %v2768_v19 }
 0x79e   :  { %v2825_v13 = vadd.f32 1.0, %v5488_v46  ;;  %v2771_v52 = vadd.f32 %v2770_v50, %v6150_v33  ;;  %5505 = vrcp.f32 %v2822_v62 }
 0x79f   :  { %v5490_v44 = vpop.eup %5489  ;;  %v4602_v37 = vpop.f32.mrf.mxu1  ;;  %4651 = vmatpush3.bf16.msra.mxu0 %v7015_v48  ;;  %5507 = vtanh.f32 %v2779_v9 }
 0x7a0   :  { %v2823_v5 = vadd.f32 1.0, %v5490_v44  ;;  %v2792_v47 = vadd.f32 %v4602_v37, %v6134_v36  ;;  %5509 = vrcp.f32 %v2825_v13  ;;  %v7411_v44 = vld [vmem:[#allocation15_spill] sm:$0xff] }
 0x7a1   :  { %v5492_v25 = vpop.eup %5491  ;;  %v2783_v51 = vpop.f32.mrf.mxu1  ;;  %5511 = vtanh.f32 %v2771_v52 }
 0x7a2   :  { %v2828_v4 = vadd.f32 1.0, %v5492_v25  ;;  %v4091_v57 = vmul.f32 -1.442695, %v2792_v47  ;;  %v2784_v60 = vadd.f32 %v2783_v51, %v6160_v42  ;;  %4653 = vmatmul.mubr.msk.bf16.vlgmr.msra.gmra.mxu0 %vm133_vm0, %v6859_v41  ;;  %5513 = vrcp.f32 %v2823_v5  ;;  %v7412_v5 = vld [vmem:[#allocation12_spill] sm:$0xff] }
 0x7a3   :  { %v5494_v11 = vpop.eup %5493  ;;  %v4603_v21 = vpop.f32.mrf.mxu1  ;;  %4656 = vmatprep.mubr.msk.bf16.mxu0 %vm133_vm0, %v6866_v45 }
 0x7a4   :  { %5515 = vrcp.f32 %v2828_v4  ;;  %v2826_v7 = vadd.f32 1.0, %v5494_v11  ;;  %v4089_v20 = vmul.f32 -1.442695, %v2784_v60  ;;  %v2795_v19 = vadd.f32 %v4603_v21, %v6138_v53 }
 0x7a5   :  { %v5496_v29 = vpop.eup %5495  ;;  %5517 = vpow2.f32 %v4091_v57  ;;  %v2786_v26 = vpop.f32.mrf.mxu1 }
 0x7a6   :  { %5519 = vrcp.f32 %v2826_v7  ;;  %v2829_v62 = vadd.f32 1.0, %v5496_v29  ;;  %v4092_v9 = vmul.f32 -1.442695, %v2795_v19  ;;  %v2787_v46 = vadd.f32 %v2786_v26, %v6176_v32 }
 0x7a7   :  { %v5498_v41 = vpop.eup %5497  ;;  %5521 = vpow2.f32 %v4089_v20 }
 0x7a8   :  { %5523 = vrcp.f32 %v2829_v62  ;;  %v2827_v50 = vadd.f32 1.0, %v5498_v41  ;;  %v4090_v13 = vmul.f32 -1.442695, %v2787_v46  ;;  %v5500_v52 = vpop.eup %5499 }
 0x7a9   :  { %5525 = vpow2.f32 %v4092_v9  ;;  %v5502_v45 = vpop.eup %5501 }
 0x7aa   :  { %5527 = vrcp.f32 %v2827_v50  ;;  %4657 = vmatmul.mubr.msk.bf16.gmra.mxu0 %vm133_vm0, %v7411_v44  ;;  %v5504_v37 = vpop.eup %5503  ;;  %v2880_v7 = vmul.f32 %v5502_v45, %v5500_v52 }
 0x7ab   :  { %5529 = vpow2.f32 %v4090_v13  ;;  %4660 = vmatprep.mubr.msk.bf16.mxu0 %vm133_vm0, %v7412_v5  ;;  %v5506_v47 = vpop.eup %5505 }
 0x7ac   :  { %v5508_v25 = vpop.eup %5507  ;;  %v2878_v9 = vmul.f32 %v5506_v47, %v5504_v37  ;;  %v7052_v47 = vld [vmem:[%s7331_s0] sm:$0x1] }
 0x7ad   :  { %v5510_v51 = vpop.eup %5509  ;;  %vm2894_vm12 = vcmp.eq.s32.totalorder %v7052_v47, 6  ;;  %vm3328_vm14 = vcmp.eq.s32.totalorder %v7052_v47, 7 }
 0x7ae   :  { %v5512_v4 = vpop.eup %5511  ;;  %v2881_v13 = vmul.f32 %v5510_v51, %v5508_v25 }
 0x7af   :  { %v5514_v57 = vpop.eup %5513 }
 0x7b0   :  { %v2879_v37 = vmul.f32 %v5514_v57, %v5512_v4  ;;  %v3343_v57 = vld [vmem:[#allocation3 + $0x398] sm:$0xff] }
 0x7b1   :  { %v5516_v60 = vpop.eup %5515 }
 0x7b2   :  { %v5518_v11 = vpop.eup %5517  ;;  %v2876_v21 = vmul.f32 %v5516_v60, %v6886_v18  ;;  %4661 = vmatmul.mubr.msk.bf16.gmra.mxu0 %vm133_vm0, %v6902_v55 }
 0x7b3   :  { %v5520_v20 = vpop.eup %5519  ;;  %v2864_v19 = vadd.f32 1.0, %v5518_v11  ;;  %4664 = vmatprep.mubr.msk.bf16.mxu0 %vm133_vm0, %v6911_v31 }
 0x7b4   :  { %v5522_v29 = vpop.eup %5521  ;;  %v7038_v26 = vadd.f32 %v2880_v7, %v2876_v21  ;;  %v2874_v62 = vmul.f32 %v5520_v20, %v6889_v63 }
 0x7b5   :  { %v5524_v46 = vpop.eup %5523  ;;  %5531 = vrcp.f32 %v2864_v19  ;;  %v2862_v41 = vadd.f32 1.0, %v5522_v29 }
 0x7b6   :  { %v5526_v50 = vpop.eup %5525  ;;  %5533 = vtanh.f32 %v7038_v26  ;;  %v7042_v18 = vadd.f32 %v2878_v9, %v2874_v62  ;;  %v2877_v55 = vmul.f32 %v5524_v46, %v6892_v49  ;;  %v7416_v46 = vsel %vm6928_vm11, %v6934_v39, %v6741_v38 }
 0x7b7   :  { %v5528_v52 = vpop.eup %5527  ;;  %5535 = vrcp.f32 %v2862_v41  ;;  %v2865_v31 = vadd.f32 1.0, %v5526_v50  ;;  %v7418_v38 = vsel %vm6928_vm11, %v6952_v2, %v6755_v22  ;;  %v7117_v22 = vld [vmem:[%s7334_s3 + $0x10] sm:$0xff]   ;;  %v7138_v2 = vld [vmem:[%s7334_s3 + $0x28] sm:$0xff]  }
 0x7b8   :  { %v5530_v45 = vpop.eup %5529  ;;  %5537 = vtanh.f32 %v7042_v18  ;;  %v7046_v44 = vadd.f32 %v2881_v13, %v2877_v55  ;;  %v2875_v63 = vmul.f32 %v5528_v52, %v6897_v1  ;;  %v2895_v1 = vsel %vm2894_vm12, 1, %v7380_v16 }
 0x7b9   :  { %5539 = vrcp.f32 %v2865_v31  ;;  %v2863_v5 = vadd.f32 1.0, %v5530_v45  ;;  %v2899_v25 = vrot.slane %v2895_v1, %v6372_v43  ;;  %v3342_v1 = vld [vmem:[#allocation3 + $0x390] sm:$0xff] }
 0x7ba   :  { %5541 = vtanh.f32 %v7046_v44  ;;  %v7056_v49 = vadd.f32 %v2879_v37, %v2875_v63  ;;  %4665 = vmatmul.mubr.msk.bf16.gmra.mxu0 %vm133_vm0, %v6920_v24  ;;  %v7415_v24 = vsel %vm6928_vm11, %v6932_v8, %v6734_v54  ;;  %v7417_v54 = vsel %vm6928_vm11, %v6940_v3, %v6748_v56  ;;  %v7110_v56 = vld [vmem:[%s7334_s3 + $0x8] sm:$0xff]   ;;  %v7131_v3 = vld [vmem:[%s7334_s3 + $0x20] sm:$0xff]  }
 0x7bb   :  { %5543 = vrcp.f32 %v2863_v5  ;;  %vm7063_vm13 = vcmp.eq.s32.totalorder %v2899_v25, 1  ;;  %v3340_v25 = vld [vmem:[#allocation3 + $0x380] sm:$0xff]  ;;  %vm3762_vm0 = vcmp.eq.s32.totalorder %v7052_v47, 8 }
 0x7bc   :  { %5545 = vtanh.f32 %v7056_v49 }
 0x7c2   :  { %v5532_v51 = vpop.eup %5531 }
 0x7c3   :  { %v5534_v4 = vpop.eup %5533 }
 0x7c4   :  { %v5536_v60 = vpop.eup %5535  ;;  %v2892_v11 = vmul.f32 %v5534_v4, %v5532_v51 }
 0x7c5   :  { %v5538_v21 = vpop.eup %5537 }
 0x7c6   :  { %v5540_v7 = vpop.eup %5539  ;;  %v7074_v20 = vsel %vm7063_vm13, %v2892_v11, %v7415_v24  ;;  %v2890_v19 = vmul.f32 %v5538_v21, %v5536_v60 }
 0x7c7   :  { %v5542_v29 = vpop.eup %5541 }
 0x7c8   :  { %v5544_v62 = vpop.eup %5543  ;;  %v2893_v9 = vmul.f32 %v5542_v29, %v5540_v7  ;;  %v7083_v41 = vsel %vm7063_vm13, %v2890_v19, %v7416_v46  ;;  %v3341_v7 = vld [vmem:[#allocation3 + $0x388] sm:$0xff]  ;;  %v3346_v29 = vld [vmem:[#allocation3 + $0x3b0] sm:$0xff] }
 0x7c9   :  { %v5546_v50 = vpop.eup %5545 }
 0x7ca   :  { %v7092_v8 = vsel %vm7063_vm13, %v2893_v9, %v7417_v54  ;;  %v3134_v55 = vpack.c.bf16 %v2893_v9, %v2892_v11  ;;  %v2891_v13 = vmul.f32 %v5546_v50, %v5544_v62  ;;  %v3344_v50 = vld [vmem:[#allocation3 + $0x3a0] sm:$0xff] }
 0x7cc   :  { %4624 = vmatprep.subr.bf16.mxu1 %v3134_v55  ;;  %v7101_v39 = vsel %vm7063_vm13, %v2891_v13, %v7418_v38  ;;  %v3133_v52 = vpack.c.bf16 %v2891_v13, %v2890_v19  ;;  %v3347_v13 = vld [vmem:[#allocation3 + $0x3b8] sm:$0xff] }
 0x7cd   :  { %4625 = vmatpush3.bf16.msra.mxu1 %v3134_v55 }
 0x7ce   :  { %4626 = vmatprep.subr.bf16.mxu1 %v3133_v52 }
 0x7d1   :  { %4627 = vmatpush3.bf16.msra.mxu1 %v3133_v52 }
 0x7d2   :  { %4628 = vmatprep.subr.bf16.mxu1 %v7010_v23 }
 0x7d5   :  { %4629 = vmatpush3.bf16.msra.mxu1 %v7010_v23  ;;  %v7145_v23 = vld [vmem:[%s7334_s3 + $0x30] sm:$0xff]  }
 0x7d6   :  { %4630 = vmatprep.subr.bf16.mxu1 %v7015_v48 }
 0x7d9   :  { %4631 = vmatpush3.bf16.msra.mxu1 %v7015_v48  ;;  %v7152_v48 = vld [vmem:[%s7334_s3 + $0x38] sm:$0xff]   ;;  %s5837_s3 = smov [#allocation6]  }
 0x7da   :  { %s3828_s20 = sshll.u32 %s5837_s3, 4  ;;  %s3829_s20 = int_to_ptr.vmem [resolvable:$true] %s3828_s20 }
 0x7db   :  { %s5809_s21 = scalar_lea.vmem %s3829_s20, 16  ;;  %s5813_s22 = scalar_lea.vmem %s3829_s20, 32 }
 0x7dc   :  { %4633 = vmatmul.mubr.msk.bf16.vlgmr.msra.gmra.mxu1 %vm506_vm1, %v7110_v56  ;;  %p5810_p5 = scmp.ne.s32.totalorder %s3829_s20, %s5809_s21  ;;  %p5814_p6 = scmp.lt.s32.totalorder %s3829_s20, %s3829_s20 }
 0x7dd   :  { %4636 = vmatprep.mubr.msk.bf16.mxu1 %vm506_vm1, %v7117_v22  ;;  %p5815_p7 = scmp.lt.s32.totalorder %s5813_s22, %s5809_s21 }
 0x7df   :  { %p5816_p8 = por %p5815_p7, %p5814_p6 }
 0x7e1   :  { %p5817_p9 = pnand %p5816_p8, %p5810_p5 }
 0x7e4   :  { %4637 = vmatmul.mubr.msk.bf16.gmra.mxu1 %vm506_vm1, %v7124_v17 }
 0x7e5   :  { %4640 = vmatprep.mubr.msk.bf16.mxu1 %vm506_vm1, %v7131_v3 }
 0x7ec   :  { %4641 = vmatmul.mubr.msk.bf16.gmra.mxu1 %vm506_vm1, %v7138_v2 }
 0x7ed   :  { %4644 = vmatprep.mubr.msk.bf16.mxu1 %vm506_vm1, %v7145_v23 }
 0x7f4   :  { %4645 = vmatmul.mubr.msk.bf16.gmra.mxu1 %vm506_vm1, %v7152_v48 }
 0x7f5   :  { %4676 = vmatprep.mubr.msk.bf16.mxu1 %vm506_vm1, %v6981_v59 }
 0x862   :  { %v4654_v31 = vpop.f32.mrf.mxu0 }
 0x863   :  { %v3455_v51 = vadd.f32 %v4654_v31, %v3342_v1 }
 0x864   :  { %v3390_v45 = vpop.f32.mrf.mxu0 }
 0x865   :  { %v3453_v60 = vadd.f32 %v3390_v45, %v3340_v25  ;;  %v4143_v11 = vmul.f32 -1.442695, %v3455_v51 }
 0x866   :  { %v4655_v63 = vpop.f32.mrf.mxu0 }
 0x867   :  { %v3456_v21 = vadd.f32 %v4655_v63, %v3343_v57  ;;  %v4141_v19 = vmul.f32 -1.442695, %v3453_v60  ;;  %5547 = vpow2.f32 %v4143_v11  ;;  %v3345_v63 = vld [vmem:[#allocation3 + $0x3a8] sm:$0xff]  ;;  %v3350_v57 = vld [vmem:[#allocation3 + $0x3d0] sm:$0xff]  ;;  %v3348_v11 = vld [vmem:[#allocation3 + $0x3c0] sm:$0xff] }
 0x868   :  { %v3393_v37 = vpop.f32.mrf.mxu0 }
 0x869   :  { %v3454_v62 = vadd.f32 %v3393_v37, %v3341_v7  ;;  %v4144_v59 = vmul.f32 -1.442695, %v3456_v21  ;;  %5549 = vpow2.f32 %v4141_v19 }
 0x86a   :  { %v4658_v5 = vpop.f32.mrf.mxu0 }
 0x86b   :  { %v3459_v46 = vadd.f32 %v4658_v5, %v3346_v29  ;;  %v4142_v55 = vmul.f32 -1.442695, %v3454_v62  ;;  %5551 = vpow2.f32 %v4144_v59 }
 0x86c   :  { %v3406_v4 = vpop.f32.mrf.mxu0 }
 0x86d   :  { %v4147_v38 = vmul.f32 -1.442695, %v3459_v46  ;;  %v3457_v52 = vadd.f32 %v3406_v4, %v3344_v50  ;;  %5553 = vpow2.f32 %v4142_v55  ;;  %v3351_v4 = vld [vmem:[#allocation3 + $0x3d8] sm:$0xff]  ;;  %v3349_v46 = vld [vmem:[#allocation3 + $0x3c8] sm:$0xff] }
 0x86e   :  { %v4659_v24 = vpop.f32.mrf.mxu0 }
 0x86f   :  { %v3460_v45 = vadd.f32 %v4659_v24, %v3347_v13  ;;  %5555 = vpow2.f32 %v4147_v38  ;;  %v4145_v1 = vmul.f32 -1.442695, %v3457_v52  ;;  %v3354_v38 = vld [vmem:[#allocation3 + $0x3f0] sm:$0xff] }
 0x870   :  { %v3409_v9 = vpop.f32.mrf.mxu0 }
 0x871   :  { %v3458_v25 = vadd.f32 %v3409_v9, %v3345_v63  ;;  %v4148_v51 = vmul.f32 -1.442695, %v3460_v45  ;;  %5557 = vpow2.f32 %v4145_v1 }
 0x872   :  { %v4662_v54 = vpop.f32.mrf.mxu0 }
 0x873   :  { %v4146_v5 = vmul.f32 -1.442695, %v3458_v25  ;;  %5559 = vpow2.f32 %v4148_v51  ;;  %v3463_v19 = vadd.f32 %v4662_v54, %v3350_v57 }
 0x874   :  { %v3422_v31 = vpop.f32.mrf.mxu0  ;;  %v5548_v60 = vpop.eup %5547 }
 0x875   :  { %v3495_v29 = vadd.f32 1.0, %v5548_v60  ;;  %v3461_v59 = vadd.f32 %v3422_v31, %v3348_v11  ;;  %5561 = vpow2.f32 %v4146_v5 }
 0x876   :  { %v4663_v37 = vpop.f32.mrf.mxu0  ;;  %v5550_v7 = vpop.eup %5549  ;;  %5563 = vtanh.f32 %v3463_v19 }
 0x877   :  { %v3493_v24 = vadd.f32 1.0, %v5550_v7  ;;  %v3464_v9 = vadd.f32 %v4663_v37, %v3351_v4  ;;  %5565 = vrcp.f32 %v3495_v29 }
 0x878   :  { %v3425_v21 = vpop.f32.mrf.mxu0  ;;  %v5552_v62 = vpop.eup %5551  ;;  %5567 = vtanh.f32 %v3461_v59 }
 0x879   :  { %v3496_v13 = vadd.f32 1.0, %v5552_v62  ;;  %v3462_v52 = vadd.f32 %v3425_v21, %v3349_v46  ;;  %5569 = vrcp.f32 %v3493_v24  ;;  %v3355_v21 = vld [vmem:[#allocation3 + $0x3f8] sm:$0xff] }
 0x87a   :  { %v4666_v50 = vpop.f32.mrf.mxu0  ;;  %v5554_v55 = vpop.eup %5553  ;;  %5571 = vtanh.f32 %v3464_v9 }
 0x87b   :  { %v3494_v31 = vadd.f32 1.0, %v5554_v55  ;;  %v3467_v25 = vadd.f32 %v4666_v50, %v3354_v38  ;;  %5573 = vrcp.f32 %v3496_v13  ;;  %v3353_v13 = vld [vmem:[#allocation3 + $0x3e8] sm:$0xff] }
 0x87c   :  { %v5556_v63 = vpop.eup %5555  ;;  %v7158_v54 = vpop.f32.mrf.mxu0  ;;  %5575 = vtanh.f32 %v3462_v52 }
 0x87d   :  { %v3499_v60 = vadd.f32 1.0, %v5556_v63  ;;  %v4151_v4 = vmul.f32 -1.442695, %v3467_v25 }
 0x87e   :  { %v5558_v11 = vpop.eup %5557  ;;  %v4667_v7 = vpop.f32.mrf.mxu0 }
 0x87f   :  { %v3497_v50 = vadd.f32 1.0, %v5558_v11  ;;  %v3468_v9 = vadd.f32 %v4667_v7, %v3355_v21 }
 0x880   :  { %v5560_v59 = vpop.eup %5559  ;;  %v3441_v38 = vpop.f32.mrf.mxu0 }
 0x882   :  { %v5562_v63 = vpop.eup %5561 }
 0x883   :  { %v7165_v25 = vpop.eup %5563 }
 0x89c   :  { %v4634_v45 = vpop.f32.mrf.mxu1 }
 0x89d   :  { %v3178_v1 = vadd.f32 %v4634_v45, %v6092_v6 }
 0x89e   :  { %v3169_v51 = vpop.f32.mrf.mxu1 }
 0x89f   :  { %v4123_v57 = vmul.f32 -1.442695, %v3178_v1  ;;  %v3170_v37 = vadd.f32 %v3169_v51, %v7400_v40  ;;  %v3500_v1 = vadd.f32 1.0, %v5560_v59 }
 0x8a0   :  { %v4635_v5 = vpop.f32.mrf.mxu1 }
 0x8a1   :  { %5577 = vpow2.f32 %v4123_v57  ;;  %v4121_v19 = vmul.f32 -1.442695, %v3170_v37  ;;  %v3181_v29 = vadd.f32 %v4635_v5, %v7401_v15  ;;  %v7168_v37 = vpop.eup %5565  ;;  %v3466_v5 = vadd.f32 %v3441_v38, %v3353_v13 }
 0x8a2   :  { %5579 = vrcp.f32 %v3494_v31  ;;  %v3172_v62 = vpop.f32.mrf.mxu1  ;;  %v7170_v21 = vpop.eup %5567 }
 0x8a3   :  { %5581 = vpow2.f32 %v4121_v19  ;;  %v4124_v24 = vmul.f32 -1.442695, %v3181_v29  ;;  %v3173_v46 = vadd.f32 %v3172_v62, %v7402_v12  ;;  %v7173_v29 = vpop.eup %5569 }
 0x8a4   :  { %5583 = vrcp.f32 %v3499_v60  ;;  %v4638_v55 = vpop.f32.mrf.mxu1  ;;  %v4152_v60 = vmul.f32 -1.442695, %v3468_v9  ;;  %v7175_v59 = vpop.eup %5571  ;;  %v4150_v9 = vmul.f32 -1.442695, %v3466_v5 }
 0x8a5   :  { %5585 = vpow2.f32 %v4124_v24  ;;  %v4122_v52 = vmul.f32 -1.442695, %v3173_v46  ;;  %v3194_v45 = vadd.f32 %v4638_v55, %v7403_v61 }
 0x8a6   :  { %5587 = vpow2.f32 %v4151_v4  ;;  %v3185_v31 = vpop.f32.mrf.mxu1  ;;  %v3498_v4 = vadd.f32 1.0, %v5562_v63 }
 0x8a7   :  { %5589 = vpow2.f32 %v4122_v52  ;;  %v4127_v51 = vmul.f32 -1.442695, %v3194_v45  ;;  %v3186_v57 = vadd.f32 %v3185_v31, %v7404_v34 }
 0x8a8   :  { %5591 = vrcp.f32 %v3497_v50  ;;  %v4639_v11 = vpop.f32.mrf.mxu1  ;;  %v7178_v50 = vpop.eup %5573 }
 0x8a9   :  { %5593 = vpow2.f32 %v4127_v51  ;;  %v4125_v7 = vmul.f32 -1.442695, %v3186_v57  ;;  %v3197_v19 = vadd.f32 %v4639_v11, %v7405_v30  ;;  %v7180_v13 = vpop.eup %5575 }
 0x8aa   :  { %5595 = vrcp.f32 %v3500_v1  ;;  %v3188_v62 = vpop.f32.mrf.mxu1 }
 0x8ab   :  { %5597 = vpow2.f32 %v4125_v7  ;;  %v4128_v24 = vmul.f32 -1.442695, %v3197_v19  ;;  %v3189_v46 = vadd.f32 %v3188_v62, %v7395_v28 }
 0x8ac   :  { %5599 = vpow2.f32 %v4152_v60  ;;  %v4642_v55 = vpop.f32.mrf.mxu1 }
 0x8ad   :  { %5601 = vpow2.f32 %v4128_v24  ;;  %v4126_v38 = vmul.f32 -1.442695, %v3189_v46  ;;  %v3210_v52 = vadd.f32 %v4642_v55, %v6124_v14 }
 0x8ae   :  { %v5578_v45 = vpop.eup %5577  ;;  %5603 = vrcp.f32 %v3498_v4  ;;  %v3201_v63 = vpop.f32.mrf.mxu1 }
 0x8af   :  { %v7183_v1 = vpop.eup %5579  ;;  %v3258_v31 = vadd.f32 1.0, %v5578_v45  ;;  %5605 = vpow2.f32 %v4126_v38  ;;  %v3202_v51 = vadd.f32 %v3201_v63, %v6140_v10 }
 0x8b0   :  { %v5582_v57 = vpop.eup %5581  ;;  %5607 = vpow2.f32 %v4150_v9  ;;  %v4643_v60 = vpop.f32.mrf.mxu1 }
 0x8b1   :  { %v7186_v5 = vpop.eup %5583  ;;  %v3256_v11 = vadd.f32 1.0, %v5582_v57  ;;  %5609 = vtanh.f32 %v3210_v52  ;;  %v3213_v7 = vadd.f32 %v4643_v60, %v6130_v27  ;;  %v3352_v60 = vld [vmem:[#allocation3 + $0x3e0] sm:$0xff] }
 0x8b2   :  { %v5586_v19 = vpop.eup %5585  ;;  %5611 = vrcp.f32 %v3258_v31  ;;  %v3204_v62 = vpop.f32.mrf.mxu1 }
 0x8b3   :  { %v7189_v4 = vpop.eup %5587  ;;  %v3259_v24 = vadd.f32 1.0, %v5586_v19  ;;  %5613 = vtanh.f32 %v3202_v51  ;;  %v3205_v46 = vadd.f32 %v3204_v62, %v6150_v33 }
 0x8b4   :  { %v5590_v55 = vpop.eup %5589  ;;  %5615 = vrcp.f32 %v3256_v11  ;;  %v4646_v38 = vpop.f32.mrf.mxu1 }
 0x8b5   :  { %v7192_v9 = vpop.eup %5591  ;;  %v3257_v45 = vadd.f32 1.0, %v5590_v55  ;;  %5617 = vtanh.f32 %v3213_v7  ;;  %v3226_v52 = vadd.f32 %v4646_v38, %v6134_v36 }
 0x8b6   :  { %v5594_v63 = vpop.eup %5593  ;;  %5619 = vrcp.f32 %v3259_v24  ;;  %v3217_v57 = vpop.f32.mrf.mxu1  ;;  %v3465_v24 = vadd.f32 %v7158_v54, %v3352_v60 }
 0x8b7   :  { %v5596_v31 = vpop.eup %5595  ;;  %v3262_v27 = vadd.f32 1.0, %v5594_v63  ;;  %5621 = vtanh.f32 %v3205_v46  ;;  %v4131_v19 = vmul.f32 -1.442695, %v3226_v52  ;;  %v3218_v51 = vadd.f32 %v3217_v57, %v6160_v42 }
 0x8b8   :  { %v5598_v62 = vpop.eup %5597  ;;  %5623 = vrcp.f32 %v3257_v45  ;;  %v4647_v11 = vpop.f32.mrf.mxu1 }
 0x8b9   :  { %v5600_v33 = vpop.eup %5599  ;;  %5625 = vrcp.f32 %v3262_v27  ;;  %v3260_v10 = vadd.f32 1.0, %v5598_v62  ;;  %v4129_v55 = vmul.f32 -1.442695, %v3218_v51  ;;  %v3229_v7 = vadd.f32 %v4647_v11, %v6138_v53 }
 0x8ba   :  { %v5602_v38 = vpop.eup %5601  ;;  %5627 = vpow2.f32 %v4131_v19  ;;  %v3220_v36 = vpop.f32.mrf.mxu1  ;;  %v4149_v11 = vmul.f32 -1.442695, %v3465_v24 }
 0x8bb   :  { %v5604_v14 = vpop.eup %5603  ;;  %5629 = vrcp.f32 %v3260_v10  ;;  %v3263_v46 = vadd.f32 1.0, %v5602_v38  ;;  %v4132_v52 = vmul.f32 -1.442695, %v3229_v7  ;;  %v3221_v63 = vadd.f32 %v3220_v36, %v6176_v32 }
 0x8bc   :  { %v5606_v57 = vpop.eup %5605  ;;  %5631 = vpow2.f32 %v4129_v55  ;;  %v3548_v10 = vmul.f32 %v5596_v31, %v6994_v58  ;;  %v3552_v36 = vmul.f32 %v7178_v50, %v7175_v59  ;;  %v3536_v38 = vadd.f32 1.0, %v5600_v33 }
 0x8bd   :  { %v7199_v45 = vpop.eup %5607  ;;  %5633 = vrcp.f32 %v3263_v46  ;;  %v3261_v27 = vadd.f32 1.0, %v5606_v57  ;;  %v4130_v51 = vmul.f32 -1.442695, %v3221_v63 }
 0x8be   :  { %v5610_v62 = vpop.eup %5609  ;;  %5635 = vpow2.f32 %v4132_v52  ;;  %v3556_v63 = vadd.f32 %v3552_v36, %v3548_v10 }
 0x8bf   :  { %v5612_v53 = vpop.eup %5611  ;;  %5637 = vrcp.f32 %v3261_v27 }
 0x8c0   :  { %v5614_v54 = vpop.eup %5613  ;;  %5639 = vpow2.f32 %v4130_v51  ;;  %v3314_v27 = vmul.f32 %v5612_v53, %v5610_v62 }
 0x8c1   :  { %v5616_v60 = vpop.eup %5615  ;;  %5641 = vpow2.f32 %v4149_v11  ;;  %v3547_v11 = vmul.f32 %v7186_v5, %v6986_v35 }
 0x8c2   :  { %v5618_v19 = vpop.eup %5617  ;;  %5643 = vrcp.f32 %v3536_v38  ;;  %v3312_v31 = vmul.f32 %v5616_v60, %v5614_v54  ;;  %v3535_v60 = vadd.f32 1.0, %v7189_v4 }
 0x8c3   :  { %v5620_v55 = vpop.eup %5619  ;;  %5645 = vtanh.f32 %v3556_v63 }
 0x8c4   :  { %v5622_v7 = vpop.eup %5621  ;;  %v3315_v38 = vmul.f32 %v5620_v55, %v5618_v19 }
 0x8c5   :  { %v5624_v46 = vpop.eup %5623 }
 0x8c6   :  { %v5626_v57 = vpop.eup %5625  ;;  %v3313_v54 = vmul.f32 %v5624_v46, %v5622_v7 }
 0x8c7   :  { %v5628_v24 = vpop.eup %5627  ;;  %v3310_v52 = vmul.f32 %v5626_v57, %v7038_v26  ;;  %v3551_v26 = vmul.f32 %v7168_v37, %v7165_v25  ;;  %v3534_v57 = vadd.f32 1.0, %v7199_v45 }
 0x8c8   :  { %v5630_v32 = vpop.eup %5629  ;;  %v3298_v51 = vadd.f32 1.0, %v5628_v24 }
 0x8c9   :  { %v5632_v58 = vpop.eup %5631  ;;  %v7206_v59 = vadd.f32 %v3314_v27, %v3310_v52  ;;  %v3308_v50 = vmul.f32 %v5630_v32, %v7042_v18  ;;  %v3546_v32 = vmul.f32 %v5604_v14, %v6998_v0  ;;  %v3550_v18 = vmul.f32 %v7183_v1, %v7180_v13  ;;  %v7419_v13 = vld [vmem:[#allocation10_spill] sm:$0xff] }
 0x8ca   :  { %v5634_v33 = vpop.eup %5633  ;;  %5647 = vrcp.f32 %v3298_v51  ;;  %v3296_v53 = vadd.f32 1.0, %v5632_v58  ;;  %v3555_v19 = vadd.f32 %v3551_v26, %v3547_v11  ;;  %v3545_v1 = vmul.f32 %v7192_v9, %v7419_v13 }
 0x8cb   :  { %v5636_v62 = vpop.eup %5635  ;;  %5649 = vtanh.f32 %v7206_v59  ;;  %v7214_v10 = vadd.f32 %v3312_v31, %v3308_v50  ;;  %v3311_v36 = vmul.f32 %v5634_v33, %v7046_v44  ;;  %v3549_v44 = vmul.f32 %v7173_v29, %v7170_v21 }
 0x8cc   :  { %v5638_v63 = vpop.eup %5637  ;;  %5651 = vrcp.f32 %v3296_v53  ;;  %v3299_v35 = vadd.f32 1.0, %v5636_v62  ;;  %v3329_v21 = vsel %vm3328_vm14, 1, %v7380_v16 }
 0x8cd   :  { %v5640_v5 = vpop.eup %5639  ;;  %5653 = vtanh.f32 %v7214_v10  ;;  %v7221_v25 = vadd.f32 %v3315_v38, %v3311_v36  ;;  %v3309_v37 = vmul.f32 %v5638_v63, %v7056_v49  ;;  %v3554_v49 = vadd.f32 %v3550_v18, %v3546_v32 }
 0x8ce   :  { %5655 = vrcp.f32 %v3299_v35  ;;  %v3297_v14 = vadd.f32 1.0, %v5640_v5  ;;  %v5642_v0 = vpop.eup %5641  ;;  %v3553_v4 = vadd.f32 %v3549_v44, %v3545_v1  ;;  %v3333_v9 = vrot.slane %v3329_v21, %v6372_v43 }
 0x8cf   :  { %5657 = vtanh.f32 %v7221_v25  ;;  %v7230_v55 = vadd.f32 %v3313_v54, %v3309_v37  ;;  %v3533_v29 = vadd.f32 1.0, %v5642_v0  ;;  %v5644_v7 = vpop.eup %5643 }
 0x8d0   :  { %5659 = vrcp.f32 %v3297_v14  ;;  %v5646_v46 = vpop.eup %5645  ;;  %vm7238_vm15 = vcmp.eq.s32.totalorder %v3333_v9, 1 }
 0x8d1   :  { %5661 = vtanh.f32 %v7230_v55  ;;  %v3564_v44 = vmul.f32 %v5646_v46, %v5644_v7 }
 0x8d2   :  { %5663 = vrcp.f32 %v3535_v60 }
 0x8d3   :  { %5665 = vtanh.f32 %v3555_v19 }
 0x8d4   :  { %5667 = vrcp.f32 %v3534_v57 }
 0x8d5   :  { %5669 = vtanh.f32 %v3554_v49 }
 0x8d6   :  { %5671 = vrcp.f32 %v3533_v29 }
 0x8d7   :  { %v5648_v45 = vpop.eup %5647  ;;  %5673 = vtanh.f32 %v3553_v4 }
 0x8d8   :  { %v5650_v24 = vpop.eup %5649 }
 0x8d9   :  { %v5652_v27 = vpop.eup %5651  ;;  %v7242_v51 = vmul.f32 %v5650_v24, %v5648_v45 }
 0x8da   :  { %v5654_v58 = vpop.eup %5653 }
 0x8db   :  { %v5656_v50 = vpop.eup %5655  ;;  %v3337_v31 = vsel %vm7238_vm15, %v7242_v51, %v7074_v20  ;;  %v7248_v33 = vmul.f32 %v5654_v58, %v5652_v27 }
 0x8dc   :  { %v5658_v11 = vpop.eup %5657 }
 0x8dd   :  { %v5660_v26 = vpop.eup %5659  ;;  %v7250_v53 = vmul.f32 %v5658_v11, %v5656_v50  ;;  %v3335_v62 = vsel %vm7238_vm15, %v7248_v33, %v7083_v41 }
 0x8de   :  { %v5662_v36 = vpop.eup %5661 }
 0x8df   :  { %v5664_v38 = vpop.eup %5663  ;;  %v3338_v63 = vsel %vm7238_vm15, %v7250_v53, %v7092_v8  ;;  %v3568_v32 = vpack.c.bf16 %v7250_v53, %v7242_v51  ;;  %v7262_v18 = vmul.f32 %v5662_v36, %v5660_v26 }
 0x8e0   :  { %v5666_v35 = vpop.eup %5665 }
 0x8e1   :  { %v5668_v5 = vpop.eup %5667  ;;  %4668 = vmatprep.subr.bf16.mxu1 %v3568_v32  ;;  %v3336_v37 = vsel %vm7238_vm15, %v7262_v18, %v7101_v39  ;;  %v3567_v54 = vpack.c.bf16 %v7262_v18, %v7248_v33  ;;  %v3563_v0 = vmul.f32 %v5666_v35, %v5664_v38  ;;  %v7422_v38 = vld [vmem:[#allocation16_spill] sm:$0xff] }
 0x8e2   :  { %v5670_v60 = vpop.eup %5669  ;;  %4669 = vmatpush3.bf16.msra.mxu1 %v3568_v32 }
 0x8e3   :  { %v5672_v14 = vpop.eup %5671  ;;  %4670 = vmatprep.subr.bf16.mxu1 %v3567_v54  ;;  %v3566_v13 = vpack.c.bf16 %v3564_v44, %v3563_v0  ;;  %v3562_v1 = vmul.f32 %v5670_v60, %v5668_v5 }
 0x8e4   :  { %v5674_v19 = vpop.eup %5673 }
 0x8e5   :  { %v3561_v57 = vmul.f32 %v5674_v19, %v5672_v14 }
 0x8e6   :  { %4671 = vmatpush3.bf16.msra.mxu1 %v3567_v54 }
 0x8e7   :  { %4672 = vmatprep.subr.bf16.mxu1 %v3566_v13  ;;  %v3565_v49 = vpack.c.bf16 %v3562_v1, %v3561_v57  ;;  %v7425_v1 = vld [vmem:[#allocation21_spill] sm:$0xff] }
 0x8ea   :  { %4673 = vmatpush3.bf16.msra.mxu1 %v3566_v13 }
 0x8eb   :  { %4674 = vmatprep.subr.bf16.mxu1 %v3565_v49 }
 0x8ee   :  { %4675 = vmatpush3.bf16.msra.mxu1 %v3565_v49 }
 0x8f1   :  { %4677 = vmatmul.mubr.msk.bf16.vlgmr.msra.gmra.mxu1 %vm506_vm1, %v7110_v56 }
 0x8f2   :  { %4680 = vmatprep.mubr.msk.bf16.mxu1 %vm506_vm1, %v7117_v22 }
 0x8f9   :  { %4681 = vmatmul.mubr.msk.bf16.gmra.mxu1 %vm506_vm1, %v7124_v17 }
 0x8fa   :  { %4684 = vmatprep.mubr.msk.bf16.mxu1 %vm506_vm1, %v7131_v3 }
 0x901   :  { %4685 = vmatmul.mubr.msk.bf16.gmra.mxu1 %vm506_vm1, %v7138_v2 }
 0x902   :  { %4688 = vmatprep.mubr.msk.bf16.mxu1 %vm506_vm1, %v7145_v23 }
 0x909   :  { %4689 = vmatmul.mubr.msk.bf16.gmra.mxu1 %vm506_vm1, %v7152_v48 }
 0x9b1   :  { %v4678_v21 = vpop.f32.mrf.mxu1 }
 0x9b2   :  { %v3612_v56 = vadd.f32 %v4678_v21, %v6092_v6 }
 0x9b3   :  { %v3603_v29 = vpop.f32.mrf.mxu1 }
 0x9b4   :  { %v4163_v22 = vmul.f32 -1.442695, %v3612_v56  ;;  %v3604_v4 = vadd.f32 %v3603_v29, %v7400_v40  ;;  %v7426_v29 = vld [vmem:[#allocation18_spill] sm:$0xff] }
 0x9b5   :  { %v4679_v17 = vpop.f32.mrf.mxu1 }
 0x9b6   :  { %5675 = vpow2.f32 %v4163_v22  ;;  %v4161_v9 = vmul.f32 -1.442695, %v3604_v4  ;;  %v3615_v3 = vadd.f32 %v4679_v17, %v7401_v15 }
 0x9b7   :  { %v3606_v7 = vpop.f32.mrf.mxu1 }
 0x9b8   :  { %5677 = vpow2.f32 %v4161_v9  ;;  %v4164_v2 = vmul.f32 -1.442695, %v3615_v3  ;;  %v3607_v23 = vadd.f32 %v3606_v7, %v7402_v12 }
 0x9b9   :  { %v4682_v46 = vpop.f32.mrf.mxu1 }
 0x9ba   :  { %5679 = vpow2.f32 %v4164_v2  ;;  %v4162_v48 = vmul.f32 -1.442695, %v3607_v23  ;;  %v3628_v45 = vadd.f32 %v4682_v46, %v7403_v61 }
 0x9bb   :  { %v3619_v6 = vpop.f32.mrf.mxu1 }
 0x9bc   :  { %5681 = vpow2.f32 %v4162_v48  ;;  %v4167_v24 = vmul.f32 -1.442695, %v3628_v45  ;;  %v3620_v40 = vadd.f32 %v3619_v6, %v7404_v34  ;;  %v7423_v34 = vld [vmem:[#allocation20_spill] sm:$0xff]  ;;  %v7427_v45 = vld [vmem:[#allocation19_spill] sm:$0xff] }
 0x9bd   :  { %v4683_v27 = vpop.f32.mrf.mxu1 }
 0x9be   :  { %5683 = vpow2.f32 %v4167_v24  ;;  %v4165_v58 = vmul.f32 -1.442695, %v3620_v40  ;;  %v3631_v15 = vadd.f32 %v4683_v27, %v7405_v30  ;;  %v7424_v30 = vld [vmem:[#allocation17_spill] sm:$0xff] }
 0x9bf   :  { %v3622_v50 = vpop.f32.mrf.mxu1 }
 0x9c0   :  { %5685 = vpow2.f32 %v4165_v58  ;;  %v4168_v11 = vmul.f32 -1.442695, %v3631_v15  ;;  %v3623_v12 = vadd.f32 %v3622_v50, %v7395_v28  ;;  %v7428_v15 = vld [vmem:[#allocation22_spill] sm:$0xff] }
 0x9c1   :  { %v4686_v26 = vpop.f32.mrf.mxu1 }
 0x9c2   :  { %5687 = vpow2.f32 %v4168_v11  ;;  %v4166_v36 = vmul.f32 -1.442695, %v3623_v12  ;;  %v3644_v61 = vadd.f32 %v4686_v26, %v7422_v38 }
 0x9c3   :  { %v5676_v32 = vpop.eup %5675  ;;  %v3635_v35 = vpop.f32.mrf.mxu1 }
 0x9c4   :  { %v3692_v5 = vadd.f32 1.0, %v5676_v32  ;;  %5689 = vpow2.f32 %v4166_v36  ;;  %v3636_v54 = vadd.f32 %v3635_v35, %v7423_v34 }
 0x9c5   :  { %v5678_v44 = vpop.eup %5677  ;;  %v4687_v60 = vpop.f32.mrf.mxu1  ;;  %5691 = vtanh.f32 %v3644_v61 }
 0x9c6   :  { %v3690_v14 = vadd.f32 1.0, %v5678_v44  ;;  %v3647_v0 = vadd.f32 %v4687_v60, %v7424_v30  ;;  %5693 = vrcp.f32 %v3692_v5 }
 0x9c7   :  { %v5680_v19 = vpop.eup %5679  ;;  %v3638_v28 = vpop.f32.mrf.mxu1  ;;  %5695 = vtanh.f32 %v3636_v54 }
 0x9c8   :  { %v3693_v13 = vadd.f32 1.0, %v5680_v19  ;;  %v3639_v57 = vadd.f32 %v3638_v28, %v7425_v1  ;;  %5697 = vrcp.f32 %v3690_v14 }
 0x9c9   :  { %v5682_v49 = vpop.eup %5681  ;;  %v4690_v21 = vpop.f32.mrf.mxu1  ;;  %5699 = vtanh.f32 %v3647_v0 }
 0x9ca   :  { %v3691_v56 = vadd.f32 1.0, %v5682_v49  ;;  %v3660_v22 = vadd.f32 %v4690_v21, %v7426_v29  ;;  %5701 = vrcp.f32 %v3693_v13 }
 0x9cb   :  { %v5684_v4 = vpop.eup %5683  ;;  %v3651_v17 = vpop.f32.mrf.mxu1  ;;  %5703 = vtanh.f32 %v3639_v57 }
 0x9cc   :  { %v3696_v9 = vadd.f32 1.0, %v5684_v4  ;;  %v4171_v3 = vmul.f32 -1.442695, %v3660_v22  ;;  %v3652_v7 = vadd.f32 %v3651_v17, %v6160_v42  ;;  %5705 = vrcp.f32 %v3691_v56 }
 0x9cd   :  { %v5686_v2 = vpop.eup %5685  ;;  %v4691_v23 = vpop.f32.mrf.mxu1 }
 0x9ce   :  { %5707 = vrcp.f32 %v3696_v9  ;;  %v3694_v46 = vadd.f32 1.0, %v5686_v2  ;;  %v4169_v48 = vmul.f32 -1.442695, %v3652_v7  ;;  %v3663_v6 = vadd.f32 %v4691_v23, %v7427_v45 }
 0x9cf   :  { %v5688_v24 = vpop.eup %5687  ;;  %5709 = vpow2.f32 %v4171_v3  ;;  %v3654_v40 = vpop.f32.mrf.mxu1 }
 0x9d0   :  { %5711 = vrcp.f32 %v3694_v46  ;;  %v3697_v27 = vadd.f32 1.0, %v5688_v24  ;;  %v4172_v58 = vmul.f32 -1.442695, %v3663_v6  ;;  %v3655_v50 = vadd.f32 %v3654_v40, %v7428_v15 }
 0x9d1   :  { %v5690_v11 = vpop.eup %5689  ;;  %5713 = vpow2.f32 %v4169_v48 }
 0x9d2   :  { %5715 = vrcp.f32 %v3697_v27  ;;  %v3695_v42 = vadd.f32 1.0, %v5690_v11  ;;  %v4170_v12 = vmul.f32 -1.442695, %v3655_v50  ;;  %v5692_v26 = vpop.eup %5691  ;;  %v3785_v11 = vpop.permute.xlu1 %3784 }
 0x9d3   :  { %5717 = vpow2.f32 %v4172_v58  ;;  %v5694_v36 = vpop.eup %5693  ;;  %v3780_v58 = vpop.permute.xlu0 %3779 }
 0x9d4   :  { %5719 = vrcp.f32 %v3695_v42  ;;  %v5696_v38 = vpop.eup %5695  ;;  %v3748_v14 = vmul.f32 %v5694_v36, %v5692_v26 }
 0x9d5   :  { %5721 = vpow2.f32 %v4170_v12  ;;  %v5698_v61 = vpop.eup %5697 }
 0x9d6   :  { %v5700_v32 = vpop.eup %5699  ;;  %v3746_v1 = vmul.f32 %v5698_v61, %v5696_v38 }
 0x9d7   :  { %v5702_v35 = vpop.eup %5701  ;;  %v3790_v61 = vpop.permute.xlu0 %3789 }
 0x9d8   :  { %v5704_v5 = vpop.eup %5703  ;;  %v3749_v22 = vmul.f32 %v5702_v35, %v5700_v32  ;;  %v3795_v32 = vpop.permute.xlu1 %3794 }
 0x9d9   :  { %v5706_v34 = vpop.eup %5705 }
 0x9da   :  { %v3747_v7 = vmul.f32 %v5706_v34, %v5704_v5 }
 0x9db   :  { %v5708_v54 = vpop.eup %5707  ;;  %v3814_v51 = vpop.permute.xlu0 %3813 }
 0x9dc   :  { %v5710_v44 = vpop.eup %5709  ;;  %v3744_v60 = vmul.f32 %v5708_v54, %v7206_v59  ;;  %v3819_v52 = vrot.slane %v3814_v51, %v6372_v43 }
 0x9dd   :  { %v5712_v30 = vpop.eup %5711  ;;  %v3732_v0 = vadd.f32 1.0, %v5710_v44 }
 0x9de   :  { %v5714_v19 = vpop.eup %5713  ;;  %v3752_v28 = vadd.f32 %v3748_v14, %v3744_v60  ;;  %v3742_v13 = vmul.f32 %v5712_v30, %v7214_v10 }
 0x9df   :  { %v5716_v57 = vpop.eup %5715  ;;  %5723 = vrcp.f32 %v3732_v0  ;;  %v3730_v49 = vadd.f32 1.0, %v5714_v19 }
 0x9e0   :  { %v5718_v21 = vpop.eup %5717  ;;  %5725 = vtanh.f32 %v3752_v28  ;;  %v3750_v56 = vadd.f32 %v3746_v1, %v3742_v13  ;;  %v3745_v29 = vmul.f32 %v5716_v57, %v7221_v25  ;;  %v3763_v25 = vsel %vm3762_vm0, 1, %v7380_v16 }
 0x9e1   :  { %v5720_v4 = vpop.eup %5719  ;;  %5727 = vrcp.f32 %v3730_v49  ;;  %v3733_v59 = vadd.f32 1.0, %v5718_v21  ;;  %v3767_v6 = vrot.slane %v3763_v25, %v6372_v43 }
 0x9e2   :  { %v5722_v17 = vpop.eup %5721  ;;  %5729 = vtanh.f32 %v3750_v56  ;;  %v3753_v9 = vadd.f32 %v3749_v22, %v3745_v29  ;;  %v3743_v3 = vmul.f32 %v5720_v4, %v7230_v55 }
 0x9e3   :  { %5731 = vrcp.f32 %v3733_v59  ;;  %v3731_v10 = vadd.f32 1.0, %v5722_v17  ;;  %vm3768_vm1 = vcmp.eq.s32.totalorder %v3767_v6, 1 }
 0x9e4   :  { %5733 = vtanh.f32 %v3753_v9  ;;  %v3751_v2 = vadd.f32 %v3747_v7, %v3743_v3 }
 0x9e5   :  { %5735 = vrcp.f32 %v3731_v10 }
 0x9e6   :  { %5737 = vtanh.f32 %v3751_v2 }
 0x9ec   :  { %v5724_v23 = vpop.eup %5723 }
 0x9ed   :  { %v5726_v46 = vpop.eup %5725 }
 0x9ee   :  { %v5728_v48 = vpop.eup %5727  ;;  %v3760_v15 = vmul.f32 %v5726_v46, %v5724_v23 }
 0x9ef   :  { %v5730_v45 = vpop.eup %5729 }
 0x9f0   :  { %v5732_v24 = vpop.eup %5731  ;;  %v3758_v40 = vmul.f32 %v5730_v45, %v5728_v48  ;;  %v3771_v26 = vsel %vm3768_vm1, %v3760_v15, %v3337_v31 }
 0x9f1   :  { %v5734_v55 = vpop.eup %5733  ;;  %v3799_v33 = vmul.f32 %v3790_v61, %v3771_v26 }
 0x9f2   :  { %v5736_v27 = vpop.eup %5735  ;;  %v3761_v12 = vmul.f32 %v5734_v55, %v5732_v24  ;;  %v3769_v16 = vsel %vm3768_vm1, %v3758_v40, %v3335_v62 }
 0x9f3   :  { %v5738_v50 = vpop.eup %5737  ;;  %v3797_v36 = vmul.f32 %v3780_v58, %v3769_v16 }
 0x9f4   :  { %v3759_v42 = vmul.f32 %v5738_v50, %v5736_v27  ;;  %v3772_v41 = vsel %vm3768_vm1, %v3761_v12, %v3338_v63 }
 0x9f5   :  { %v3800_v39 = vmul.f32 %v3795_v32, %v3772_v41 }
 0x9f6   :  { %v3770_v47 = vsel %vm3768_vm1, %v3759_v42, %v3336_v37 }
 0x9f7   :  { %v3798_v38 = vmul.f32 %v3785_v11, %v3770_v47 }
 0x9f9   :  { %v3801_v62 = vadd.f32 %v3798_v38, %v3797_v36 }
 0x9fb   :  { %v3802_v18 = vadd.f32 %v3801_v62, %v3799_v33 }
 0x9fd   :  { %v3803_v37 = vadd.f32 %v3802_v18, %v3800_v39 }
 0x9ff   :  { %v3804_v35 = vrot.slane %v3803_v37, 4 }
 0xa01   :  { %v3805_v5 = vadd.f32 %v3804_v35, %v3803_v37 }
 0xa03   :  { %v3806_v34 = vrot.slane %v3805_v5, 2 }
 0xa05   :  { %v3807_v20 = vadd.f32 %v3806_v34, %v3805_v5 }
 0xa07   :  { %v3808_v31 = vrot.slane %v3807_v20, 1 }
 0xa09   :  { %v3809_v54 = vadd.f32 %v3808_v31, %v3807_v20 }
 0xa0b   :  { %v3820_v44 = vadd.f32 %v3819_v52, %v3809_v54 }
 0xa0d   :  { %3821 = vst [vmem:[#allocation6] sm:$0x1] %v3820_v44 }
 0xa0e   :  { %5820 = shalt.err (!%p5817_p9)
}
 0xa0f   :  { %3831 = dma.vmem_to_hbm [thread:$0]  %s3829_s20, 16, %s7338_s7, [#allocation5]  }
 0xa10   :  { %5831 = dma.done.wait [#allocation5], 16  }
 0xa11   :  { %5832 = vsyncadd [#allocation5], 4294967280 }
 0xa12   :  { %3835 = vsyncpa [#allocation4], 1 }
 0xa13   :  { %3836 = vsyncpa [#allocation5], 1 }

</bundles_post_ra>
